<compile_context>
chip_gen: v7x
topology: tpu7x:2x2x1
jax: 0.10.0
libtpu: 0.0.40
codegen_flags: <defaults>
</compile_context>

<pallas_src>
import functools

import numpy as np

import jax
import jax.numpy as jnp
from jax.experimental import pallas as pl
from jax.experimental.pallas import tpu as pltpu


def _boundary_masks(n, h, w):
    """0/1 masks (9, n*h*w): is tap (dy, dx) in-bounds at output pixel (y, x)."""
    p = np.arange(n * h * w)
    y = (p // w) % h
    x = p % w
    m = np.zeros((9, n * h * w), np.float32)
    for dy in range(3):
        for dx in range(3):
            ok = ((y + dy - 1 >= 0) & (y + dy - 1 < h) &
                  (x + dx - 1 >= 0) & (x + dx - 1 < w))
            m[dy * 3 + dx] = ok.astype(np.float32)
    return m


# Static slice bounds inside the packed per-channel parameter column
# [g1(16) be1(16) g2(32) be2(32) g3(16) be3(16) b4(1)] -> (129, 1).
_G1, _BE1 = (0, 16), (16, 32)
_G2, _BE2 = (32, 64), (64, 96)
_G3, _BE3 = (96, 112), (112, 128)
_B4 = (128, 129)


def _fused_cnn_kernel(x_ref, masks_ref, w1_ref, w2_ref, w3_ref, w4_ref,
                      p_ref, out_ref, xbuf_ref, *, img_w, img_pix, n_img,
                      c_in, n_pix, eps):
    """Whole network, fully VMEM resident.  No grid.

    x_ref     : (N*Cin, H*W)  raw input, free reshape of NCHW
    masks_ref : (9, P)        per-tap 'same'-padding validity masks
    w1/2/3_ref: (9, Cout, Cin) per-tap conv weights (Cin of layer 1 padded to 8)
    w4_ref    : (1, 16)       final 1x1 conv weight
    p_ref     : (129, 1)      packed [g1 be1 g2 be2 g3 be3 b4]
    out_ref   : (1, P)        lane-dense output
    xbuf_ref  : (8, P)        scratch holding the channel-major input
    """
    inv_n = 1.0 / float(n_pix)
    ones_col = jnp.ones((n_pix, 1), jnp.float32)

    # --- prologue: (N*C, H*W) -> channel-major (8, P), zero-padded channels.
    xbuf_ref[...] = jnp.zeros_like(xbuf_ref)
    for n in range(n_img):
        for c in range(c_in):
            xbuf_ref[c:c + 1, n * img_pix:(n + 1) * img_pix] = (
                x_ref[n * c_in + c:n * c_in + c + 1, :])

    def conv3x3_bn_relu(act, w_ref, gamma, beta):
        # 9 per-tap matmuls accumulated in a single add chain (no im2col).
        acc = None
        for dy in range(3):
            for dx in range(3):
                t = dy * 3 + dx
                off = (dy - 1) * img_w + (dx - 1)  # tap shift in flat pixels
                if off == 0:
                    tap = act                       # center tap always valid
                else:
                    tap = (pltpu.roll(act, (-off) % n_pix, axis=1)
                           * masks_ref[t:t + 1, :])
                contrib = jnp.dot(w_ref[t], tap,
                                  preferred_element_type=jnp.float32)
                acc = contrib if acc is None else acc + contrib
        conv = acc                                            # (cout, P)

        # Training-mode BatchNorm2d: one-pass batch stats over N*H*W, summed
        # on the (idle) MXU via dots against a ones column.
        # (Conv bias omitted on purpose: it cancels exactly in (x - mean).)
        s1 = jnp.dot(conv, ones_col, preferred_element_type=jnp.float32)
        s2 = jnp.dot(conv * conv, ones_col,
                     preferred_element_type=jnp.float32)      # (cout, 1)
        mean = s1 * inv_n
        var = jnp.maximum(s2 * inv_n - mean * mean, 0.0)      # biased var
        scale = gamma * jax.lax.rsqrt(var + eps)
        bias = beta - mean * scale
        return jnp.maximum(conv * scale + bias, 0.0)          # ReLU

    g1, be1 = p_ref[_G1[0]:_G1[1], :], p_ref[_BE1[0]:_BE1[1], :]
    g2, be2 = p_ref[_G2[0]:_G2[1], :], p_ref[_BE2[0]:_BE2[1], :]
    g3, be3 = p_ref[_G3[0]:_G3[1], :], p_ref[_BE3[0]:_BE3[1], :]
    b4 = p_ref[_B4[0]:_B4[1], :]

    act = xbuf_ref[...]                                       # (8, P)
    act = conv3x3_bn_relu(act, w1_ref, g1, be1)               # (16, P)
    act = conv3x3_bn_relu(act, w2_ref, g2, be2)               # (32, P)
    act = conv3x3_bn_relu(act, w3_ref, g3, be3)               # (16, P)

    # Final 1x1 conv (no BN, keep its bias): single matmul + broadcast add.
    out_ref[...] = (jnp.dot(w4_ref[...], act,
                            preferred_element_type=jnp.float32) + b4)


@jax.jit
def cnn_model_forward(x_nchw, params):
    """Equivalent of CnnModel.forward. x_nchw: (N, 3, H, W) -> (N, 1, H, W)."""
    N, C, H, W = x_nchw.shape
    HW = H * W
    P = N * HW
    CIN_PAD = 8  # pad first-layer channels 3 -> 8 for sublane alignment

    # Free reshape (zero-copy) -- the channel-major reassembly happens in-kernel.
    x_in = x_nchw.reshape(N * C, HW)

    # Host-side weight packing to (9, Cout, Cin): each tap is an aligned
    # leading-index slice.  Tap order (dy, dx) matches the kernel loop.
    def tap_w(w, cin_pad=None):
        kh, kw, cin, cout = w.shape
        if cin_pad is not None and cin_pad > cin:
            w = jnp.pad(w, ((0, 0), (0, 0), (0, cin_pad - cin), (0, 0)))
            cin = cin_pad
        return jnp.transpose(w, (0, 1, 3, 2)).reshape(kh * kw, cout, cin)

    w1t = tap_w(params["w1"], CIN_PAD)                        # (9, 16, 8)
    w2t = tap_w(params["w2"])                                 # (9, 32, 16)
    w3t = tap_w(params["w3"])                                 # (9, 16, 32)
    w4f = jnp.transpose(params["w4"], (3, 0, 1, 2)).reshape(1, 16)

    # Pack all tiny per-channel params into one operand (one DMA descriptor).
    # NOTE: b1/b2/b3 are intentionally not passed: pre-BN conv bias cancels
    # exactly under training-mode batch statistics.
    packed = jnp.concatenate(
        [params["g1"], params["be1"], params["g2"], params["be2"],
         params["g3"], params["be3"], params["b4"]]).reshape(-1, 1)  # (129,1)

    masks = jnp.asarray(_boundary_masks(N, H, W))             # (9, P)

    kern = functools.partial(_fused_cnn_kernel, img_w=W, img_pix=HW,
                             n_img=N, c_in=C, n_pix=P, eps=1e-5)
    vmem = pl.BlockSpec(memory_space=pltpu.MemorySpace.VMEM)
    out_flat = pl.pallas_call(
        kern,
        out_shape=jax.ShapeDtypeStruct((1, P), jnp.float32),
        in_specs=[vmem] * 7,
        out_specs=vmem,
        scratch_shapes=[pltpu.VMEM((CIN_PAD, P), jnp.float32)],  # input buffer
    )(x_in, masks, w1t, w2t, w3t, w4f, packed)

    # C_out == 1, so the NCHW output is a plain zero-copy reshape.
    return out_flat.reshape(N, 1, H, W)


@jax.jit
def _reference_forward(x, params, eps=1e-5):
    """Pure-XLA reference with the exact torch training-mode semantics."""
    def conv(x, w, b):
        y = jax.lax.conv_general_dilated(
            x, w, window_strides=(1, 1), padding="SAME",
            dimension_numbers=("NCHW", "HWIO", "NCHW"))
        return y + b.reshape(1, -1, 1, 1)

    def bn_relu(y, g, be):
        mean = jnp.mean(y, axis=(0, 2, 3), keepdims=True)
        var = jnp.mean(jnp.square(y - mean), axis=(0, 2, 3), keepdims=True)
        y = ((y - mean) * jax.lax.rsqrt(var + eps) * g.reshape(1, -1, 1, 1)
             + be.reshape(1, -1, 1, 1))
        return jnp.maximum(y, 0.0)

    y = bn_relu(conv(x, params["w1"], params["b1"]), params["g1"], params["be1"])
    y = bn_relu(conv(y, params["w2"], params["b2"]), params["g2"], params["be2"])
    y = bn_relu(conv(y, params["w3"], params["b3"]), params["g3"], params["be3"])
    return conv(y, params["w4"], params["b4"])


def init_params(key):
    """Deterministic synthetic parameters matching the torch module's shapes."""
    keys = jax.random.split(key, 4)

    def conv_init(k, ksz, cin, cout):
        kw_, kb = jax.random.split(k)
        fan_in = cin * ksz * ksz
        w = jax.random.normal(kw_, (ksz, ksz, cin, cout), jnp.float32)
        w = w * (1.0 / jnp.sqrt(jnp.float32(fan_in)))
        b = jax.random.normal(kb, (cout,), jnp.float32) * 0.01
        return w, b

    p = {}
    p["w1"], p["b1"] = conv_init(keys[0], 3, 3, 16)    # Conv2d(3, 16, 3)
    p["w2"], p["b2"] = conv_init(keys[1], 3, 16, 32)   # Conv2d(16, 32, 3)
    p["w3"], p["b3"] = conv_init(keys[2], 3, 32, 16)   # Conv2d(32, 16, 3)
    p["w4"], p["b4"] = conv_init(keys[3], 1, 16, 1)    # Conv2d(16, 1, 1)
    # BatchNorm2d affine params, PyTorch default init: weight=1, bias=0.
    for i, c in zip((1, 2, 3), (16, 32, 16)):
        p[f"g{i}"] = jnp.ones((c,), jnp.float32)
        p[f"be{i}"] = jnp.zeros((c,), jnp.float32)
    return p


if __name__ == "__main__":
    key = jax.random.PRNGKey(0)
    kx, kp = jax.random.split(key)

    # PyTorch-convention NCHW input: batch=2, channels=3 (fixed by the model),
    # spatial 16x16.
    x = jax.random.normal(kx, (2, 3, 16, 16), jnp.float32)
    params = init_params(kp)

    out = cnn_model_forward(x, params)
    out = jax.block_until_ready(out)
    assert out.shape == (2, 1, 16, 16), out.shape
    assert out.dtype == jnp.float32

    # Cross-check the fused kernel against the pure-XLA reference.
    ref = jax.block_until_ready(_reference_forward(x, params))
    max_err = float(jnp.max(jnp.abs(out - ref)))
    assert max_err < 2e-3, f"max abs error vs reference: {max_err}"

    print("KERNEL_OK")
</pallas_src>

<mosaic_0001>
module attributes {stable_mosaic.version = 11 : i64} {
  func.func @_fused_cnn_kernel(%arg0: memref<6x256xf32, #tpu.memory_space<vmem>>, %arg1: memref<9x512xf32, #tpu.memory_space<vmem>>, %arg2: memref<9x16x8xf32, #tpu.memory_space<vmem>>, %arg3: memref<9x32x16xf32, #tpu.memory_space<vmem>>, %arg4: memref<9x16x32xf32, #tpu.memory_space<vmem>>, %arg5: memref<1x16xf32, #tpu.memory_space<vmem>>, %arg6: memref<129x1xf32, #tpu.memory_space<vmem>>, %arg7: memref<1x512xf32, #tpu.memory_space<vmem>>, %arg8: memref<8x512xf32, #tpu.memory_space<vmem>>) attributes {dimension_semantics = [], scalar_prefetch = 0 : i64, scratch_operands = 1 : i64, tpu.core_type = #tpu.core_type<tc>} {
    %cst = arith.constant 1.000000e+00 : f32
    %0 = vector.broadcast %cst : f32 to vector<512x1xf32>
    %cst_0 = arith.constant 0.000000e+00 : f32
    %1 = vector.broadcast %cst_0 : f32 to vector<8x512xf32>
    %c0 = arith.constant 0 : index
    %c0_1 = arith.constant 0 : index
    %2 = vector.load %arg8[%c0, %c0_1] : memref<8x512xf32, #tpu.memory_space<vmem>>, vector<8x512xf32>
    tpu.vector_store %arg8[%c0, %c0_1], %1 {strides = array<i32>} : memref<8x512xf32, #tpu.memory_space<vmem>>, vector<8x512xf32>,
    %c0_2 = arith.constant 0 : index
    %c0_3 = arith.constant 0 : index
    %3 = vector.load %arg0[%c0_2, %c0_3] : memref<6x256xf32, #tpu.memory_space<vmem>>, vector<1x256xf32>
    %c0_4 = arith.constant 0 : index
    %c0_5 = arith.constant 0 : index
    %4 = vector.load %arg8[%c0_4, %c0_5] : memref<8x512xf32, #tpu.memory_space<vmem>>, vector<1x256xf32>
    tpu.vector_store %arg8[%c0_4, %c0_5], %3 {strides = array<i32>} : memref<8x512xf32, #tpu.memory_space<vmem>>, vector<1x256xf32>,
    %c1 = arith.constant 1 : index
    %c0_6 = arith.constant 0 : index
    %5 = vector.load %arg0[%c1, %c0_6] : memref<6x256xf32, #tpu.memory_space<vmem>>, vector<1x256xf32>
    %c1_7 = arith.constant 1 : index
    %c0_8 = arith.constant 0 : index
    %6 = vector.load %arg8[%c1_7, %c0_8] : memref<8x512xf32, #tpu.memory_space<vmem>>, vector<1x256xf32>
    tpu.vector_store %arg8[%c1_7, %c0_8], %5 {strides = array<i32>} : memref<8x512xf32, #tpu.memory_space<vmem>>, vector<1x256xf32>,
    %c2 = arith.constant 2 : index
    %c0_9 = arith.constant 0 : index
    %7 = vector.load %arg0[%c2, %c0_9] : memref<6x256xf32, #tpu.memory_space<vmem>>, vector<1x256xf32>
    %c2_10 = arith.constant 2 : index
    %c0_11 = arith.constant 0 : index
    %8 = vector.load %arg8[%c2_10, %c0_11] : memref<8x512xf32, #tpu.memory_space<vmem>>, vector<1x256xf32>
    tpu.vector_store %arg8[%c2_10, %c0_11], %7 {strides = array<i32>} : memref<8x512xf32, #tpu.memory_space<vmem>>, vector<1x256xf32>,
    %c3 = arith.constant 3 : index
    %c0_12 = arith.constant 0 : index
    %9 = vector.load %arg0[%c3, %c0_12] : memref<6x256xf32, #tpu.memory_space<vmem>>, vector<1x256xf32>
    %c0_13 = arith.constant 0 : index
    %c256 = arith.constant 256 : index
    %10 = vector.load %arg8[%c0_13, %c256] : memref<8x512xf32, #tpu.memory_space<vmem>>, vector<1x256xf32>
    tpu.vector_store %arg8[%c0_13, %c256], %9 {strides = array<i32>} : memref<8x512xf32, #tpu.memory_space<vmem>>, vector<1x256xf32>,
    %c4 = arith.constant 4 : index
    %c0_14 = arith.constant 0 : index
    %11 = vector.load %arg0[%c4, %c0_14] : memref<6x256xf32, #tpu.memory_space<vmem>>, vector<1x256xf32>
    %c1_15 = arith.constant 1 : index
    %c256_16 = arith.constant 256 : index
    %12 = vector.load %arg8[%c1_15, %c256_16] : memref<8x512xf32, #tpu.memory_space<vmem>>, vector<1x256xf32>
    tpu.vector_store %arg8[%c1_15, %c256_16], %11 {strides = array<i32>} : memref<8x512xf32, #tpu.memory_space<vmem>>, vector<1x256xf32>,
    %c5 = arith.constant 5 : index
    %c0_17 = arith.constant 0 : index
    %13 = vector.load %arg0[%c5, %c0_17] : memref<6x256xf32, #tpu.memory_space<vmem>>, vector<1x256xf32>
    %c2_18 = arith.constant 2 : index
    %c256_19 = arith.constant 256 : index
    %14 = vector.load %arg8[%c2_18, %c256_19] : memref<8x512xf32, #tpu.memory_space<vmem>>, vector<1x256xf32>
    tpu.vector_store %arg8[%c2_18, %c256_19], %13 {strides = array<i32>} : memref<8x512xf32, #tpu.memory_space<vmem>>, vector<1x256xf32>,
    %c0_20 = arith.constant 0 : index
    %c0_21 = arith.constant 0 : index
    %15 = vector.load %arg6[%c0_20, %c0_21] : memref<129x1xf32, #tpu.memory_space<vmem>>, vector<16x1xf32>
    %c16 = arith.constant 16 : index
    %c0_22 = arith.constant 0 : index
    %16 = vector.load %arg6[%c16, %c0_22] : memref<129x1xf32, #tpu.memory_space<vmem>>, vector<16x1xf32>
    %c32 = arith.constant 32 : index
    %c0_23 = arith.constant 0 : index
    %17 = vector.load %arg6[%c32, %c0_23] : memref<129x1xf32, #tpu.memory_space<vmem>>, vector<32x1xf32>
    %c64 = arith.constant 64 : index
    %c0_24 = arith.constant 0 : index
    %18 = vector.load %arg6[%c64, %c0_24] : memref<129x1xf32, #tpu.memory_space<vmem>>, vector<32x1xf32>
    %c96 = arith.constant 96 : index
    %c0_25 = arith.constant 0 : index
    %19 = vector.load %arg6[%c96, %c0_25] : memref<129x1xf32, #tpu.memory_space<vmem>>, vector<16x1xf32>
    %c112 = arith.constant 112 : index
    %c0_26 = arith.constant 0 : index
    %20 = vector.load %arg6[%c112, %c0_26] : memref<129x1xf32, #tpu.memory_space<vmem>>, vector<16x1xf32>
    %c128 = arith.constant 128 : index
    %c0_27 = arith.constant 0 : index
    %21 = vector.load %arg6[%c128, %c0_27] : memref<129x1xf32, #tpu.memory_space<vmem>>, vector<1x1xf32>
    %c0_28 = arith.constant 0 : index
    %c0_29 = arith.constant 0 : index
    %22 = vector.load %arg8[%c0_28, %c0_29] : memref<8x512xf32, #tpu.memory_space<vmem>>, vector<8x512xf32>
    %c17_i32 = arith.constant 17 : i32
    %23 = tpu.dynamic_rotate %22 by %c17_i32 dim 1 : vector<8x512xf32>, i32 -> vector<8x512xf32>
    %c0_30 = arith.constant 0 : index
    %c0_31 = arith.constant 0 : index
    %24 = vector.load %arg1[%c0_30, %c0_31] : memref<9x512xf32, #tpu.memory_space<vmem>>, vector<1x512xf32>
    %25 = vector.broadcast %24 : vector<1x512xf32> to vector<8x512xf32>
    %26 = arith.mulf %23, %25 : vector<8x512xf32>
    %c0_32 = arith.constant 0 : index
    %c0_33 = arith.constant 0 : index
    %c0_34 = arith.constant 0 : index
    %27 = vector.load %arg2[%c0_32, %c0_33, %c0_34] : memref<9x16x8xf32, #tpu.memory_space<vmem>>, vector<1x16x8xf32>
    %28 = vector.shape_cast %27 : vector<1x16x8xf32> to vector<16x8xf32>
    %cst_35 = arith.constant dense<0.000000e+00> : vector<16x512xf32>
    %29 = tpu.matmul %28, %26, %cst_35 {dimension_numbers = #tpu.dot_dimension_numbers<[1], [0], [0], [1], [0, 0, 1, 1], [], []>} : vector<16x8xf32>, vector<8x512xf32>, vector<16x512xf32> -> vector<16x512xf32>
    %c16_i32 = arith.constant 16 : i32
    %30 = tpu.dynamic_rotate %22 by %c16_i32 dim 1 : vector<8x512xf32>, i32 -> vector<8x512xf32>
    %c1_36 = arith.constant 1 : index
    %c0_37 = arith.constant 0 : index
    %31 = vector.load %arg1[%c1_36, %c0_37] : memref<9x512xf32, #tpu.memory_space<vmem>>, vector<1x512xf32>
    %32 = vector.broadcast %31 : vector<1x512xf32> to vector<8x512xf32>
    %33 = arith.mulf %30, %32 : vector<8x512xf32>
    %c1_38 = arith.constant 1 : index
    %c0_39 = arith.constant 0 : index
    %c0_40 = arith.constant 0 : index
    %34 = vector.load %arg2[%c1_38, %c0_39, %c0_40] : memref<9x16x8xf32, #tpu.memory_space<vmem>>, vector<1x16x8xf32>
    %35 = vector.shape_cast %34 : vector<1x16x8xf32> to vector<16x8xf32>
    %cst_41 = arith.constant dense<0.000000e+00> : vector<16x512xf32>
    %36 = tpu.matmul %35, %33, %cst_41 {dimension_numbers = #tpu.dot_dimension_numbers<[1], [0], [0], [1], [0, 0, 1, 1], [], []>} : vector<16x8xf32>, vector<8x512xf32>, vector<16x512xf32> -> vector<16x512xf32>
    %37 = arith.addf %29, %36 : vector<16x512xf32>
    %c15_i32 = arith.constant 15 : i32
    %38 = tpu.dynamic_rotate %22 by %c15_i32 dim 1 : vector<8x512xf32>, i32 -> vector<8x512xf32>
    %c2_42 = arith.constant 2 : index
    %c0_43 = arith.constant 0 : index
    %39 = vector.load %arg1[%c2_42, %c0_43] : memref<9x512xf32, #tpu.memory_space<vmem>>, vector<1x512xf32>
    %40 = vector.broadcast %39 : vector<1x512xf32> to vector<8x512xf32>
    %41 = arith.mulf %38, %40 : vector<8x512xf32>
    %c2_44 = arith.constant 2 : index
    %c0_45 = arith.constant 0 : index
    %c0_46 = arith.constant 0 : index
    %42 = vector.load %arg2[%c2_44, %c0_45, %c0_46] : memref<9x16x8xf32, #tpu.memory_space<vmem>>, vector<1x16x8xf32>
    %43 = vector.shape_cast %42 : vector<1x16x8xf32> to vector<16x8xf32>
    %cst_47 = arith.constant dense<0.000000e+00> : vector<16x512xf32>
    %44 = tpu.matmul %43, %41, %cst_47 {dimension_numbers = #tpu.dot_dimension_numbers<[1], [0], [0], [1], [0, 0, 1, 1], [], []>} : vector<16x8xf32>, vector<8x512xf32>, vector<16x512xf32> -> vector<16x512xf32>
    %45 = arith.addf %37, %44 : vector<16x512xf32>
    %c1_i32 = arith.constant 1 : i32
    %46 = tpu.dynamic_rotate %22 by %c1_i32 dim 1 : vector<8x512xf32>, i32 -> vector<8x512xf32>
    %c3_48 = arith.constant 3 : index
    %c0_49 = arith.constant 0 : index
    %47 = vector.load %arg1[%c3_48, %c0_49] : memref<9x512xf32, #tpu.memory_space<vmem>>, vector<1x512xf32>
    %48 = vector.broadcast %47 : vector<1x512xf32> to vector<8x512xf32>
    %49 = arith.mulf %46, %48 : vector<8x512xf32>
    %c3_50 = arith.constant 3 : index
    %c0_51 = arith.constant 0 : index
    %c0_52 = arith.constant 0 : index
    %50 = vector.load %arg2[%c3_50, %c0_51, %c0_52] : memref<9x16x8xf32, #tpu.memory_space<vmem>>, vector<1x16x8xf32>
    %51 = vector.shape_cast %50 : vector<1x16x8xf32> to vector<16x8xf32>
    %cst_53 = arith.constant dense<0.000000e+00> : vector<16x512xf32>
    %52 = tpu.matmul %51, %49, %cst_53 {dimension_numbers = #tpu.dot_dimension_numbers<[1], [0], [0], [1], [0, 0, 1, 1], [], []>} : vector<16x8xf32>, vector<8x512xf32>, vector<16x512xf32> -> vector<16x512xf32>
    %53 = arith.addf %45, %52 : vector<16x512xf32>
    %c4_54 = arith.constant 4 : index
    %c0_55 = arith.constant 0 : index
    %c0_56 = arith.constant 0 : index
    %54 = vector.load %arg2[%c4_54, %c0_55, %c0_56] : memref<9x16x8xf32, #tpu.memory_space<vmem>>, vector<1x16x8xf32>
    %55 = vector.shape_cast %54 : vector<1x16x8xf32> to vector<16x8xf32>
    %cst_57 = arith.constant dense<0.000000e+00> : vector<16x512xf32>
    %56 = tpu.matmul %55, %22, %cst_57 {dimension_numbers = #tpu.dot_dimension_numbers<[1], [0], [0], [1], [0, 0, 1, 1], [], []>} : vector<16x8xf32>, vector<8x512xf32>, vector<16x512xf32> -> vector<16x512xf32>
    %57 = arith.addf %53, %56 : vector<16x512xf32>
    %c511_i32 = arith.constant 511 : i32
    %58 = tpu.dynamic_rotate %22 by %c511_i32 dim 1 : vector<8x512xf32>, i32 -> vector<8x512xf32>
    %c5_58 = arith.constant 5 : index
    %c0_59 = arith.constant 0 : index
    %59 = vector.load %arg1[%c5_58, %c0_59] : memref<9x512xf32, #tpu.memory_space<vmem>>, vector<1x512xf32>
    %60 = vector.broadcast %59 : vector<1x512xf32> to vector<8x512xf32>
    %61 = arith.mulf %58, %60 : vector<8x512xf32>
    %c5_60 = arith.constant 5 : index
    %c0_61 = arith.constant 0 : index
    %c0_62 = arith.constant 0 : index
    %62 = vector.load %arg2[%c5_60, %c0_61, %c0_62] : memref<9x16x8xf32, #tpu.memory_space<vmem>>, vector<1x16x8xf32>
    %63 = vector.shape_cast %62 : vector<1x16x8xf32> to vector<16x8xf32>
    %cst_63 = arith.constant dense<0.000000e+00> : vector<16x512xf32>
    %64 = tpu.matmul %63, %61, %cst_63 {dimension_numbers = #tpu.dot_dimension_numbers<[1], [0], [0], [1], [0, 0, 1, 1], [], []>} : vector<16x8xf32>, vector<8x512xf32>, vector<16x512xf32> -> vector<16x512xf32>
    %65 = arith.addf %57, %64 : vector<16x512xf32>
    %c497_i32 = arith.constant 497 : i32
    %66 = tpu.dynamic_rotate %22 by %c497_i32 dim 1 : vector<8x512xf32>, i32 -> vector<8x512xf32>
    %c6 = arith.constant 6 : index
    %c0_64 = arith.constant 0 : index
    %67 = vector.load %arg1[%c6, %c0_64] : memref<9x512xf32, #tpu.memory_space<vmem>>, vector<1x512xf32>
    %68 = vector.broadcast %67 : vector<1x512xf32> to vector<8x512xf32>
    %69 = arith.mulf %66, %68 : vector<8x512xf32>
    %c6_65 = arith.constant 6 : index
    %c0_66 = arith.constant 0 : index
    %c0_67 = arith.constant 0 : index
    %70 = vector.load %arg2[%c6_65, %c0_66, %c0_67] : memref<9x16x8xf32, #tpu.memory_space<vmem>>, vector<1x16x8xf32>
    %71 = vector.shape_cast %70 : vector<1x16x8xf32> to vector<16x8xf32>
    %cst_68 = arith.constant dense<0.000000e+00> : vector<16x512xf32>
    %72 = tpu.matmul %71, %69, %cst_68 {dimension_numbers = #tpu.dot_dimension_numbers<[1], [0], [0], [1], [0, 0, 1, 1], [], []>} : vector<16x8xf32>, vector<8x512xf32>, vector<16x512xf32> -> vector<16x512xf32>
    %73 = arith.addf %65, %72 : vector<16x512xf32>
    %c496_i32 = arith.constant 496 : i32
    %74 = tpu.dynamic_rotate %22 by %c496_i32 dim 1 : vector<8x512xf32>, i32 -> vector<8x512xf32>
    %c7 = arith.constant 7 : index
    %c0_69 = arith.constant 0 : index
    %75 = vector.load %arg1[%c7, %c0_69] : memref<9x512xf32, #tpu.memory_space<vmem>>, vector<1x512xf32>
    %76 = vector.broadcast %75 : vector<1x512xf32> to vector<8x512xf32>
    %77 = arith.mulf %74, %76 : vector<8x512xf32>
    %c7_70 = arith.constant 7 : index
    %c0_71 = arith.constant 0 : index
    %c0_72 = arith.constant 0 : index
    %78 = vector.load %arg2[%c7_70, %c0_71, %c0_72] : memref<9x16x8xf32, #tpu.memory_space<vmem>>, vector<1x16x8xf32>
    %79 = vector.shape_cast %78 : vector<1x16x8xf32> to vector<16x8xf32>
    %cst_73 = arith.constant dense<0.000000e+00> : vector<16x512xf32>
    %80 = tpu.matmul %79, %77, %cst_73 {dimension_numbers = #tpu.dot_dimension_numbers<[1], [0], [0], [1], [0, 0, 1, 1], [], []>} : vector<16x8xf32>, vector<8x512xf32>, vector<16x512xf32> -> vector<16x512xf32>
    %81 = arith.addf %73, %80 : vector<16x512xf32>
    %c495_i32 = arith.constant 495 : i32
    %82 = tpu.dynamic_rotate %22 by %c495_i32 dim 1 : vector<8x512xf32>, i32 -> vector<8x512xf32>
    %c8 = arith.constant 8 : index
    %c0_74 = arith.constant 0 : index
    %83 = vector.load %arg1[%c8, %c0_74] : memref<9x512xf32, #tpu.memory_space<vmem>>, vector<1x512xf32>
    %84 = vector.broadcast %83 : vector<1x512xf32> to vector<8x512xf32>
    %85 = arith.mulf %82, %84 : vector<8x512xf32>
    %c8_75 = arith.constant 8 : index
    %c0_76 = arith.constant 0 : index
    %c0_77 = arith.constant 0 : index
    %86 = vector.load %arg2[%c8_75, %c0_76, %c0_77] : memref<9x16x8xf32, #tpu.memory_space<vmem>>, vector<1x16x8xf32>
    %87 = vector.shape_cast %86 : vector<1x16x8xf32> to vector<16x8xf32>
    %cst_78 = arith.constant dense<0.000000e+00> : vector<16x512xf32>
    %88 = tpu.matmul %87, %85, %cst_78 {dimension_numbers = #tpu.dot_dimension_numbers<[1], [0], [0], [1], [0, 0, 1, 1], [], []>} : vector<16x8xf32>, vector<8x512xf32>, vector<16x512xf32> -> vector<16x512xf32>
    %89 = arith.addf %81, %88 : vector<16x512xf32>
    %cst_79 = arith.constant dense<0.000000e+00> : vector<16x1xf32>
    %90 = tpu.matmul %89, %0, %cst_79 {dimension_numbers = #tpu.dot_dimension_numbers<[1], [0], [0], [1], [0, 0, 1, 1], [], []>} : vector<16x512xf32>, vector<512x1xf32>, vector<16x1xf32> -> vector<16x1xf32>
    %91 = arith.mulf %89, %89 : vector<16x512xf32>
    %cst_80 = arith.constant dense<0.000000e+00> : vector<16x1xf32>
    %92 = tpu.matmul %91, %0, %cst_80 {dimension_numbers = #tpu.dot_dimension_numbers<[1], [0], [0], [1], [0, 0, 1, 1], [], []>} : vector<16x512xf32>, vector<512x1xf32>, vector<16x1xf32> -> vector<16x1xf32>
    %cst_81 = arith.constant 0.001953125 : f32
    %93 = vector.broadcast %cst_81 : f32 to vector<16x1xf32>
    %94 = arith.mulf %90, %93 : vector<16x1xf32>
    %cst_82 = arith.constant 0.001953125 : f32
    %95 = vector.broadcast %cst_82 : f32 to vector<16x1xf32>
    %96 = arith.mulf %92, %95 : vector<16x1xf32>
    %97 = arith.mulf %94, %94 : vector<16x1xf32>
    %98 = arith.subf %96, %97 : vector<16x1xf32>
    %cst_83 = arith.constant 0.000000e+00 : f32
    %99 = vector.broadcast %cst_83 : f32 to vector<16x1xf32>
    %100 = arith.maximumf %98, %99 : vector<16x1xf32>
    %cst_84 = arith.constant 9.99999974E-6 : f32
    %101 = vector.broadcast %cst_84 : f32 to vector<16x1xf32>
    %102 = arith.addf %100, %101 : vector<16x1xf32>
    %103 = math.rsqrt %102 : vector<16x1xf32>
    %104 = arith.mulf %15, %103 : vector<16x1xf32>
    %105 = arith.mulf %94, %104 : vector<16x1xf32>
    %106 = arith.subf %16, %105 : vector<16x1xf32>
    %107 = vector.broadcast %104 : vector<16x1xf32> to vector<16x512xf32>
    %108 = arith.mulf %89, %107 : vector<16x512xf32>
    %109 = vector.broadcast %106 : vector<16x1xf32> to vector<16x512xf32>
    %110 = arith.addf %108, %109 : vector<16x512xf32>
    %cst_85 = arith.constant 0.000000e+00 : f32
    %111 = vector.broadcast %cst_85 : f32 to vector<16x512xf32>
    %112 = arith.maximumf %110, %111 : vector<16x512xf32>
    %c17_i32_86 = arith.constant 17 : i32
    %113 = tpu.dynamic_rotate %112 by %c17_i32_86 dim 1 : vector<16x512xf32>, i32 -> vector<16x512xf32>
    %c0_87 = arith.constant 0 : index
    %c0_88 = arith.constant 0 : index
    %114 = vector.load %arg1[%c0_87, %c0_88] : memref<9x512xf32, #tpu.memory_space<vmem>>, vector<1x512xf32>
    %115 = vector.broadcast %114 : vector<1x512xf32> to vector<16x512xf32>
    %116 = arith.mulf %113, %115 : vector<16x512xf32>
    %c0_89 = arith.constant 0 : index
    %c0_90 = arith.constant 0 : index
    %c0_91 = arith.constant 0 : index
    %117 = vector.load %arg3[%c0_89, %c0_90, %c0_91] : memref<9x32x16xf32, #tpu.memory_space<vmem>>, vector<1x32x16xf32>
    %118 = vector.shape_cast %117 : vector<1x32x16xf32> to vector<32x16xf32>
    %cst_92 = arith.constant dense<0.000000e+00> : vector<32x512xf32>
    %119 = tpu.matmul %118, %116, %cst_92 {dimension_numbers = #tpu.dot_dimension_numbers<[1], [0], [0], [1], [0, 0, 1, 1], [], []>} : vector<32x16xf32>, vector<16x512xf32>, vector<32x512xf32> -> vector<32x512xf32>
    %c16_i32_93 = arith.constant 16 : i32
    %120 = tpu.dynamic_rotate %112 by %c16_i32_93 dim 1 : vector<16x512xf32>, i32 -> vector<16x512xf32>
    %c1_94 = arith.constant 1 : index
    %c0_95 = arith.constant 0 : index
    %121 = vector.load %arg1[%c1_94, %c0_95] : memref<9x512xf32, #tpu.memory_space<vmem>>, vector<1x512xf32>
    %122 = vector.broadcast %121 : vector<1x512xf32> to vector<16x512xf32>
    %123 = arith.mulf %120, %122 : vector<16x512xf32>
    %c1_96 = arith.constant 1 : index
    %c0_97 = arith.constant 0 : index
    %c0_98 = arith.constant 0 : index
    %124 = vector.load %arg3[%c1_96, %c0_97, %c0_98] : memref<9x32x16xf32, #tpu.memory_space<vmem>>, vector<1x32x16xf32>
    %125 = vector.shape_cast %124 : vector<1x32x16xf32> to vector<32x16xf32>
    %cst_99 = arith.constant dense<0.000000e+00> : vector<32x512xf32>
    %126 = tpu.matmul %125, %123, %cst_99 {dimension_numbers = #tpu.dot_dimension_numbers<[1], [0], [0], [1], [0, 0, 1, 1], [], []>} : vector<32x16xf32>, vector<16x512xf32>, vector<32x512xf32> -> vector<32x512xf32>
    %127 = arith.addf %119, %126 : vector<32x512xf32>
    %c15_i32_100 = arith.constant 15 : i32
    %128 = tpu.dynamic_rotate %112 by %c15_i32_100 dim 1 : vector<16x512xf32>, i32 -> vector<16x512xf32>
    %c2_101 = arith.constant 2 : index
    %c0_102 = arith.constant 0 : index
    %129 = vector.load %arg1[%c2_101, %c0_102] : memref<9x512xf32, #tpu.memory_space<vmem>>, vector<1x512xf32>
    %130 = vector.broadcast %129 : vector<1x512xf32> to vector<16x512xf32>
    %131 = arith.mulf %128, %130 : vector<16x512xf32>
    %c2_103 = arith.constant 2 : index
    %c0_104 = arith.constant 0 : index
    %c0_105 = arith.constant 0 : index
    %132 = vector.load %arg3[%c2_103, %c0_104, %c0_105] : memref<9x32x16xf32, #tpu.memory_space<vmem>>, vector<1x32x16xf32>
    %133 = vector.shape_cast %132 : vector<1x32x16xf32> to vector<32x16xf32>
    %cst_106 = arith.constant dense<0.000000e+00> : vector<32x512xf32>
    %134 = tpu.matmul %133, %131, %cst_106 {dimension_numbers = #tpu.dot_dimension_numbers<[1], [0], [0], [1], [0, 0, 1, 1], [], []>} : vector<32x16xf32>, vector<16x512xf32>, vector<32x512xf32> -> vector<32x512xf32>
    %135 = arith.addf %127, %134 : vector<32x512xf32>
    %c1_i32_107 = arith.constant 1 : i32
    %136 = tpu.dynamic_rotate %112 by %c1_i32_107 dim 1 : vector<16x512xf32>, i32 -> vector<16x512xf32>
    %c3_108 = arith.constant 3 : index
    %c0_109 = arith.constant 0 : index
    %137 = vector.load %arg1[%c3_108, %c0_109] : memref<9x512xf32, #tpu.memory_space<vmem>>, vector<1x512xf32>
    %138 = vector.broadcast %137 : vector<1x512xf32> to vector<16x512xf32>
    %139 = arith.mulf %136, %138 : vector<16x512xf32>
    %c3_110 = arith.constant 3 : index
    %c0_111 = arith.constant 0 : index
    %c0_112 = arith.constant 0 : index
    %140 = vector.load %arg3[%c3_110, %c0_111, %c0_112] : memref<9x32x16xf32, #tpu.memory_space<vmem>>, vector<1x32x16xf32>
    %141 = vector.shape_cast %140 : vector<1x32x16xf32> to vector<32x16xf32>
    %cst_113 = arith.constant dense<0.000000e+00> : vector<32x512xf32>
    %142 = tpu.matmul %141, %139, %cst_113 {dimension_numbers = #tpu.dot_dimension_numbers<[1], [0], [0], [1], [0, 0, 1, 1], [], []>} : vector<32x16xf32>, vector<16x512xf32>, vector<32x512xf32> -> vector<32x512xf32>
    %143 = arith.addf %135, %142 : vector<32x512xf32>
    %c4_114 = arith.constant 4 : index
    %c0_115 = arith.constant 0 : index
    %c0_116 = arith.constant 0 : index
    %144 = vector.load %arg3[%c4_114, %c0_115, %c0_116] : memref<9x32x16xf32, #tpu.memory_space<vmem>>, vector<1x32x16xf32>
    %145 = vector.shape_cast %144 : vector<1x32x16xf32> to vector<32x16xf32>
    %cst_117 = arith.constant dense<0.000000e+00> : vector<32x512xf32>
    %146 = tpu.matmul %145, %112, %cst_117 {dimension_numbers = #tpu.dot_dimension_numbers<[1], [0], [0], [1], [0, 0, 1, 1], [], []>} : vector<32x16xf32>, vector<16x512xf32>, vector<32x512xf32> -> vector<32x512xf32>
    %147 = arith.addf %143, %146 : vector<32x512xf32>
    %c511_i32_118 = arith.constant 511 : i32
    %148 = tpu.dynamic_rotate %112 by %c511_i32_118 dim 1 : vector<16x512xf32>, i32 -> vector<16x512xf32>
    %c5_119 = arith.constant 5 : index
    %c0_120 = arith.constant 0 : index
    %149 = vector.load %arg1[%c5_119, %c0_120] : memref<9x512xf32, #tpu.memory_space<vmem>>, vector<1x512xf32>
    %150 = vector.broadcast %149 : vector<1x512xf32> to vector<16x512xf32>
    %151 = arith.mulf %148, %150 : vector<16x512xf32>
    %c5_121 = arith.constant 5 : index
    %c0_122 = arith.constant 0 : index
    %c0_123 = arith.constant 0 : index
    %152 = vector.load %arg3[%c5_121, %c0_122, %c0_123] : memref<9x32x16xf32, #tpu.memory_space<vmem>>, vector<1x32x16xf32>
    %153 = vector.shape_cast %152 : vector<1x32x16xf32> to vector<32x16xf32>
    %cst_124 = arith.constant dense<0.000000e+00> : vector<32x512xf32>
    %154 = tpu.matmul %153, %151, %cst_124 {dimension_numbers = #tpu.dot_dimension_numbers<[1], [0], [0], [1], [0, 0, 1, 1], [], []>} : vector<32x16xf32>, vector<16x512xf32>, vector<32x512xf32> -> vector<32x512xf32>
    %155 = arith.addf %147, %154 : vector<32x512xf32>
    %c497_i32_125 = arith.constant 497 : i32
    %156 = tpu.dynamic_rotate %112 by %c497_i32_125 dim 1 : vector<16x512xf32>, i32 -> vector<16x512xf32>
    %c6_126 = arith.constant 6 : index
    %c0_127 = arith.constant 0 : index
    %157 = vector.load %arg1[%c6_126, %c0_127] : memref<9x512xf32, #tpu.memory_space<vmem>>, vector<1x512xf32>
    %158 = vector.broadcast %157 : vector<1x512xf32> to vector<16x512xf32>
    %159 = arith.mulf %156, %158 : vector<16x512xf32>
    %c6_128 = arith.constant 6 : index
    %c0_129 = arith.constant 0 : index
    %c0_130 = arith.constant 0 : index
    %160 = vector.load %arg3[%c6_128, %c0_129, %c0_130] : memref<9x32x16xf32, #tpu.memory_space<vmem>>, vector<1x32x16xf32>
    %161 = vector.shape_cast %160 : vector<1x32x16xf32> to vector<32x16xf32>
    %cst_131 = arith.constant dense<0.000000e+00> : vector<32x512xf32>
    %162 = tpu.matmul %161, %159, %cst_131 {dimension_numbers = #tpu.dot_dimension_numbers<[1], [0], [0], [1], [0, 0, 1, 1], [], []>} : vector<32x16xf32>, vector<16x512xf32>, vector<32x512xf32> -> vector<32x512xf32>
    %163 = arith.addf %155, %162 : vector<32x512xf32>
    %c496_i32_132 = arith.constant 496 : i32
    %164 = tpu.dynamic_rotate %112 by %c496_i32_132 dim 1 : vector<16x512xf32>, i32 -> vector<16x512xf32>
    %c7_133 = arith.constant 7 : index
    %c0_134 = arith.constant 0 : index
    %165 = vector.load %arg1[%c7_133, %c0_134] : memref<9x512xf32, #tpu.memory_space<vmem>>, vector<1x512xf32>
    %166 = vector.broadcast %165 : vector<1x512xf32> to vector<16x512xf32>
    %167 = arith.mulf %164, %166 : vector<16x512xf32>
    %c7_135 = arith.constant 7 : index
    %c0_136 = arith.constant 0 : index
    %c0_137 = arith.constant 0 : index
    %168 = vector.load %arg3[%c7_135, %c0_136, %c0_137] : memref<9x32x16xf32, #tpu.memory_space<vmem>>, vector<1x32x16xf32>
    %169 = vector.shape_cast %168 : vector<1x32x16xf32> to vector<32x16xf32>
    %cst_138 = arith.constant dense<0.000000e+00> : vector<32x512xf32>
    %170 = tpu.matmul %169, %167, %cst_138 {dimension_numbers = #tpu.dot_dimension_numbers<[1], [0], [0], [1], [0, 0, 1, 1], [], []>} : vector<32x16xf32>, vector<16x512xf32>, vector<32x512xf32> -> vector<32x512xf32>
    %171 = arith.addf %163, %170 : vector<32x512xf32>
    %c495_i32_139 = arith.constant 495 : i32
    %172 = tpu.dynamic_rotate %112 by %c495_i32_139 dim 1 : vector<16x512xf32>, i32 -> vector<16x512xf32>
    %c8_140 = arith.constant 8 : index
    %c0_141 = arith.constant 0 : index
    %173 = vector.load %arg1[%c8_140, %c0_141] : memref<9x512xf32, #tpu.memory_space<vmem>>, vector<1x512xf32>
    %174 = vector.broadcast %173 : vector<1x512xf32> to vector<16x512xf32>
    %175 = arith.mulf %172, %174 : vector<16x512xf32>
    %c8_142 = arith.constant 8 : index
    %c0_143 = arith.constant 0 : index
    %c0_144 = arith.constant 0 : index
    %176 = vector.load %arg3[%c8_142, %c0_143, %c0_144] : memref<9x32x16xf32, #tpu.memory_space<vmem>>, vector<1x32x16xf32>
    %177 = vector.shape_cast %176 : vector<1x32x16xf32> to vector<32x16xf32>
    %cst_145 = arith.constant dense<0.000000e+00> : vector<32x512xf32>
    %178 = tpu.matmul %177, %175, %cst_145 {dimension_numbers = #tpu.dot_dimension_numbers<[1], [0], [0], [1], [0, 0, 1, 1], [], []>} : vector<32x16xf32>, vector<16x512xf32>, vector<32x512xf32> -> vector<32x512xf32>
    %179 = arith.addf %171, %178 : vector<32x512xf32>
    %cst_146 = arith.constant dense<0.000000e+00> : vector<32x1xf32>
    %180 = tpu.matmul %179, %0, %cst_146 {dimension_numbers = #tpu.dot_dimension_numbers<[1], [0], [0], [1], [0, 0, 1, 1], [], []>} : vector<32x512xf32>, vector<512x1xf32>, vector<32x1xf32> -> vector<32x1xf32>
    %181 = arith.mulf %179, %179 : vector<32x512xf32>
    %cst_147 = arith.constant dense<0.000000e+00> : vector<32x1xf32>
    %182 = tpu.matmul %181, %0, %cst_147 {dimension_numbers = #tpu.dot_dimension_numbers<[1], [0], [0], [1], [0, 0, 1, 1], [], []>} : vector<32x512xf32>, vector<512x1xf32>, vector<32x1xf32> -> vector<32x1xf32>
    %cst_148 = arith.constant 0.001953125 : f32
    %183 = vector.broadcast %cst_148 : f32 to vector<32x1xf32>
    %184 = arith.mulf %180, %183 : vector<32x1xf32>
    %cst_149 = arith.constant 0.001953125 : f32
    %185 = vector.broadcast %cst_149 : f32 to vector<32x1xf32>
    %186 = arith.mulf %182, %185 : vector<32x1xf32>
    %187 = arith.mulf %184, %184 : vector<32x1xf32>
    %188 = arith.subf %186, %187 : vector<32x1xf32>
    %cst_150 = arith.constant 0.000000e+00 : f32
    %189 = vector.broadcast %cst_150 : f32 to vector<32x1xf32>
    %190 = arith.maximumf %188, %189 : vector<32x1xf32>
    %cst_151 = arith.constant 9.99999974E-6 : f32
    %191 = vector.broadcast %cst_151 : f32 to vector<32x1xf32>
    %192 = arith.addf %190, %191 : vector<32x1xf32>
    %193 = math.rsqrt %192 : vector<32x1xf32>
    %194 = arith.mulf %17, %193 : vector<32x1xf32>
    %195 = arith.mulf %184, %194 : vector<32x1xf32>
    %196 = arith.subf %18, %195 : vector<32x1xf32>
    %197 = vector.broadcast %194 : vector<32x1xf32> to vector<32x512xf32>
    %198 = arith.mulf %179, %197 : vector<32x512xf32>
    %199 = vector.broadcast %196 : vector<32x1xf32> to vector<32x512xf32>
    %200 = arith.addf %198, %199 : vector<32x512xf32>
    %cst_152 = arith.constant 0.000000e+00 : f32
    %201 = vector.broadcast %cst_152 : f32 to vector<32x512xf32>
    %202 = arith.maximumf %200, %201 : vector<32x512xf32>
    %c17_i32_153 = arith.constant 17 : i32
    %203 = tpu.dynamic_rotate %202 by %c17_i32_153 dim 1 : vector<32x512xf32>, i32 -> vector<32x512xf32>
    %c0_154 = arith.constant 0 : index
    %c0_155 = arith.constant 0 : index
    %204 = vector.load %arg1[%c0_154, %c0_155] : memref<9x512xf32, #tpu.memory_space<vmem>>, vector<1x512xf32>
    %205 = vector.broadcast %204 : vector<1x512xf32> to vector<32x512xf32>
    %206 = arith.mulf %203, %205 : vector<32x512xf32>
    %c0_156 = arith.constant 0 : index
    %c0_157 = arith.constant 0 : index
    %c0_158 = arith.constant 0 : index
    %207 = vector.load %arg4[%c0_156, %c0_157, %c0_158] : memref<9x16x32xf32, #tpu.memory_space<vmem>>, vector<1x16x32xf32>
    %208 = vector.shape_cast %207 : vector<1x16x32xf32> to vector<16x32xf32>
    %cst_159 = arith.constant dense<0.000000e+00> : vector<16x512xf32>
    %209 = tpu.matmul %208, %206, %cst_159 {dimension_numbers = #tpu.dot_dimension_numbers<[1], [0], [0], [1], [0, 0, 1, 1], [], []>} : vector<16x32xf32>, vector<32x512xf32>, vector<16x512xf32> -> vector<16x512xf32>
    %c16_i32_160 = arith.constant 16 : i32
    %210 = tpu.dynamic_rotate %202 by %c16_i32_160 dim 1 : vector<32x512xf32>, i32 -> vector<32x512xf32>
    %c1_161 = arith.constant 1 : index
    %c0_162 = arith.constant 0 : index
    %211 = vector.load %arg1[%c1_161, %c0_162] : memref<9x512xf32, #tpu.memory_space<vmem>>, vector<1x512xf32>
    %212 = vector.broadcast %211 : vector<1x512xf32> to vector<32x512xf32>
    %213 = arith.mulf %210, %212 : vector<32x512xf32>
    %c1_163 = arith.constant 1 : index
    %c0_164 = arith.constant 0 : index
    %c0_165 = arith.constant 0 : index
    %214 = vector.load %arg4[%c1_163, %c0_164, %c0_165] : memref<9x16x32xf32, #tpu.memory_space<vmem>>, vector<1x16x32xf32>
    %215 = vector.shape_cast %214 : vector<1x16x32xf32> to vector<16x32xf32>
    %cst_166 = arith.constant dense<0.000000e+00> : vector<16x512xf32>
    %216 = tpu.matmul %215, %213, %cst_166 {dimension_numbers = #tpu.dot_dimension_numbers<[1], [0], [0], [1], [0, 0, 1, 1], [], []>} : vector<16x32xf32>, vector<32x512xf32>, vector<16x512xf32> -> vector<16x512xf32>
    %217 = arith.addf %209, %216 : vector<16x512xf32>
    %c15_i32_167 = arith.constant 15 : i32
    %218 = tpu.dynamic_rotate %202 by %c15_i32_167 dim 1 : vector<32x512xf32>, i32 -> vector<32x512xf32>
    %c2_168 = arith.constant 2 : index
    %c0_169 = arith.constant 0 : index
    %219 = vector.load %arg1[%c2_168, %c0_169] : memref<9x512xf32, #tpu.memory_space<vmem>>, vector<1x512xf32>
    %220 = vector.broadcast %219 : vector<1x512xf32> to vector<32x512xf32>
    %221 = arith.mulf %218, %220 : vector<32x512xf32>
    %c2_170 = arith.constant 2 : index
    %c0_171 = arith.constant 0 : index
    %c0_172 = arith.constant 0 : index
    %222 = vector.load %arg4[%c2_170, %c0_171, %c0_172] : memref<9x16x32xf32, #tpu.memory_space<vmem>>, vector<1x16x32xf32>
    %223 = vector.shape_cast %222 : vector<1x16x32xf32> to vector<16x32xf32>
    %cst_173 = arith.constant dense<0.000000e+00> : vector<16x512xf32>
    %224 = tpu.matmul %223, %221, %cst_173 {dimension_numbers = #tpu.dot_dimension_numbers<[1], [0], [0], [1], [0, 0, 1, 1], [], []>} : vector<16x32xf32>, vector<32x512xf32>, vector<16x512xf32> -> vector<16x512xf32>
    %225 = arith.addf %217, %224 : vector<16x512xf32>
    %c1_i32_174 = arith.constant 1 : i32
    %226 = tpu.dynamic_rotate %202 by %c1_i32_174 dim 1 : vector<32x512xf32>, i32 -> vector<32x512xf32>
    %c3_175 = arith.constant 3 : index
    %c0_176 = arith.constant 0 : index
    %227 = vector.load %arg1[%c3_175, %c0_176] : memref<9x512xf32, #tpu.memory_space<vmem>>, vector<1x512xf32>
    %228 = vector.broadcast %227 : vector<1x512xf32> to vector<32x512xf32>
    %229 = arith.mulf %226, %228 : vector<32x512xf32>
    %c3_177 = arith.constant 3 : index
    %c0_178 = arith.constant 0 : index
    %c0_179 = arith.constant 0 : index
    %230 = vector.load %arg4[%c3_177, %c0_178, %c0_179] : memref<9x16x32xf32, #tpu.memory_space<vmem>>, vector<1x16x32xf32>
    %231 = vector.shape_cast %230 : vector<1x16x32xf32> to vector<16x32xf32>
    %cst_180 = arith.constant dense<0.000000e+00> : vector<16x512xf32>
    %232 = tpu.matmul %231, %229, %cst_180 {dimension_numbers = #tpu.dot_dimension_numbers<[1], [0], [0], [1], [0, 0, 1, 1], [], []>} : vector<16x32xf32>, vector<32x512xf32>, vector<16x512xf32> -> vector<16x512xf32>
    %233 = arith.addf %225, %232 : vector<16x512xf32>
    %c4_181 = arith.constant 4 : index
    %c0_182 = arith.constant 0 : index
    %c0_183 = arith.constant 0 : index
    %234 = vector.load %arg4[%c4_181, %c0_182, %c0_183] : memref<9x16x32xf32, #tpu.memory_space<vmem>>, vector<1x16x32xf32>
    %235 = vector.shape_cast %234 : vector<1x16x32xf32> to vector<16x32xf32>
    %cst_184 = arith.constant dense<0.000000e+00> : vector<16x512xf32>
    %236 = tpu.matmul %235, %202, %cst_184 {dimension_numbers = #tpu.dot_dimension_numbers<[1], [0], [0], [1], [0, 0, 1, 1], [], []>} : vector<16x32xf32>, vector<32x512xf32>, vector<16x512xf32> -> vector<16x512xf32>
    %237 = arith.addf %233, %236 : vector<16x512xf32>
    %c511_i32_185 = arith.constant 511 : i32
    %238 = tpu.dynamic_rotate %202 by %c511_i32_185 dim 1 : vector<32x512xf32>, i32 -> vector<32x512xf32>
    %c5_186 = arith.constant 5 : index
    %c0_187 = arith.constant 0 : index
    %239 = vector.load %arg1[%c5_186, %c0_187] : memref<9x512xf32, #tpu.memory_space<vmem>>, vector<1x512xf32>
    %240 = vector.broadcast %239 : vector<1x512xf32> to vector<32x512xf32>
    %241 = arith.mulf %238, %240 : vector<32x512xf32>
    %c5_188 = arith.constant 5 : index
    %c0_189 = arith.constant 0 : index
    %c0_190 = arith.constant 0 : index
    %242 = vector.load %arg4[%c5_188, %c0_189, %c0_190] : memref<9x16x32xf32, #tpu.memory_space<vmem>>, vector<1x16x32xf32>
    %243 = vector.shape_cast %242 : vector<1x16x32xf32> to vector<16x32xf32>
    %cst_191 = arith.constant dense<0.000000e+00> : vector<16x512xf32>
    %244 = tpu.matmul %243, %241, %cst_191 {dimension_numbers = #tpu.dot_dimension_numbers<[1], [0], [0], [1], [0, 0, 1, 1], [], []>} : vector<16x32xf32>, vector<32x512xf32>, vector<16x512xf32> -> vector<16x512xf32>
    %245 = arith.addf %237, %244 : vector<16x512xf32>
    %c497_i32_192 = arith.constant 497 : i32
    %246 = tpu.dynamic_rotate %202 by %c497_i32_192 dim 1 : vector<32x512xf32>, i32 -> vector<32x512xf32>
    %c6_193 = arith.constant 6 : index
    %c0_194 = arith.constant 0 : index
    %247 = vector.load %arg1[%c6_193, %c0_194] : memref<9x512xf32, #tpu.memory_space<vmem>>, vector<1x512xf32>
    %248 = vector.broadcast %247 : vector<1x512xf32> to vector<32x512xf32>
    %249 = arith.mulf %246, %248 : vector<32x512xf32>
    %c6_195 = arith.constant 6 : index
    %c0_196 = arith.constant 0 : index
    %c0_197 = arith.constant 0 : index
    %250 = vector.load %arg4[%c6_195, %c0_196, %c0_197] : memref<9x16x32xf32, #tpu.memory_space<vmem>>, vector<1x16x32xf32>
    %251 = vector.shape_cast %250 : vector<1x16x32xf32> to vector<16x32xf32>
    %cst_198 = arith.constant dense<0.000000e+00> : vector<16x512xf32>
    %252 = tpu.matmul %251, %249, %cst_198 {dimension_numbers = #tpu.dot_dimension_numbers<[1], [0], [0], [1], [0, 0, 1, 1], [], []>} : vector<16x32xf32>, vector<32x512xf32>, vector<16x512xf32> -> vector<16x512xf32>
    %253 = arith.addf %245, %252 : vector<16x512xf32>
    %c496_i32_199 = arith.constant 496 : i32
    %254 = tpu.dynamic_rotate %202 by %c496_i32_199 dim 1 : vector<32x512xf32>, i32 -> vector<32x512xf32>
    %c7_200 = arith.constant 7 : index
    %c0_201 = arith.constant 0 : index
    %255 = vector.load %arg1[%c7_200, %c0_201] : memref<9x512xf32, #tpu.memory_space<vmem>>, vector<1x512xf32>
    %256 = vector.broadcast %255 : vector<1x512xf32> to vector<32x512xf32>
    %257 = arith.mulf %254, %256 : vector<32x512xf32>
    %c7_202 = arith.constant 7 : index
    %c0_203 = arith.constant 0 : index
    %c0_204 = arith.constant 0 : index
    %258 = vector.load %arg4[%c7_202, %c0_203, %c0_204] : memref<9x16x32xf32, #tpu.memory_space<vmem>>, vector<1x16x32xf32>
    %259 = vector.shape_cast %258 : vector<1x16x32xf32> to vector<16x32xf32>
    %cst_205 = arith.constant dense<0.000000e+00> : vector<16x512xf32>
    %260 = tpu.matmul %259, %257, %cst_205 {dimension_numbers = #tpu.dot_dimension_numbers<[1], [0], [0], [1], [0, 0, 1, 1], [], []>} : vector<16x32xf32>, vector<32x512xf32>, vector<16x512xf32> -> vector<16x512xf32>
    %261 = arith.addf %253, %260 : vector<16x512xf32>
    %c495_i32_206 = arith.constant 495 : i32
    %262 = tpu.dynamic_rotate %202 by %c495_i32_206 dim 1 : vector<32x512xf32>, i32 -> vector<32x512xf32>
    %c8_207 = arith.constant 8 : index
    %c0_208 = arith.constant 0 : index
    %263 = vector.load %arg1[%c8_207, %c0_208] : memref<9x512xf32, #tpu.memory_space<vmem>>, vector<1x512xf32>
    %264 = vector.broadcast %263 : vector<1x512xf32> to vector<32x512xf32>
    %265 = arith.mulf %262, %264 : vector<32x512xf32>
    %c8_209 = arith.constant 8 : index
    %c0_210 = arith.constant 0 : index
    %c0_211 = arith.constant 0 : index
    %266 = vector.load %arg4[%c8_209, %c0_210, %c0_211] : memref<9x16x32xf32, #tpu.memory_space<vmem>>, vector<1x16x32xf32>
    %267 = vector.shape_cast %266 : vector<1x16x32xf32> to vector<16x32xf32>
    %cst_212 = arith.constant dense<0.000000e+00> : vector<16x512xf32>
    %268 = tpu.matmul %267, %265, %cst_212 {dimension_numbers = #tpu.dot_dimension_numbers<[1], [0], [0], [1], [0, 0, 1, 1], [], []>} : vector<16x32xf32>, vector<32x512xf32>, vector<16x512xf32> -> vector<16x512xf32>
    %269 = arith.addf %261, %268 : vector<16x512xf32>
    %cst_213 = arith.constant dense<0.000000e+00> : vector<16x1xf32>
    %270 = tpu.matmul %269, %0, %cst_213 {dimension_numbers = #tpu.dot_dimension_numbers<[1], [0], [0], [1], [0, 0, 1, 1], [], []>} : vector<16x512xf32>, vector<512x1xf32>, vector<16x1xf32> -> vector<16x1xf32>
    %271 = arith.mulf %269, %269 : vector<16x512xf32>
    %cst_214 = arith.constant dense<0.000000e+00> : vector<16x1xf32>
    %272 = tpu.matmul %271, %0, %cst_214 {dimension_numbers = #tpu.dot_dimension_numbers<[1], [0], [0], [1], [0, 0, 1, 1], [], []>} : vector<16x512xf32>, vector<512x1xf32>, vector<16x1xf32> -> vector<16x1xf32>
    %cst_215 = arith.constant 0.001953125 : f32
    %273 = vector.broadcast %cst_215 : f32 to vector<16x1xf32>
    %274 = arith.mulf %270, %273 : vector<16x1xf32>
    %cst_216 = arith.constant 0.001953125 : f32
    %275 = vector.broadcast %cst_216 : f32 to vector<16x1xf32>
    %276 = arith.mulf %272, %275 : vector<16x1xf32>
    %277 = arith.mulf %274, %274 : vector<16x1xf32>
    %278 = arith.subf %276, %277 : vector<16x1xf32>
    %cst_217 = arith.constant 0.000000e+00 : f32
    %279 = vector.broadcast %cst_217 : f32 to vector<16x1xf32>
    %280 = arith.maximumf %278, %279 : vector<16x1xf32>
    %cst_218 = arith.constant 9.99999974E-6 : f32
    %281 = vector.broadcast %cst_218 : f32 to vector<16x1xf32>
    %282 = arith.addf %280, %281 : vector<16x1xf32>
    %283 = math.rsqrt %282 : vector<16x1xf32>
    %284 = arith.mulf %19, %283 : vector<16x1xf32>
    %285 = arith.mulf %274, %284 : vector<16x1xf32>
    %286 = arith.subf %20, %285 : vector<16x1xf32>
    %287 = vector.broadcast %284 : vector<16x1xf32> to vector<16x512xf32>
    %288 = arith.mulf %269, %287 : vector<16x512xf32>
    %289 = vector.broadcast %286 : vector<16x1xf32> to vector<16x512xf32>
    %290 = arith.addf %288, %289 : vector<16x512xf32>
    %cst_219 = arith.constant 0.000000e+00 : f32
    %291 = vector.broadcast %cst_219 : f32 to vector<16x512xf32>
    %292 = arith.maximumf %290, %291 : vector<16x512xf32>
    %c0_220 = arith.constant 0 : index
    %c0_221 = arith.constant 0 : index
    %293 = vector.load %arg5[%c0_220, %c0_221] : memref<1x16xf32, #tpu.memory_space<vmem>>, vector<1x16xf32>
    %cst_222 = arith.constant dense<0.000000e+00> : vector<1x512xf32>
    %294 = tpu.matmul %293, %292, %cst_222 {dimension_numbers = #tpu.dot_dimension_numbers<[1], [0], [0], [1], [0, 0, 1, 1], [], []>} : vector<1x16xf32>, vector<16x512xf32>, vector<1x512xf32> -> vector<1x512xf32>
    %295 = vector.broadcast %21 : vector<1x1xf32> to vector<1x512xf32>
    %296 = arith.addf %294, %295 : vector<1x512xf32>
    %c0_223 = arith.constant 0 : index
    %c0_224 = arith.constant 0 : index
    %297 = vector.load %arg7[%c0_223, %c0_224] : memref<1x512xf32, #tpu.memory_space<vmem>>, vector<1x512xf32>
    tpu.vector_store %arg7[%c0_223, %c0_224], %296 {strides = array<i32>} : memref<1x512xf32, #tpu.memory_space<vmem>>, vector<1x512xf32>,
    return
  }
}

</mosaic_0001>

<bundles_post_ra>
// kernel: cnn_model_forward.1
= control target key start
LH: loop header
LB: loop body
LE: loop exit
PB: predicated region body
PF: predicated region fallthrough
CT: control target
= control target key end

     0   :  { %v11547_v0 = vlaneseq  ;;  %v11550_v1 = vmov 0.0   ;;  %s8905_s13 = smov 16   ;;  %s8907_s14 = smov 15   ;;  %vm169_vm3 = vcmask 64512   ;;  %vm2372_vm10 = vcmask 130048   ;;  %s11539_s0 = inlined_call_operand.vmem [shape: f32[6,256], index: 0, kind: input, shape index: {}]   ;;  %s11540_s1 = inlined_call_operand.vmem [shape: f32[9,512], index: 1, kind: input, shape index: {}]   ;;  %s11541_s2 = inlined_call_operand.vmem [shape: f32[9,16,8], index: 2, kind: input, shape index: {}]   ;;  %s11542_s6 = inlined_call_operand.vmem [shape: f32[129,1], index: 6, kind: input, shape index: {}]   ;;  %s11543_s3 = inlined_call_operand.vmem [shape: f32[9,32,16], index: 3, kind: input, shape index: {}]   ;;  %s11544_s4 = inlined_call_operand.vmem [shape: f32[9,16,32], index: 4, kind: input, shape index: {}]   ;;  %s11545_s5 = inlined_call_operand.vmem [shape: f32[1,16], index: 5, kind: input, shape index: {}]   ;;  %s11546_s7 = inlined_call_operand.vmem [shape: f32[1,512], index: 7, kind: output, shape index: {}]  }
   0x1   :  { %28 = vst [vmem:[#allocation2 + $0x10] sm:$0xff] %v11550_v1  ;;  %29 = vst [vmem:[#allocation2 + $0x18] sm:$0xff] %v11550_v1  ;;  %v7502_v2 = vld [vmem:[%s11539_s0 + $0x3] ss:$8 sm:$0x3]  ;;  %240 = vmatprep.mubr.f32.mxu0 %v11550_v1  ;;  %317 = vmatprep.mubr.f32.mxu1 %v11550_v1  ;;  %s8908_s15 = smov 1  }
   0x2   :  { %v7503_v3 = vld [vmem:[%s11539_s0 + $0x4] ss:$8 sm:$0x3]  ;;  %26 = vst [vmem:[#allocation2] sm:$0xff] %v11550_v1  ;;  %27 = vst [vmem:[#allocation2 + $0x8] sm:$0xff] %v11550_v1  ;;  %vm33_vm0 = vcmp.lt.s32.totalorder %v11547_v0, 256 }
   0x3   :  { %v7504_v4 = vld [vmem:[%s11539_s0 + $0x5] ss:$8 sm:$0x3]  ;;  %50 = vst.msk [vmem:[#allocation2 + $0x10] ss:$8 sm:$0x3] %vm33_vm0, %v7502_v2 }
   0x4   :  { %55 = vst.msk [vmem:[#allocation2 + $0x11] ss:$8 sm:$0x3] %vm33_vm0, %v7503_v3  ;;  %60 = vst.msk [vmem:[#allocation2 + $0x12] ss:$8 sm:$0x3] %vm33_vm0, %v7504_v4 }
   0x5   :  { %v30_v5 = vld [vmem:[%s11539_s0] ss:$8 sm:$0x3]  ;;  %v7500_v6 = vld [vmem:[%s11539_s0 + $0x1] ss:$8 sm:$0x3] }
   0x6   :  { %35 = vst.msk [vmem:[#allocation2] ss:$8 sm:$0x3] %vm33_vm0, %v30_v5  ;;  %40 = vst.msk [vmem:[#allocation2 + $0x1] ss:$8 sm:$0x3] %vm33_vm0, %v7500_v6 }
   0x7   :  { %v7501_v7 = vld [vmem:[%s11539_s0 + $0x2] ss:$8 sm:$0x3]  ;;  %s8906_s0 = smov 17   ;;  %s8909_s16 = smov 127   ;;  %v9054_v12 = vshrl.u32 %v11547_v0, 7 }
   0x8   :  { %45 = vst.msk [vmem:[#allocation2 + $0x2] ss:$8 sm:$0x3] %vm33_vm0, %v7501_v7  ;;  %s8910_s17 = smov 113   ;;  %s8911_s18 = smov 112   ;;  %v9057_v13 = vand.u32 127, %v11547_v0 }
   0x9   :  { %s8912_s19 = smov 111   ;;  %11652 = vst [vmem:[#allocation3_spill] sm:$0xff] %v9054_v12  ;;  %v9060_v14 = vsub.s32 3, %v9054_v12  ;;  %v7505_v15 = vld [vmem:[%s11540_s1 + $0x1] ss:$8 sm:$0xf] }
   0xa   :  { %v9066_v17 = vsub.s32 0, %v9054_v12  ;;  %vm134_vm1 = vcmp.lt.s32.totalorder %v9057_v13, 16  ;;  %v9073_v19 = vsub.s32 1, %v9054_v12  ;;  %v9076_v20 = vsub.s32 2, %v9054_v12  ;;  %v7506_v37 = vld [vmem:[%s11541_s2 + $0x10] sm:$0xff]  ;;  %v7507_v47 = vld [vmem:[%s11541_s2 + $0x18] sm:$0xff] }
   0xb   :  { %v8981_v8 = vld [vmem:[#allocation2 + $0x10] sm:$0xff]  ;;  %v8985_v9 = vld [vmem:[#allocation2 + $0x18] sm:$0xff]  ;;  %v9070_v18 = vrot.slane %v7505_v15, %v9060_v14  ;;  %vm93_vm2 = vcmp.lt.s32.totalorder %v9057_v13, 17  ;;  %vm498_vm4 = vcmp.lt.s32.totalorder %v9057_v13, 15  ;;  %v124_v58 = vld [vmem:[%s11541_s2] sm:$0xff]  ;;  %vm709_vm5 = vcmp.lt.s32.totalorder %v9057_v13, 1 }
   0xc   :  { %130 = vrot.lane.b32.xlu1 %v8981_v8, %s8905_s13  ;;  %v9081_v24 = vrot.slane %v7505_v15, %v9066_v17  ;;  %v9085_v26 = vrot.slane %v7505_v15, %v9073_v19  ;;  %v9090_v28 = vrot.slane %v7505_v15, %v9076_v20  ;;  %v98_v29 = vld [vmem:[%s11540_s1] ss:$8 sm:$0xf]  ;;  %v7516_v49 = vld [vmem:[%s11540_s1 + $0x2] ss:$8 sm:$0xf] }
   0xd   :  { %v9107_v38 = vrot.slane %v98_v29, %v9066_v17  ;;  %v9110_v39 = vrot.slane %v98_v29, %v9073_v19  ;;  %v9118_v44 = vrot.slane %v98_v29, %v9076_v20  ;;  %v9128_v48 = vrot.slane %v98_v29, %v9060_v14  ;;  %v7523_v5 = vld [vmem:[%s11540_s1 + $0x3] ss:$8 sm:$0xf] }
   0xe   :  { %v9140_v54 = vrot.slane %v7516_v49, %v9073_v19  ;;  %v9148_v57 = vrot.slane %v7516_v49, %v9066_v17  ;;  %v9159_v63 = vrot.slane %v7516_v49, %v9076_v20  ;;  %v9166_v4 = vrot.slane %v7516_v49, %v9060_v14  ;;  %v125_v6 = vld [vmem:[%s11541_s2 + $0x8] sm:$0xff]  ;;  %v7517_v29 = vld [vmem:[%s11541_s2 + $0x20] sm:$0xff] }
   0xf   :  { %v8987_v10 = vld [vmem:[#allocation2] sm:$0xff]  ;;  %v8993_v11 = vld [vmem:[#allocation2 + $0x8] sm:$0xff]  ;;  %11653 = vst [vmem:[#allocation4_spill] sm:$0xff] %v9107_v38  ;;  %11654 = vst [vmem:[#allocation5_spill] sm:$0xff] %v9110_v39  ;;  %vm1091_vm6 = vcmp.lt.s32.totalorder %v9057_v13, 127  ;;  %vm1302_vm7 = vcmp.lt.s32.totalorder %v9057_v13, 113 }
  0x10   :  { %126 = vrot.lane.b32.xlu0 %v8987_v10, %s8905_s13  ;;  %132 = vrot.lane.b32.xlu1 %v8985_v9, %s8905_s13  ;;  %11655 = vst [vmem:[#allocation6_spill] sm:$0xff] %v9118_v44  ;;  %11656 = vst [vmem:[#allocation7_spill] sm:$0xff] %v9128_v48  ;;  %vm1513_vm8 = vcmp.lt.s32.totalorder %v9057_v13, 112  ;;  %vm1724_vm9 = vcmp.lt.s32.totalorder %v9057_v13, 111  ;;  %vm5039_vm11 = vcmask 261120   ;;  %v7715_v13 = vld [vmem:[%s11544_s4 + $0x88] sm:$0xff] }
  0x11   :  { %11657 = vst [vmem:[#allocation8_spill] sm:$0xff] %v9140_v54  ;;  %11658 = vst [vmem:[#allocation9_spill] sm:$0xff] %v9148_v57 }
  0x12   :  { %11659 = vst [vmem:[#allocation10_spill] sm:$0xff] %v9159_v63  ;;  %11660 = vst [vmem:[#allocation11_spill] sm:$0xff] %v9166_v4 }
  0x14   :  { %128 = vrot.lane.b32.xlu0 %v8993_v11, %s8905_s13  ;;  %85 = vrot.lane.b32.xlu1 %v8993_v11, %s8906_s0 }
  0x18   :  { %83 = vrot.lane.b32.xlu0 %v8987_v10, %s8906_s0  ;;  %89 = vrot.lane.b32.xlu1 %v8985_v9, %s8906_s0 }
  0x1c   :  { %87 = vrot.lane.b32.xlu0 %v8981_v8, %s8906_s0  ;;  %492 = vrot.lane.b32.xlu1 %v8993_v11, %s8907_s14 }
  0x20   :  { %490 = vrot.lane.b32.xlu0 %v8987_v10, %s8907_s14  ;;  %496 = vrot.lane.b32.xlu1 %v8985_v9, %s8907_s14 }
  0x24   :  { %494 = vrot.lane.b32.xlu0 %v8981_v8, %s8907_s14  ;;  %703 = vrot.lane.b32.xlu1 %v8993_v11, %s8908_s15 }
  0x28   :  { %701 = vrot.lane.b32.xlu0 %v8987_v10, %s8908_s15  ;;  %707 = vrot.lane.b32.xlu1 %v8985_v9, %s8908_s15 }
  0x2c   :  { %705 = vrot.lane.b32.xlu0 %v8981_v8, %s8908_s15  ;;  %1085 = vrot.lane.b32.xlu1 %v8993_v11, %s8909_s16 }
  0x30   :  { %1083 = vrot.lane.b32.xlu0 %v8987_v10, %s8909_s16  ;;  %1089 = vrot.lane.b32.xlu1 %v8985_v9, %s8909_s16 }
  0x34   :  { %1087 = vrot.lane.b32.xlu0 %v8981_v8, %s8909_s16  ;;  %1296 = vrot.lane.b32.xlu1 %v8993_v11, %s8910_s17 }
  0x38   :  { %1294 = vrot.lane.b32.xlu0 %v8987_v10, %s8910_s17  ;;  %1300 = vrot.lane.b32.xlu1 %v8985_v9, %s8910_s17 }
  0x3c   :  { %1298 = vrot.lane.b32.xlu0 %v8981_v8, %s8910_s17  ;;  %1507 = vrot.lane.b32.xlu1 %v8993_v11, %s8911_s18 }
  0x40   :  { %1505 = vrot.lane.b32.xlu0 %v8987_v10, %s8911_s18  ;;  %1511 = vrot.lane.b32.xlu1 %v8985_v9, %s8911_s18 }
  0x44   :  { %1509 = vrot.lane.b32.xlu0 %v8981_v8, %s8911_s18  ;;  %1718 = vrot.lane.b32.xlu1 %v8993_v11, %s8912_s19 }
  0x48   :  { %1716 = vrot.lane.b32.xlu0 %v8987_v10, %s8912_s19  ;;  %1722 = vrot.lane.b32.xlu1 %v8985_v9, %s8912_s19 }
  0x4c   :  { %1720 = vrot.lane.b32.xlu0 %v8981_v8, %s8912_s19 }
  0x7e   :  { %v131_v16 = vpop.permute.xlu1 %130 }
  0x82   :  { %v127_v21 = vpop.permute.xlu0 %126  ;;  %v133_v22 = vpop.permute.xlu1 %132 }
  0x83   :  { %v135_v23 = vsel %vm134_vm1, %v131_v16, %v133_v22  ;;  %v138_v27 = vsel %vm134_vm1, %v133_v22, %v127_v21  ;;  %v9181_v22 = vrot.slane %v7523_v5, %v9073_v19 }
  0x84   :  { %v165_v25 = vmul.f32 %v9070_v18, %v135_v23  ;;  %v162_v33 = vmul.f32 %v9081_v24, %v138_v27  ;;  %v9189_v27 = vrot.slane %v7523_v5, %v9066_v17 }
  0x85   :  { %11661 = vst [vmem:[#allocation12_spill] sm:$0xff] %v9181_v22 }
  0x86   :  { %v129_v30 = vpop.permute.xlu0 %128  ;;  %253 = vmatprep.subr.mxu1 %v165_v25  ;;  %v86_v31 = vpop.permute.xlu1 %85  ;;  %11662 = vst [vmem:[#allocation13_spill] sm:$0xff] %v9189_v27 }
  0x87   :  { %v137_v32 = vsel %vm134_vm1, %v127_v21, %v129_v30  ;;  %v136_v34 = vsel %vm134_vm1, %v129_v30, %v131_v16 }
  0x88   :  { %v163_v35 = vmul.f32 %v9085_v26, %v137_v32  ;;  %v164_v36 = vmul.f32 %v9090_v28, %v136_v34  ;;  %v9201_v34 = vrot.slane %v7523_v5, %v9076_v20 }
  0x8a   :  { %176 = vmatprep.subr.mxu0 %v163_v35  ;;  %v84_v40 = vpop.permute.xlu0 %83  ;;  %254 = vmatpush1.msra.mxu1 %v164_v36  ;;  %v90_v41 = vpop.permute.xlu1 %89  ;;  %11663 = vst [vmem:[#allocation14_spill] sm:$0xff] %v9201_v34 }
  0x8b   :  { %v96_v42 = vsel %vm93_vm2, %v84_v40, %v86_v31  ;;  %177 = vmatpush1.msra.mxu0 %v162_v33  ;;  %7510 = vmatmul.mubr.msk.f32.vlgmr.msra.gmra.mrb[0].mxu1 %vm169_vm3, %v7506_v37  ;;  %v97_v43 = vsel %vm93_vm2, %v90_v41, %v84_v40  ;;  %v7518_v40 = vld [vmem:[%s11541_s2 + $0x28] sm:$0xff] }
  0x8c   :  { %7508 = vmatmul.mubr.msk.f32.vlgmr.msra.gmra.mrb[0].mxu0 %vm169_vm3, %v7506_v37  ;;  %v120_v45 = vmul.f32 %v9107_v38, %v97_v43  ;;  %v121_v46 = vmul.f32 %v9110_v39, %v96_v42  ;;  %323 = vmatprep.mubr.f32.mxu1 %v11550_v1  ;;  %v9208_v37 = vrot.slane %v7523_v5, %v9060_v14 }
  0x8d   :  { %246 = vmatprep.mubr.f32.mxu0 %v11550_v1 }
  0x8e   :  { %336 = vmatprep.subr.mxu0 %v121_v46  ;;  %v88_v50 = vpop.permute.xlu0 %87  ;;  %v493_v51 = vpop.permute.xlu1 %492  ;;  %11664 = vst [vmem:[#allocation15_spill] sm:$0xff] %v9208_v37  ;;  %v7536_v46 = vld [vmem:[%s11540_s1 + $0x5] ss:$8 sm:$0xf] }
  0x8f   :  { %v94_v52 = vsel %vm93_vm2, %v88_v50, %v90_v41  ;;  %v95_v53 = vsel %vm93_vm2, %v86_v31, %v88_v50  ;;  %7511 = vmatmul.mubr.msk.f32.gmra.mrb[2].mxu1 %vm169_vm3, %v7507_v47  ;;  %337 = vmatpush1.msra.mxu0 %v120_v45  ;;  %v7524_v50 = vld [vmem:[%s11541_s2 + $0x30] sm:$0xff] }
  0x90   :  { %v122_v55 = vmul.f32 %v9118_v44, %v95_v53  ;;  %7509 = vmatmul.mubr.msk.f32.gmra.mrb[2].mxu0 %vm169_vm3, %v7507_v47  ;;  %v123_v56 = vmul.f32 %v9128_v48, %v94_v52  ;;  %477 = vmatprep.mubr.f32.mxu1 %v11550_v1  ;;  %v9234_v53 = vrot.slane %v7536_v46, %v9060_v14 }
  0x91   :  { %400 = vmatprep.mubr.f32.mxu0 %v11550_v1 }
  0x92   :  { %413 = vmatprep.subr.mxu1 %v123_v56  ;;  %v491_v59 = vpop.permute.xlu0 %490  ;;  %v497_v60 = vpop.permute.xlu1 %496  ;;  %11665 = vst [vmem:[#allocation16_spill] sm:$0xff] %v9234_v53  ;;  %v9241_v56 = vrot.slane %v7536_v46, %v9073_v19 }
  0x93   :  { %v501_v61 = vsel %vm498_vm4, %v491_v59, %v493_v51  ;;  %414 = vmatpush1.msra.mxu1 %v122_v55  ;;  %v502_v62 = vsel %vm498_vm4, %v497_v60, %v491_v59  ;;  %v7543_v59 = vld [vmem:[%s11540_s1 + $0x6] ss:$8 sm:$0xf] }
  0x94   :  { %7512 = vmatmul.mubr.msk.f32.vlgmr.msra.gmra.mrb[0].mxu0 %vm169_vm3, %v124_v58  ;;  %7514 = vmatmul.mubr.msk.f32.vlgmr.msra.gmra.mrb[0].mxu1 %vm169_vm3, %v124_v58  ;;  %v526_v2 = vmul.f32 %v9148_v57, %v502_v62  ;;  %v527_v3 = vmul.f32 %v9140_v54, %v501_v61  ;;  %11666 = vst [vmem:[#allocation17_spill] sm:$0xff] %v9241_v56 }
  0x95   :  { %406 = vmatprep.mubr.f32.mxu0 %v11550_v1  ;;  %483 = vmatprep.mubr.f32.mxu1 %v11550_v1  ;;  %v9244_v58 = vrot.slane %v7536_v46, %v9066_v17  ;;  %v9257_v62 = vrot.slane %v7536_v46, %v9076_v20 }
  0x96   :  { %539 = vmatprep.subr.mxu0 %v527_v3  ;;  %v495_v7 = vpop.permute.xlu0 %494  ;;  %v704_v15 = vpop.permute.xlu1 %703 }
  0x97   :  { %v499_v16 = vsel %vm498_vm4, %v495_v7, %v497_v60  ;;  %v500_v21 = vsel %vm498_vm4, %v493_v51, %v495_v7  ;;  %540 = vmatpush1.msra.mxu0 %v526_v2  ;;  %11667 = vst [vmem:[#allocation18_spill] sm:$0xff] %v9244_v58  ;;  %11668 = vst [vmem:[#allocation19_spill] sm:$0xff] %v9257_v62 }
  0x98   :  { %v528_v23 = vmul.f32 %v9159_v63, %v500_v21  ;;  %7513 = vmatmul.mubr.msk.f32.gmra.mrb[2].mxu0 %vm169_vm3, %v125_v6  ;;  %7515 = vmatmul.mubr.msk.f32.gmra.mrb[2].mxu1 %vm169_vm3, %v125_v6  ;;  %v529_v25 = vmul.f32 %v9166_v4, %v499_v16 }
  0x99   :  { %603 = vmatprep.mubr.f32.mxu0 %v11550_v1  ;;  %680 = vmatprep.mubr.f32.mxu1 %v11550_v1 }
  0x9a   :  { %616 = vmatprep.subr.mxu1 %v529_v25  ;;  %v702_v30 = vpop.permute.xlu0 %701  ;;  %v708_v31 = vpop.permute.xlu1 %707  ;;  %v9286_v25 = vrot.slane %v7543_v59, %v9073_v19 }
  0x9b   :  { %v712_v32 = vsel %vm709_vm5, %v702_v30, %v704_v15  ;;  %617 = vmatpush1.msra.mxu1 %v528_v23  ;;  %v713_v33 = vsel %vm709_vm5, %v708_v31, %v702_v30  ;;  %v9290_v30 = vrot.slane %v7543_v59, %v9066_v17 }
  0x9c   :  { %7519 = vmatmul.mubr.msk.f32.vlgmr.msra.gmra.mrb[0].mxu0 %vm169_vm3, %v7517_v29  ;;  %7521 = vmatmul.mubr.msk.f32.vlgmr.msra.gmra.mrb[0].mxu1 %vm169_vm3, %v7517_v29  ;;  %v737_v35 = vmul.f32 %v9189_v27, %v713_v33  ;;  %v738_v36 = vmul.f32 %v9181_v22, %v712_v32  ;;  %11670 = vst [vmem:[#allocation21_spill] sm:$0xff] %v9286_v25  ;;  %v7550_v32 = vld [vmem:[%s11540_s1 + $0x7] ss:$8 sm:$0xf] }
  0x9d   :  { %609 = vmatprep.mubr.f32.mxu0 %v11550_v1  ;;  %686 = vmatprep.mubr.f32.mxu1 %v11550_v1  ;;  %11671 = vst [vmem:[#allocation22_spill] sm:$0xff] %v9290_v30 }
  0x9e   :  { %750 = vmatprep.subr.mxu0 %v738_v36  ;;  %v706_v41 = vpop.permute.xlu0 %705  ;;  %v1086_v42 = vpop.permute.xlu1 %1085  ;;  %v9303_v36 = vrot.slane %v7543_v59, %v9076_v20 }
  0x9f   :  { %v710_v43 = vsel %vm709_vm5, %v706_v41, %v708_v31  ;;  %v711_v45 = vsel %vm709_vm5, %v704_v15, %v706_v41  ;;  %751 = vmatpush1.msra.mxu0 %v737_v35  ;;  %v7531_v31 = vld [vmem:[%s11541_s2 + $0x48] sm:$0xff] }
  0xa0   :  { %v739_v47 = vmul.f32 %v9201_v34, %v711_v45  ;;  %7520 = vmatmul.mubr.msk.f32.gmra.mrb[2].mxu0 %vm169_vm3, %v7518_v40  ;;  %7522 = vmatmul.mubr.msk.f32.gmra.mrb[2].mxu1 %vm169_vm3, %v7518_v40  ;;  %v740_v49 = vmul.f32 %v9208_v37, %v710_v43  ;;  %11672 = vst [vmem:[#allocation23_spill] sm:$0xff] %v9303_v36 }
  0xa1   :  { %814 = vmatprep.mubr.f32.mxu0 %v11550_v1  ;;  %891 = vmatprep.mubr.f32.mxu1 %v11550_v1  ;;  %v9314_v45 = vrot.slane %v7550_v32, %v9060_v14 }
  0xa2   :  { %827 = vmatprep.subr.mxu1 %v740_v49  ;;  %v1084_v51 = vpop.permute.xlu0 %1083  ;;  %v1090_v52 = vpop.permute.xlu1 %1089  ;;  %921 = vmatprep.subr.mxu0 %v8993_v11  ;;  %v7525_v11 = vld [vmem:[%s11541_s2 + $0x38] sm:$0xff] }
  0xa3   :  { %828 = vmatpush1.msra.mxu1 %v739_v47  ;;  %v1095_v55 = vsel %vm1091_vm6, %v1090_v52, %v1084_v51  ;;  %v1094_v60 = vsel %vm1091_vm6, %v1084_v51, %v1086_v42  ;;  %11673 = vst [vmem:[#allocation24_spill] sm:$0xff] %v9314_v45  ;;  %v7537_v47 = vld [vmem:[%s11541_s2 + $0x50] sm:$0xff] }
  0xa4   :  { %7526 = vmatmul.mubr.msk.f32.vlgmr.msra.gmra.mrb[0].mxu0 %vm169_vm3, %v7524_v50  ;;  %7528 = vmatmul.mubr.msk.f32.vlgmr.msra.gmra.mrb[0].mxu1 %vm169_vm3, %v7524_v50  ;;  %v1122_v3 = vmul.f32 %v9234_v53, %v1095_v55  ;;  %v1119_v7 = vmul.f32 %v9244_v58, %v1094_v60  ;;  %v9328_v55 = vrot.slane %v7550_v32, %v9073_v19  ;;  %v7538_v60 = vld [vmem:[%s11541_s2 + $0x58] sm:$0xff] }
  0xa5   :  { %820 = vmatprep.mubr.f32.mxu0 %v11550_v1  ;;  %897 = vmatprep.mubr.f32.mxu1 %v11550_v1 }
  0xa6   :  { %v1088_v61 = vpop.permute.xlu0 %1087  ;;  %998 = vmatprep.subr.mxu1 %v8985_v9  ;;  %922 = vmatpush1.msra.mxu0 %v8987_v10  ;;  %v1297_v2 = vpop.permute.xlu1 %1296  ;;  %v9272_v10 = vrot.slane %v7543_v59, %v9060_v14  ;;  %11674 = vst [vmem:[#allocation25_spill] sm:$0xff] %v9328_v55  ;;  %v9332_v59 = vrot.slane %v7550_v32, %v9066_v17 }
  0xa7   :  { %v1093_v5 = vsel %vm1091_vm6, %v1086_v42, %v1088_v61  ;;  %v1092_v6 = vsel %vm1091_vm6, %v1088_v61, %v1090_v52  ;;  %999 = vmatpush1.msra.mxu1 %v8981_v8  ;;  %v7530_v8 = vld [vmem:[%s11541_s2 + $0x40] sm:$0xff] }
  0xa8   :  { %7527 = vmatmul.mubr.msk.f32.gmra.mrb[2].mxu0 %vm169_vm3, %v7525_v11  ;;  %7529 = vmatmul.mubr.msk.f32.gmra.mrb[2].mxu1 %vm169_vm3, %v7525_v11  ;;  %v1120_v9 = vmul.f32 %v9241_v56, %v1093_v5  ;;  %11669 = vst [vmem:[#allocation20_spill] sm:$0xff] %v9272_v10  ;;  %v1121_v15 = vmul.f32 %v9257_v62, %v1092_v6  ;;  %11675 = vst [vmem:[#allocation26_spill] sm:$0xff] %v9332_v59  ;;  %v7557_v61 = vld [vmem:[%s11540_s1 + $0x20] ss:$8 sm:$0xf] }
  0xa9   :  { %985 = vmatprep.mubr.f32.mxu0 %v11550_v1  ;;  %1062 = vmatprep.mubr.f32.mxu1 %v11550_v1  ;;  %v9345_v5 = vrot.slane %v7550_v32, %v9076_v20 }
  0xaa   :  { %1132 = vmatprep.subr.mxu0 %v1120_v9  ;;  %v1295_v16 = vpop.permute.xlu0 %1294  ;;  %1209 = vmatprep.subr.mxu1 %v1122_v3  ;;  %v1301_v21 = vpop.permute.xlu1 %1300 }
  0xab   :  { %v1306_v23 = vsel %vm1302_vm7, %v1301_v21, %v1295_v16  ;;  %v1305_v33 = vsel %vm1302_vm7, %v1295_v16, %v1297_v2  ;;  %11676 = vst [vmem:[#allocation27_spill] sm:$0xff] %v9345_v5 }
  0xac   :  { %7532 = vmatmul.mubr.msk.f32.vlgmr.msra.gmra.mrb[0].mxu0 %vm169_vm3, %v7530_v8  ;;  %7534 = vmatmul.mubr.msk.f32.vlgmr.msra.gmra.mrb[0].mxu1 %vm169_vm3, %v7530_v8  ;;  %v1333_v29 = vmul.f32 %v9272_v10, %v1306_v23  ;;  %v1330_v46 = vmul.f32 %v9290_v30, %v1305_v33 }
  0xad   :  { %1133 = vmatpush1.msra.mxu0 %v1119_v7  ;;  %991 = vmatprep.mubr.f32.mxu0 %v11550_v1 }
  0xae   :  { %1068 = vmatprep.mubr.f32.mxu1 %v11550_v1  ;;  %v1299_v35 = vpop.permute.xlu0 %1298  ;;  %1210 = vmatpush1.msra.mxu1 %v1121_v15  ;;  %v1508_v40 = vpop.permute.xlu1 %1507  ;;  %v9356_v15 = vrot.slane %v7557_v61, %v9060_v14  ;;  %v9370_v14 = vrot.slane %v7557_v61, %v9073_v19  ;;  %v9384_v19 = vrot.slane %v7557_v61, %v9076_v20  ;;  %v7551_v20 = vld [vmem:[%s11541_s2 + $0x70] sm:$0xff] }
  0xaf   :  { %v1304_v41 = vsel %vm1302_vm7, %v1297_v2, %v1299_v35  ;;  %v1303_v42 = vsel %vm1302_vm7, %v1299_v35, %v1301_v21  ;;  %1420 = vmatprep.subr.mxu1 %v1333_v29  ;;  %v7544_v21 = vld [vmem:[%s11541_s2 + $0x60] sm:$0xff]  ;;  %v9374_v35 = vrot.slane %v7557_v61, %v9066_v17 }
  0xb0   :  { %7533 = vmatmul.mubr.msk.f32.gmra.mrb[2].mxu0 %vm169_vm3, %v7531_v31  ;;  %7535 = vmatmul.mubr.msk.f32.gmra.mrb[2].mxu1 %vm169_vm3, %v7531_v31  ;;  %v1331_v43 = vmul.f32 %v9286_v25, %v1304_v41  ;;  %v1332_v49 = vmul.f32 %v9303_v36, %v1303_v42  ;;  %11677 = vst [vmem:[#allocation28_spill] sm:$0xff] %v9356_v15  ;;  %11678 = vst [vmem:[#allocation29_spill] sm:$0xff] %v9370_v14 }
  0xb1   :  { %1196 = vmatprep.mubr.f32.mxu0 %v11550_v1  ;;  %1273 = vmatprep.mubr.f32.mxu1 %v11550_v1  ;;  %11679 = vst [vmem:[#allocation30_spill] sm:$0xff] %v9374_v35  ;;  %11680 = vst [vmem:[#allocation31_spill] sm:$0xff] %v9384_v19 }
  0xb2   :  { %1343 = vmatprep.subr.mxu0 %v1331_v43  ;;  %v1506_v50 = vpop.permute.xlu0 %1505  ;;  %v1512_v51 = vpop.permute.xlu1 %1511 }
  0xb3   :  { %v1517_v52 = vsel %vm1513_vm8, %v1512_v51, %v1506_v50  ;;  %v1516_v2 = vsel %vm1513_vm8, %v1506_v50, %v1508_v40  ;;  %v7552_v50 = vld [vmem:[%s11541_s2 + $0x78] sm:$0xff] }
  0xb4   :  { %7539 = vmatmul.mubr.msk.f32.vlgmr.msra.gmra.mrb[0].mxu0 %vm169_vm3, %v7537_v47  ;;  %7541 = vmatmul.mubr.msk.f32.vlgmr.msra.gmra.mrb[0].mxu1 %vm169_vm3, %v7537_v47  ;;  %v1544_v11 = vmul.f32 %v9314_v45, %v1517_v52  ;;  %v1541_v16 = vmul.f32 %v9332_v59, %v1516_v2  ;;  %v7558_v52 = vld [vmem:[%s11541_s2 + $0x80] sm:$0xff] }
  0xb5   :  { %1344 = vmatpush1.msra.mxu0 %v1330_v46  ;;  %1202 = vmatprep.mubr.f32.mxu0 %v11550_v1 }
  0xb6   :  { %1279 = vmatprep.mubr.f32.mxu1 %v11550_v1  ;;  %v1510_v3 = vpop.permute.xlu0 %1509  ;;  %1421 = vmatpush1.msra.mxu1 %v1332_v49  ;;  %v1719_v6 = vpop.permute.xlu1 %1718 }
  0xb7   :  { %v1515_v9 = vsel %vm1513_vm8, %v1508_v40, %v1510_v3  ;;  %v1514_v7 = vsel %vm1513_vm8, %v1510_v3, %v1512_v51  ;;  %1631 = vmatprep.subr.mxu1 %v1544_v11  ;;  %v7545_v40 = vld [vmem:[%s11541_s2 + $0x68] sm:$0xff]  ;;  %v11548_v51 = vmov 1.0|1.0  }
  0xb8   :  { %7540 = vmatmul.mubr.msk.f32.gmra.mrb[2].mxu0 %vm169_vm3, %v7538_v60  ;;  %7542 = vmatmul.mubr.msk.f32.gmra.mrb[2].mxu1 %vm169_vm3, %v7538_v60  ;;  %v1542_v8 = vmul.f32 %v9328_v55, %v1515_v9  ;;  %v1543_v23 = vmul.f32 %v9345_v5, %v1514_v7  ;;  %v7559_v11 = vld [vmem:[%s11541_s2 + $0x88] sm:$0xff] }
  0xb9   :  { %1407 = vmatprep.mubr.f32.mxu0 %v11550_v1  ;;  %1484 = vmatprep.mubr.f32.mxu1 %v11550_v1 }
  0xba   :  { %1554 = vmatprep.subr.mxu0 %v1542_v8  ;;  %v1717_v29 = vpop.permute.xlu0 %1716  ;;  %v1723_v31 = vpop.permute.xlu1 %1722 }
  0xbb   :  { %v1728_v32 = vsel %vm1724_vm9, %v1723_v31, %v1717_v29  ;;  %v1727_v41 = vsel %vm1724_vm9, %v1717_v29, %v1719_v6 }
  0xbc   :  { %7546 = vmatmul.mubr.msk.f32.vlgmr.msra.gmra.mrb[0].mxu0 %vm169_vm3, %v7544_v21  ;;  %7548 = vmatmul.mubr.msk.f32.vlgmr.msra.gmra.mrb[0].mxu1 %vm169_vm3, %v7544_v21  ;;  %v1755_v33 = vmul.f32 %v9356_v15, %v1728_v32  ;;  %v1752_v47 = vmul.f32 %v9374_v35, %v1727_v41  ;;  %v8914_v41 = vmov 0  }
  0xbd   :  { %1555 = vmatpush1.msra.mxu0 %v1541_v16  ;;  %1413 = vmatprep.mubr.f32.mxu0 %v11550_v1 }
  0xbe   :  { %1490 = vmatprep.mubr.f32.mxu1 %v11550_v1  ;;  %v1721_v42 = vpop.permute.xlu0 %1720  ;;  %1632 = vmatpush1.msra.mxu1 %v1543_v23 }
  0xbf   :  { %v1726_v17 = vsel %vm1724_vm9, %v1719_v6, %v1721_v42  ;;  %v1725_v43 = vsel %vm1724_vm9, %v1721_v42, %v1723_v31  ;;  %1842 = vmatprep.subr.mxu1 %v1755_v33  ;;  %8886 = vset.pattern.permute.xlu0 %v8914_v41 }
  0xc0   :  { %7547 = vmatmul.mubr.msk.f32.gmra.mrb[2].mxu0 %vm169_vm3, %v7545_v40  ;;  %7549 = vmatmul.mubr.msk.f32.gmra.mrb[2].mxu1 %vm169_vm3, %v7545_v40  ;;  %v1753_v46 = vmul.f32 %v9370_v14, %v1726_v17  ;;  %v1754_v49 = vmul.f32 %v9384_v19, %v1725_v43 }
  0xc1   :  { %1618 = vmatprep.mubr.f32.mxu0 %v11550_v1  ;;  %1695 = vmatprep.mubr.f32.mxu1 %v11550_v1 }
  0xc2   :  { %1765 = vmatprep.subr.mxu0 %v1753_v46  ;;  %8887 = vset.pattern.permute.xlu1 %v8914_v41 }
  0xc4   :  { %7553 = vmatmul.mubr.msk.f32.vlgmr.msra.gmra.mrb[0].mxu0 %vm169_vm3, %v7551_v20  ;;  %7555 = vmatmul.mubr.msk.f32.vlgmr.msra.gmra.mrb[0].mxu1 %vm169_vm3, %v7551_v20 }
  0xc5   :  { %1766 = vmatpush1.msra.mxu0 %v1752_v47  ;;  %1624 = vmatprep.mubr.f32.mxu0 %v11550_v1 }
  0xc6   :  { %1701 = vmatprep.mubr.f32.mxu1 %v11550_v1  ;;  %1843 = vmatpush1.msra.mxu1 %v1754_v49 }
  0xc7   :  { %8202 = vmatprep.subr.bf16.mxu0 %v11548_v51  ;;  %8218 = vmatprep.subr.bf16.mxu1 %v11548_v51 }
  0xc8   :  { %7554 = vmatmul.mubr.msk.f32.gmra.mrb[2].mxu0 %vm169_vm3, %v7552_v50  ;;  %7556 = vmatmul.mubr.msk.f32.gmra.mrb[2].mxu1 %vm169_vm3, %v7552_v50 }
  0xc9   :  { %1829 = vmatprep.mubr.f32.mxu0 %v11550_v1  ;;  %1906 = vmatprep.mubr.f32.mxu1 %v11550_v1 }
  0xcc   :  { %7560 = vmatmul.mubr.msk.f32.vlgmr.msra.gmra.mrb[0].mxu0 %vm169_vm3, %v7558_v52  ;;  %7562 = vmatmul.mubr.msk.f32.vlgmr.msra.gmra.mrb[0].mxu1 %vm169_vm3, %v7558_v52 }
  0xcd   :  { %1835 = vmatprep.mubr.f32.mxu0 %v11550_v1  ;;  %1912 = vmatprep.mubr.f32.mxu1 %v11550_v1 }
  0xce   :  { %8203 = vmatpush3.bf16.msra.mxu0 %v11548_v51  ;;  %8219 = vmatpush3.bf16.msra.mxu1 %v11548_v51 }
  0xcf   :  { %8204 = vmatprep.subr.bf16.mxu0 %v11548_v51  ;;  %8220 = vmatprep.subr.bf16.mxu1 %v11548_v51 }
  0xd0   :  { %7561 = vmatmul.mubr.msk.f32.gmra.mrb[2].mxu0 %vm169_vm3, %v7559_v11  ;;  %7563 = vmatmul.mubr.msk.f32.gmra.mrb[2].mxu1 %vm169_vm3, %v7559_v11 }
  0xd2   :  { %8205 = vmatpush3.bf16.msra.mxu0 %v11548_v51  ;;  %8221 = vmatpush3.bf16.msra.mxu1 %v11548_v51 }
  0xd3   :  { %8206 = vmatprep.subr.bf16.mxu0 %v11548_v51  ;;  %8222 = vmatprep.subr.bf16.mxu1 %v11548_v51 }
  0xd6   :  { %8207 = vmatpush3.bf16.msra.mxu0 %v11548_v51  ;;  %8223 = vmatpush3.bf16.msra.mxu1 %v11548_v51 }
  0xd7   :  { %8208 = vmatprep.subr.bf16.mxu0 %v11548_v51  ;;  %8224 = vmatprep.subr.bf16.mxu1 %v11548_v51 }
  0xda   :  { %8209 = vmatpush3.bf16.msra.mxu0 %v11548_v51  ;;  %8225 = vmatpush3.bf16.msra.mxu1 %v11548_v51 }
  0xdb   :  { %8210 = vmatprep.subr.bf16.mxu0 %v11548_v51  ;;  %8226 = vmatprep.subr.bf16.mxu1 %v11548_v51 }
  0xde   :  { %8211 = vmatpush3.bf16.msra.mxu0 %v11548_v51  ;;  %8227 = vmatpush3.bf16.msra.mxu1 %v11548_v51 }
  0xdf   :  { %8212 = vmatprep.subr.bf16.mxu0 %v11548_v51  ;;  %8228 = vmatprep.subr.bf16.mxu1 %v11548_v51 }
  0xe2   :  { %8213 = vmatpush3.bf16.msra.mxu0 %v11548_v51  ;;  %8229 = vmatpush3.bf16.msra.mxu1 %v11548_v51 }
  0xe3   :  { %8214 = vmatprep.subr.bf16.mxu0 %v11548_v51  ;;  %8230 = vmatprep.subr.bf16.mxu1 %v11548_v51 }
  0xe6   :  { %8215 = vmatpush3.bf16.msra.mxu0 %v11548_v51  ;;  %8231 = vmatpush3.bf16.msra.mxu1 %v11548_v51 }
  0xe7   :  { %8216 = vmatprep.subr.bf16.mxu0 %v11548_v51  ;;  %8232 = vmatprep.subr.bf16.mxu1 %v11548_v51 }
  0xea   :  { %8217 = vmatpush3.bf16.msra.mxu0 %v11548_v51  ;;  %8233 = vmatpush3.bf16.msra.mxu1 %v11548_v51 }
  0xeb   :  { %8234 = vmatprep.subr.bf16.mxu0 %v11548_v51  ;;  %8250 = vmatprep.subr.bf16.mxu1 %v11548_v51 }
 0x19f   :  { %v9457_v60 = vpop.f32.mrb[0].mxu0  ;;  %v9459_v61 = vpop.f32.mrb[0].mxu1 }
 0x1a0   :  { %v9461_v2 = vpop.f32.mrb[1].mxu0  ;;  %v9463_v3 = vpop.f32.mrb[1].mxu1  ;;  %v2077_v23 = vmul.f32 %v9457_v60, %v9457_v60  ;;  %v2079_v29 = vmul.f32 %v9459_v61, %v9459_v61 }
 0x1a1   :  { %1991 = vmatprep.mubr.f32.mxu0 %v9461_v2  ;;  %2066 = vmatprep.mubr.f32.mxu1 %v9463_v3  ;;  %v2078_v16 = vmul.f32 %v9461_v2, %v9461_v2  ;;  %v2080_v21 = vmul.f32 %v9463_v3, %v9463_v3 }
 0x1a2   :  { %1992 = vmatmul.mubr.f32.vlgmr.msra.gmra.mrb[4].mxu0 %v9457_v60  ;;  %2067 = vmatmul.mubr.f32.vlgmr.msra.gmra.mrb[4].mxu1 %v9459_v61 }
 0x1a3   :  { %8235 = vmatpush3.bf16.msra.mxu0 %v11548_v51  ;;  %8251 = vmatpush3.bf16.msra.mxu1 %v11548_v51  ;;  %v9471_v6 = vpop.f32.mrb[2].mxu0  ;;  %v9473_v9 = vpop.f32.mrb[2].mxu1 }
 0x1a4   :  { %v9475_v7 = vpop.f32.mrb[3].mxu0  ;;  %v9477_v8 = vpop.f32.mrb[3].mxu1  ;;  %8236 = vmatprep.subr.bf16.mxu0 %v11548_v51  ;;  %8252 = vmatprep.subr.bf16.mxu1 %v11548_v51  ;;  %v2081_v33 = vmul.f32 %v9471_v6, %v9471_v6  ;;  %v2083_v40 = vmul.f32 %v9473_v9, %v9473_v9 }
 0x1a5   :  { %1996 = vmatprep.mubr.f32.mxu0 %v9475_v7  ;;  %2071 = vmatprep.mubr.f32.mxu1 %v9477_v8  ;;  %v2082_v31 = vmul.f32 %v9475_v7, %v9475_v7  ;;  %v2084_v32 = vmul.f32 %v9477_v8, %v9477_v8 }
 0x1a6   :  { %1997 = vmatmul.mubr.f32.gmra.mrb[6].mxu0 %v9471_v6  ;;  %2072 = vmatmul.mubr.f32.gmra.mrb[6].mxu1 %v9473_v9 }
 0x1a7   :  { %8237 = vmatpush3.bf16.msra.mxu0 %v11548_v51  ;;  %8253 = vmatpush3.bf16.msra.mxu1 %v11548_v51 }
 0x1a8   :  { %2149 = vmatprep.mubr.f32.mxu0 %v2078_v16  ;;  %2224 = vmatprep.mubr.f32.mxu1 %v2080_v21 }
 0x1a9   :  { %8238 = vmatprep.subr.bf16.mxu0 %v11548_v51  ;;  %8254 = vmatprep.subr.bf16.mxu1 %v11548_v51 }
 0x1ab   :  { %8239 = vmatpush3.bf16.msra.mxu0 %v11548_v51  ;;  %8255 = vmatpush3.bf16.msra.mxu1 %v11548_v51 }
 0x1ac   :  { %8240 = vmatprep.subr.bf16.mxu0 %v11548_v51  ;;  %8256 = vmatprep.subr.bf16.mxu1 %v11548_v51 }
 0x1af   :  { %8241 = vmatpush3.bf16.msra.mxu0 %v11548_v51  ;;  %8257 = vmatpush3.bf16.msra.mxu1 %v11548_v51 }
 0x1b0   :  { %8242 = vmatprep.subr.bf16.mxu0 %v11548_v51  ;;  %8258 = vmatprep.subr.bf16.mxu1 %v11548_v51 }
 0x1b3   :  { %8243 = vmatpush3.bf16.msra.mxu0 %v11548_v51  ;;  %8259 = vmatpush3.bf16.msra.mxu1 %v11548_v51 }
 0x1b4   :  { %8244 = vmatprep.subr.bf16.mxu0 %v11548_v51  ;;  %8260 = vmatprep.subr.bf16.mxu1 %v11548_v51 }
 0x1b7   :  { %8245 = vmatpush3.bf16.msra.mxu0 %v11548_v51  ;;  %8261 = vmatpush3.bf16.msra.mxu1 %v11548_v51 }
 0x1b8   :  { %8246 = vmatprep.subr.bf16.mxu0 %v11548_v51  ;;  %8262 = vmatprep.subr.bf16.mxu1 %v11548_v51 }
 0x1bb   :  { %8247 = vmatpush3.bf16.msra.mxu0 %v11548_v51  ;;  %8263 = vmatpush3.bf16.msra.mxu1 %v11548_v51 }
 0x1bc   :  { %8248 = vmatprep.subr.bf16.mxu0 %v11548_v51  ;;  %8264 = vmatprep.subr.bf16.mxu1 %v11548_v51 }
 0x1bf   :  { %8249 = vmatpush3.bf16.msra.mxu0 %v11548_v51  ;;  %8265 = vmatpush3.bf16.msra.mxu1 %v11548_v51 }
 0x1c2   :  { %2150 = vmatmul.mubr.f32.vlgmr.msra.gmra.mrb[8].mxu0 %v2077_v23  ;;  %2225 = vmatmul.mubr.f32.vlgmr.msra.gmra.mrb[8].mxu1 %v2079_v29 }
 0x1c3   :  { %2154 = vmatprep.mubr.f32.mxu0 %v2082_v31  ;;  %2229 = vmatprep.mubr.f32.mxu1 %v2084_v32 }
 0x1c6   :  { %2155 = vmatmul.mubr.f32.gmra.mrb[10].mxu0 %v2081_v33  ;;  %2230 = vmatmul.mubr.f32.gmra.mrb[10].mxu1 %v2083_v40 }
 0x1c7   :  { %2449 = vmatprep.mubr.f32.mxu0 %v11550_v1  ;;  %2538 = vmatprep.mubr.f32.mxu1 %v11550_v1 }
 0x275   :  { %v7754_v42 = vpop.f32.mrb[4].mxu0  ;;  %v7792_v17 = vpop.f32.mrb[4].mxu1 }
 0x276   :  { %v7755_v43 = vpop.f32.mrb[5].mxu0  ;;  %v7793_v46 = vpop.f32.mrb[5].mxu1 }
 0x277   :  { %v7756_v47 = vadd.f32 %v7755_v43, %v7754_v42  ;;  %v7794_v20 = vadd.f32 %v7793_v46, %v7792_v17 }
 0x279   :  { %v2069_v49 = vadd.f32 %v7794_v20, %v7756_v47  ;;  %v7757_v50 = vpop.f32.mrb[6].mxu0  ;;  %v7795_v52 = vpop.f32.mrb[6].mxu1 }
 0x27a   :  { %v7758_v11 = vpop.f32.mrb[7].mxu0  ;;  %v7796_v16 = vpop.f32.mrb[7].mxu1 }
 0x27b   :  { %v7759_v21 = vadd.f32 %v7758_v11, %v7757_v50  ;;  %v7797_v23 = vadd.f32 %v7796_v16, %v7795_v52  ;;  %v2235_v33 = vmul.f32 0.001953125, %v2069_v49 }
 0x27d   :  { %v2074_v29 = vadd.f32 %v7797_v23, %v7759_v21  ;;  %v2239_v42 = vmul.f32 %v2235_v33, %v2235_v33 }
 0x27f   :  { %v2236_v46 = vmul.f32 0.001953125, %v2074_v29 }
 0x281   :  { %v2240_v11 = vmul.f32 %v2236_v46, %v2236_v46 }
 0x295   :  { %v7830_v31 = vpop.f32.mrb[8].mxu0  ;;  %v7868_v32 = vpop.f32.mrb[8].mxu1 }
 0x296   :  { %v7831_v40 = vpop.f32.mrb[9].mxu0  ;;  %v7869_v0 = vpop.f32.mrb[9].mxu1 }
 0x297   :  { %v7832_v41 = vadd.f32 %v7831_v40, %v7830_v31  ;;  %v7870_v51 = vadd.f32 %v7869_v0, %v7868_v32  ;;  %v65_v40 = vld [vmem:[%s11542_s6 + $0x18] sm:$0xff] }
 0x299   :  { %v2227_v1 = vadd.f32 %v7870_v51, %v7832_v41  ;;  %v7833_v12 = vpop.f32.mrb[10].mxu0  ;;  %v7871_v19 = vpop.f32.mrb[10].mxu1  ;;  %v62_v51 = vld [vmem:[%s11542_s6] sm:$0xff]  ;;  %v64_v41 = vld [vmem:[%s11542_s6 + $0x10] sm:$0xff] }
 0x29a   :  { %v7834_v17 = vpop.f32.mrb[11].mxu0  ;;  %v7872_v43 = vpop.f32.mrb[11].mxu1 }
 0x29b   :  { %v2237_v47 = vmul.f32 0.001953125, %v2227_v1  ;;  %v7835_v20 = vadd.f32 %v7834_v17, %v7833_v12  ;;  %v7873_v35 = vadd.f32 %v7872_v43, %v7871_v19  ;;  %v63_v1 = vld [vmem:[%s11542_s6 + $0x8] sm:$0xff] }
 0x29d   :  { %v2241_v50 = vsub.f32 %v2237_v47, %v2239_v42  ;;  %v2232_v52 = vadd.f32 %v7873_v35, %v7835_v20 }
 0x29f   :  { %v2243_v16 = vmax.f32 %v2241_v50, 0.0  ;;  %v2238_v21 = vmul.f32 0.001953125, %v2232_v52 }
 0x2a1   :  { %v2245_v49 = vadd.f32 1e-05, %v2243_v16  ;;  %v2242_v23 = vsub.f32 %v2238_v21, %v2240_v11 }
 0x2a3   :  { %8888 = vrsqrt.f32 %v2245_v49  ;;  %v2244_v31 = vmax.f32 %v2242_v23, 0.0 }
 0x2a5   :  { %v2246_v0 = vadd.f32 1e-05, %v2244_v31 }
 0x2a7   :  { %8890 = vrsqrt.f32 %v2246_v0 }
 0x2ad   :  { %v8889_v32 = vpop.eup %8888 }
 0x2ae   :  { %v2249_v29 = vmul.f32 %v8889_v32, %v62_v51 }
 0x2b0   :  { %2257 = vperm.xlu0 %8886, %v2249_v29   ;;  %v2251_v12 = vmul.f32 %v2249_v29, %v2235_v33 }
 0x2b1   :  { %v8891_v35 = vpop.eup %8890 }
 0x2b2   :  { %v2250_v19 = vmul.f32 %v8891_v35, %v63_v1  ;;  %v2253_v43 = vsub.f32 %v64_v41, %v2251_v12 }
 0x2b4   :  { %2262 = vperm.xlu1 %8887, %v2250_v19   ;;  %v2252_v42 = vmul.f32 %v2250_v19, %v2236_v46 }
 0x2b6   :  { %v2254_v17 = vsub.f32 %v65_v40, %v2252_v42 }
 0x2b8   :  { %2280 = vperm.xlu0 %8886, %v2254_v17   ;;  %2275 = vperm.xlu1 %8887, %v2253_v43  }
 0x32f   :  { %v2258_v47 = vpop.permute.xlu0 %2257 }
 0x330   :  { %v2265_v50 = vmul.f32 %v2258_v47, %v9457_v60  ;;  %v2266_v49 = vmul.f32 %v2258_v47, %v9461_v2  ;;  %v2267_v60 = vmul.f32 %v2258_v47, %v9459_v61 }
 0x333   :  { %v2263_v20 = vpop.permute.xlu1 %2262 }
 0x334   :  { %v2269_v33 = vmul.f32 %v2263_v20, %v9471_v6  ;;  %v2270_v16 = vmul.f32 %v2263_v20, %v9475_v7  ;;  %v2271_v32 = vmul.f32 %v2263_v20, %v9473_v9  ;;  %v2272_v1 = vmul.f32 %v2263_v20, %v9477_v8 }
 0x335   :  { %v2268_v9 = vmul.f32 %v2258_v47, %v9463_v3 }
 0x337   :  { %v2281_v52 = vpop.permute.xlu0 %2280  ;;  %v2276_v11 = vpop.permute.xlu1 %2275 }
 0x338   :  { %v2287_v21 = vadd.f32 %v2281_v52, %v2269_v33  ;;  %v2283_v23 = vadd.f32 %v2276_v11, %v2265_v50  ;;  %v2288_v31 = vadd.f32 %v2281_v52, %v2270_v16  ;;  %v2284_v0 = vadd.f32 %v2276_v11, %v2266_v49 }
 0x339   :  { %v2289_v6 = vadd.f32 %v2281_v52, %v2271_v32  ;;  %v2285_v2 = vadd.f32 %v2276_v11, %v2267_v60  ;;  %v2290_v61 = vadd.f32 %v2281_v52, %v2272_v1  ;;  %v2286_v35 = vadd.f32 %v2276_v11, %v2268_v9 }
 0x33a   :  { %v9545_v46 = vmax.f32 %v2287_v21, 0.0  ;;  %v9547_v51 = vmax.f32 %v2283_v23, 0.0  ;;  %v9555_v7 = vmax.f32 %v2288_v31, 0.0  ;;  %v9557_v29 = vmax.f32 %v2284_v0, 0.0 }
 0x33b   :  { %v9565_v12 = vmax.f32 %v2289_v6, 0.0  ;;  %v9567_v19 = vmax.f32 %v2285_v2, 0.0  ;;  %v9573_v8 = vmax.f32 %v2290_v61, 0.0  ;;  %v9575_v40 = vmax.f32 %v2286_v35, 0.0 }
 0x33c   :  { %2337 = vrot.lane.b32.xlu0 %v9545_v46, %s8905_s13  ;;  %2335 = vrot.lane.b32.xlu1 %v9547_v51, %s8905_s13 }
 0x340   :  { %2341 = vrot.lane.b32.xlu0 %v9555_v7, %s8905_s13  ;;  %2339 = vrot.lane.b32.xlu1 %v9557_v29, %s8905_s13 }
 0x344   :  { %2345 = vrot.lane.b32.xlu0 %v9565_v12, %s8905_s13  ;;  %2343 = vrot.lane.b32.xlu1 %v9567_v19, %s8905_s13 }
 0x348   :  { %2349 = vrot.lane.b32.xlu0 %v9573_v8, %s8905_s13  ;;  %2347 = vrot.lane.b32.xlu1 %v9575_v40, %s8905_s13 }
 0x34c   :  { %2301 = vrot.lane.b32.xlu0 %v9545_v46, %s8906_s0  ;;  %2299 = vrot.lane.b32.xlu1 %v9547_v51, %s8906_s0 }
 0x350   :  { %2305 = vrot.lane.b32.xlu0 %v9555_v7, %s8906_s0  ;;  %2303 = vrot.lane.b32.xlu1 %v9557_v29, %s8906_s0 }
 0x354   :  { %2309 = vrot.lane.b32.xlu0 %v9565_v12, %s8906_s0  ;;  %2307 = vrot.lane.b32.xlu1 %v9567_v19, %s8906_s0 }
 0x358   :  { %2313 = vrot.lane.b32.xlu0 %v9573_v8, %s8906_s0  ;;  %2311 = vrot.lane.b32.xlu1 %v9575_v40, %s8906_s0 }
 0x35c   :  { %2755 = vrot.lane.b32.xlu0 %v9545_v46, %s8907_s14  ;;  %2753 = vrot.lane.b32.xlu1 %v9547_v51, %s8907_s14 }
 0x360   :  { %2759 = vrot.lane.b32.xlu0 %v9555_v7, %s8907_s14  ;;  %2757 = vrot.lane.b32.xlu1 %v9557_v29, %s8907_s14 }
 0x364   :  { %2763 = vrot.lane.b32.xlu0 %v9565_v12, %s8907_s14  ;;  %2761 = vrot.lane.b32.xlu1 %v9567_v19, %s8907_s14 }
 0x368   :  { %2767 = vrot.lane.b32.xlu0 %v9573_v8, %s8907_s14  ;;  %2765 = vrot.lane.b32.xlu1 %v9575_v40, %s8907_s14 }
 0x36c   :  { %2998 = vrot.lane.b32.xlu0 %v9545_v46, %s8908_s15  ;;  %2996 = vrot.lane.b32.xlu1 %v9547_v51, %s8908_s15 }
 0x370   :  { %3002 = vrot.lane.b32.xlu0 %v9555_v7, %s8908_s15  ;;  %3000 = vrot.lane.b32.xlu1 %v9557_v29, %s8908_s15 }
 0x374   :  { %3006 = vrot.lane.b32.xlu0 %v9565_v12, %s8908_s15  ;;  %3004 = vrot.lane.b32.xlu1 %v9567_v19, %s8908_s15 }
 0x378   :  { %3010 = vrot.lane.b32.xlu0 %v9573_v8, %s8908_s15  ;;  %3008 = vrot.lane.b32.xlu1 %v9575_v40, %s8908_s15 }
 0x37c   :  { %3452 = vrot.lane.b32.xlu0 %v9545_v46, %s8909_s16  ;;  %3450 = vrot.lane.b32.xlu1 %v9547_v51, %s8909_s16 }
 0x380   :  { %3456 = vrot.lane.b32.xlu0 %v9555_v7, %s8909_s16  ;;  %3454 = vrot.lane.b32.xlu1 %v9557_v29, %s8909_s16 }
 0x384   :  { %3460 = vrot.lane.b32.xlu0 %v9565_v12, %s8909_s16  ;;  %3458 = vrot.lane.b32.xlu1 %v9567_v19, %s8909_s16 }
 0x388   :  { %3464 = vrot.lane.b32.xlu0 %v9573_v8, %s8909_s16  ;;  %3462 = vrot.lane.b32.xlu1 %v9575_v40, %s8909_s16 }
 0x38c   :  { %3695 = vrot.lane.b32.xlu0 %v9545_v46, %s8910_s17  ;;  %3693 = vrot.lane.b32.xlu1 %v9547_v51, %s8910_s17 }
 0x390   :  { %3699 = vrot.lane.b32.xlu0 %v9555_v7, %s8910_s17  ;;  %3697 = vrot.lane.b32.xlu1 %v9557_v29, %s8910_s17 }
 0x394   :  { %3703 = vrot.lane.b32.xlu0 %v9565_v12, %s8910_s17  ;;  %3701 = vrot.lane.b32.xlu1 %v9567_v19, %s8910_s17 }
 0x398   :  { %3707 = vrot.lane.b32.xlu0 %v9573_v8, %s8910_s17  ;;  %3705 = vrot.lane.b32.xlu1 %v9575_v40, %s8910_s17 }
 0x39c   :  { %3938 = vrot.lane.b32.xlu0 %v9545_v46, %s8911_s18  ;;  %3936 = vrot.lane.b32.xlu1 %v9547_v51, %s8911_s18 }
 0x3a0   :  { %3942 = vrot.lane.b32.xlu0 %v9555_v7, %s8911_s18  ;;  %3940 = vrot.lane.b32.xlu1 %v9557_v29, %s8911_s18 }
 0x3a4   :  { %3946 = vrot.lane.b32.xlu0 %v9565_v12, %s8911_s18  ;;  %3944 = vrot.lane.b32.xlu1 %v9567_v19, %s8911_s18 }
 0x3a8   :  { %3950 = vrot.lane.b32.xlu0 %v9573_v8, %s8911_s18  ;;  %3948 = vrot.lane.b32.xlu1 %v9575_v40, %s8911_s18 }
 0x3ac   :  { %4181 = vrot.lane.b32.xlu0 %v9545_v46, %s8912_s19  ;;  %4179 = vrot.lane.b32.xlu1 %v9547_v51, %s8912_s19 }
 0x3ae   :  { %v2338_v3 = vpop.permute.xlu0 %2337  ;;  %v2336_v41 = vpop.permute.xlu1 %2335 }
 0x3b0   :  { %4185 = vrot.lane.b32.xlu0 %v9555_v7, %s8912_s19  ;;  %4183 = vrot.lane.b32.xlu1 %v9557_v29, %s8912_s19 }
 0x3b2   :  { %v2342_v42 = vpop.permute.xlu0 %2341  ;;  %v2340_v43 = vpop.permute.xlu1 %2339 }
 0x3b3   :  { %v2356_v17 = vsel %vm134_vm1, %v2338_v3, %v2342_v42  ;;  %v2355_v20 = vsel %vm134_vm1, %v2336_v41, %v2340_v43 }
 0x3b4   :  { %v2364_v47 = vmul.f32 %v2356_v17, %v9085_v26  ;;  %4189 = vrot.lane.b32.xlu0 %v9565_v12, %s8912_s19  ;;  %v2360_v33 = vmul.f32 %v2355_v20, %v9085_v26  ;;  %4187 = vrot.lane.b32.xlu1 %v9567_v19, %s8912_s19  ;;  %v7564_v20 = vld [vmem:[%s11543_s3 + $0x20] sm:$0xff] }
 0x3b6   :  { %v2346_v50 = vpop.permute.xlu0 %2345  ;;  %v2344_v52 = vpop.permute.xlu1 %2343  ;;  %v8266_v11 = vpack.c.bf16 %v2364_v47, %v2360_v33 }
 0x3b7   :  { %v2354_v16 = vsel %vm134_vm1, %v2342_v42, %v2346_v50  ;;  %v2353_v21 = vsel %vm134_vm1, %v2340_v43, %v2344_v52 }
 0x3b8   :  { %4193 = vrot.lane.b32.xlu0 %v9573_v8, %s8912_s19  ;;  %4191 = vrot.lane.b32.xlu1 %v9575_v40, %s8912_s19  ;;  %v2365_v23 = vmul.f32 %v2354_v16, %v9090_v28  ;;  %v2361_v31 = vmul.f32 %v2353_v21, %v9090_v28  ;;  %v11681_v21 = vmov 0.0  }
 0x3b9   :  { %8267 = vmatprep.subr.bf16.mxu0 %v8266_v11 }
 0x3ba   :  { %v2350_v49 = vpop.permute.xlu0 %2349  ;;  %v2348_v60 = vpop.permute.xlu1 %2347 }
 0x3bb   :  { %v2352_v0 = vsel %vm134_vm1, %v2346_v50, %v2350_v49  ;;  %v2358_v32 = vsel %vm134_vm1, %v2350_v49, %v2338_v3  ;;  %v2351_v1 = vsel %vm134_vm1, %v2344_v52, %v2348_v60  ;;  %v2357_v9 = vsel %vm134_vm1, %v2348_v60, %v2336_v41  ;;  %v7565_v49 = vld [vmem:[%s11543_s3 + $0x28] sm:$0xff]  ;;  %v7566_v60 = vld [vmem:[%s11543_s3 + $0x30] sm:$0xff] }
 0x3bc   :  { %v2363_v6 = vmul.f32 %v2358_v32, %v9081_v24  ;;  %v2366_v2 = vmul.f32 %v2352_v0, %v9070_v18  ;;  %v2359_v61 = vmul.f32 %v2357_v9, %v9081_v24  ;;  %v2362_v35 = vmul.f32 %v2351_v1, %v9070_v18 }
 0x3bd   :  { %v8272_v3 = vpack.c.bf16 %v2365_v23, %v2361_v31 }
 0x3be   :  { %v2302_v42 = vpop.permute.xlu0 %2301  ;;  %v8268_v17 = vpack.c.bf16 %v2363_v6, %v2359_v61  ;;  %v2300_v43 = vpop.permute.xlu1 %2299  ;;  %v8270_v47 = vpack.c.bf16 %v2366_v2, %v2362_v35 }
 0x3c0   :  { %8269 = vmatpush1.bf16.msra.mxu0 %v8268_v17  ;;  %8271 = vmatprep.subr.bf16.mxu1 %v8270_v47 }
 0x3c1   :  { %8273 = vmatpush1.bf16.msra.mxu1 %v8272_v3 }
 0x3c2   :  { %v2306_v33 = vpop.permute.xlu0 %2305  ;;  %v2304_v50 = vpop.permute.xlu1 %2303 }
 0x3c3   :  { %v2320_v41 = vsel %vm93_vm2, %v2302_v42, %v2306_v33  ;;  %v2319_v11 = vsel %vm93_vm2, %v2300_v43, %v2304_v50  ;;  %7568 = vmatmul.mubr.msk.f32.vlgmr.msra.gmra.mrb[12].mxu0 %vm2372_vm10, %v7564_v20 }
 0x3c4   :  { %v2328_v52 = vmul.f32 %v2320_v41, %v9110_v39  ;;  %v2324_v16 = vmul.f32 %v2319_v11, %v9110_v39  ;;  %7572 = vmatmul.mubr.msk.f32.vlgmr.msra.gmra.mrb[12].mxu1 %vm2372_vm10, %v7564_v20  ;;  %2455 = vmatprep.mubr.f32.mxu0 %v11681_v21 }
 0x3c5   :  { %2544 = vmatprep.mubr.f32.mxu1 %v11681_v21 }
 0x3c6   :  { %v2310_v23 = vpop.permute.xlu0 %2309  ;;  %v2308_v31 = vpop.permute.xlu1 %2307  ;;  %v8274_v0 = vpack.c.bf16 %v2328_v52, %v2324_v16 }
 0x3c7   :  { %v2318_v32 = vsel %vm93_vm2, %v2306_v33, %v2310_v23  ;;  %7569 = vmatmul.mubr.msk.f32.gmra.mrb[14].mxu0 %vm2372_vm10, %v7565_v49  ;;  %v2317_v6 = vsel %vm93_vm2, %v2304_v50, %v2308_v31 }
 0x3c8   :  { %7573 = vmatmul.mubr.msk.f32.gmra.mrb[14].mxu1 %vm2372_vm10, %v7565_v49  ;;  %8275 = vmatprep.subr.bf16.mxu0 %v8274_v0  ;;  %v2329_v1 = vmul.f32 %v2318_v32, %v9118_v44  ;;  %v2325_v33 = vmul.f32 %v2317_v6, %v9118_v44 }
 0x3c9   :  { %2461 = vmatprep.mubr.f32.mxu0 %v11681_v21  ;;  %2550 = vmatprep.mubr.f32.mxu1 %v11681_v21 }
 0x3ca   :  { %v2314_v2 = vpop.permute.xlu0 %2313  ;;  %v2312_v35 = vpop.permute.xlu1 %2311  ;;  %v8280_v49 = vpack.c.bf16 %v2329_v1, %v2325_v33  ;;  %v2332_v1 = vld [vmem:[%s11543_s3 + $0x8] sm:$0xff] }
 0x3cb   :  { %v2316_v9 = vsel %vm93_vm2, %v2310_v23, %v2314_v2  ;;  %v2322_v61 = vsel %vm93_vm2, %v2314_v2, %v2302_v42  ;;  %v2315_v3 = vsel %vm93_vm2, %v2308_v31, %v2312_v35  ;;  %v2321_v20 = vsel %vm93_vm2, %v2312_v35, %v2300_v43  ;;  %7570 = vmatmul.mubr.msk.f32.gmra.mrb[16].mxu0 %vm2372_vm10, %v7566_v60  ;;  %v7567_v42 = vld [vmem:[%s11543_s3 + $0x38] sm:$0xff]  ;;  %v2331_v23 = vld [vmem:[%s11543_s3] sm:$0xff] }
 0x3cc   :  { %v2327_v17 = vmul.f32 %v2322_v61, %v9107_v38  ;;  %v2330_v47 = vmul.f32 %v2316_v9, %v9128_v48  ;;  %v2323_v41 = vmul.f32 %v2321_v20, %v9107_v38  ;;  %v2326_v50 = vmul.f32 %v2315_v3, %v9128_v48  ;;  %7574 = vmatmul.mubr.msk.f32.gmra.mrb[16].mxu1 %vm2372_vm10, %v7566_v60 }
 0x3cd   :  { %2467 = vmatprep.mubr.f32.mxu0 %v11681_v21  ;;  %2556 = vmatprep.mubr.f32.mxu1 %v11681_v21 }
 0x3ce   :  { %v2756_v52 = vpop.permute.xlu0 %2755  ;;  %v8276_v43 = vpack.c.bf16 %v2327_v17, %v2323_v41  ;;  %v2754_v11 = vpop.permute.xlu1 %2753  ;;  %v8278_v16 = vpack.c.bf16 %v2330_v47, %v2326_v50  ;;  %v2333_v17 = vld [vmem:[%s11543_s3 + $0x10] sm:$0xff] }
 0x3cf   :  { %7571 = vmatmul.mubr.msk.f32.gmra.mrb[18].mxu0 %vm2372_vm10, %v7567_v42 }
 0x3d0   :  { %7575 = vmatmul.mubr.msk.f32.gmra.mrb[18].mxu1 %vm2372_vm10, %v7567_v42  ;;  %8277 = vmatpush1.bf16.msra.mxu0 %v8276_v43 }
 0x3d1   :  { %8279 = vmatprep.subr.bf16.mxu1 %v8278_v16  ;;  %2639 = vmatprep.mubr.f32.mxu0 %v11681_v21 }
 0x3d2   :  { %v2760_v31 = vpop.permute.xlu0 %2759  ;;  %8281 = vmatpush1.bf16.msra.mxu1 %v8280_v49  ;;  %v2758_v32 = vpop.permute.xlu1 %2757  ;;  %2728 = vmatprep.mubr.f32.mxu1 %v11681_v21 }
 0x3d3   :  { %v2774_v0 = vsel %vm498_vm4, %v2756_v52, %v2760_v31  ;;  %v2773_v6 = vsel %vm498_vm4, %v2754_v11, %v2758_v32  ;;  %7576 = vmatmul.mubr.msk.f32.vlgmr.msra.gmra.mrb[12].mxu0 %vm2372_vm10, %v2331_v23 }
 0x3d4   :  { %v2782_v60 = vmul.f32 %v2774_v0, %v9140_v54  ;;  %v2778_v2 = vmul.f32 %v2773_v6, %v9140_v54  ;;  %2645 = vmatprep.mubr.f32.mxu0 %v11681_v21 }
 0x3d5   :  { %7580 = vmatmul.mubr.msk.f32.vlgmr.msra.gmra.mrb[12].mxu1 %vm2372_vm10, %v2331_v23 }
 0x3d6   :  { %v2764_v9 = vpop.permute.xlu0 %2763  ;;  %v2762_v61 = vpop.permute.xlu1 %2761  ;;  %2734 = vmatprep.mubr.f32.mxu1 %v11681_v21  ;;  %v8282_v35 = vpack.c.bf16 %v2782_v60, %v2778_v2 }
 0x3d7   :  { %7577 = vmatmul.mubr.msk.f32.gmra.mrb[14].mxu0 %vm2372_vm10, %v2332_v1  ;;  %v2772_v47 = vsel %vm498_vm4, %v2760_v31, %v2764_v9  ;;  %v2771_v3 = vsel %vm498_vm4, %v2758_v32, %v2762_v61  ;;  %v2334_v32 = vld [vmem:[%s11543_s3 + $0x18] sm:$0xff] }
 0x3d8   :  { %8283 = vmatprep.subr.bf16.mxu0 %v8282_v35  ;;  %2651 = vmatprep.mubr.f32.mxu0 %v11681_v21  ;;  %v2783_v23 = vmul.f32 %v2772_v47, %v9159_v63  ;;  %v2779_v31 = vmul.f32 %v2771_v3, %v9159_v63 }
 0x3d9   :  { %7581 = vmatmul.mubr.msk.f32.gmra.mrb[14].mxu1 %vm2372_vm10, %v2332_v1 }
 0x3da   :  { %v2768_v20 = vpop.permute.xlu0 %2767  ;;  %v2766_v50 = vpop.permute.xlu1 %2765  ;;  %2740 = vmatprep.mubr.f32.mxu1 %v11681_v21  ;;  %v8288_v1 = vpack.c.bf16 %v2783_v23, %v2779_v31 }
 0x3db   :  { %v2770_v33 = vsel %vm498_vm4, %v2764_v9, %v2768_v20  ;;  %v2776_v41 = vsel %vm498_vm4, %v2768_v20, %v2756_v52  ;;  %v2769_v16 = vsel %vm498_vm4, %v2762_v61, %v2766_v50  ;;  %v2775_v49 = vsel %vm498_vm4, %v2766_v50, %v2754_v11  ;;  %7578 = vmatmul.mubr.msk.f32.gmra.mrb[16].mxu0 %vm2372_vm10, %v2333_v17  ;;  %v7584_v9 = vld [vmem:[%s11543_s3 + $0x40] sm:$0xff] }
 0x3dc   :  { %v2781_v42 = vmul.f32 %v2776_v41, %v9148_v57  ;;  %v2784_v43 = vmul.f32 %v2770_v33, %v9166_v4  ;;  %v2777_v52 = vmul.f32 %v2775_v49, %v9148_v57  ;;  %v2780_v0 = vmul.f32 %v2769_v16, %v9166_v4  ;;  %2657 = vmatprep.mubr.f32.mxu0 %v11681_v21  ;;  %v7585_v33 = vld [vmem:[%s11543_s3 + $0x48] sm:$0xff] }
 0x3dd   :  { %7582 = vmatmul.mubr.msk.f32.gmra.mrb[16].mxu1 %vm2372_vm10, %v2333_v17 }
 0x3de   :  { %v2999_v60 = vpop.permute.xlu0 %2998  ;;  %v8284_v11 = vpack.c.bf16 %v2781_v42, %v2777_v52  ;;  %v2997_v6 = vpop.permute.xlu1 %2996  ;;  %2746 = vmatprep.mubr.f32.mxu1 %v11681_v21  ;;  %v8286_v2 = vpack.c.bf16 %v2784_v43, %v2780_v0  ;;  %v7586_v43 = vld [vmem:[%s11543_s3 + $0x50] sm:$0xff] }
 0x3df   :  { %7579 = vmatmul.mubr.msk.f32.gmra.mrb[18].mxu0 %vm2372_vm10, %v2334_v32 }
 0x3e0   :  { %8285 = vmatpush1.bf16.msra.mxu0 %v8284_v11  ;;  %8287 = vmatprep.subr.bf16.mxu1 %v8286_v2 }
 0x3e1   :  { %7583 = vmatmul.mubr.msk.f32.gmra.mrb[18].mxu1 %vm2372_vm10, %v2334_v32  ;;  %2866 = vmatprep.mubr.f32.mxu0 %v11681_v21 }
 0x3e2   :  { %v3003_v61 = vpop.permute.xlu0 %3002  ;;  %8289 = vmatpush1.bf16.msra.mxu1 %v8288_v1  ;;  %v3001_v17 = vpop.permute.xlu1 %3000  ;;  %2955 = vmatprep.mubr.f32.mxu1 %v11681_v21 }
 0x3e3   :  { %v3017_v35 = vsel %vm709_vm5, %v2999_v60, %v3003_v61  ;;  %v3016_v3 = vsel %vm709_vm5, %v2997_v6, %v3001_v17  ;;  %7588 = vmatmul.mubr.msk.f32.vlgmr.msra.gmra.mrb[12].mxu0 %vm2372_vm10, %v7584_v9 }
 0x3e4   :  { %v3025_v47 = vmul.f32 %v3017_v35, %v9181_v22  ;;  %v3021_v20 = vmul.f32 %v3016_v3, %v9181_v22  ;;  %2872 = vmatprep.mubr.f32.mxu0 %v11681_v21 }
 0x3e5   :  { %7592 = vmatmul.mubr.msk.f32.vlgmr.msra.gmra.mrb[12].mxu1 %vm2372_vm10, %v7584_v9 }
 0x3e6   :  { %v3007_v41 = vpop.permute.xlu0 %3006  ;;  %v3005_v50 = vpop.permute.xlu1 %3004  ;;  %2961 = vmatprep.mubr.f32.mxu1 %v11681_v21  ;;  %v8290_v42 = vpack.c.bf16 %v3025_v47, %v3021_v20 }
 0x3e7   :  { %7589 = vmatmul.mubr.msk.f32.gmra.mrb[14].mxu0 %vm2372_vm10, %v7585_v33  ;;  %v3015_v16 = vsel %vm709_vm5, %v3003_v61, %v3007_v41  ;;  %v3014_v49 = vsel %vm709_vm5, %v3001_v17, %v3005_v50  ;;  %v7587_v17 = vld [vmem:[%s11543_s3 + $0x58] sm:$0xff] }
 0x3e8   :  { %8291 = vmatprep.subr.bf16.mxu0 %v8290_v42  ;;  %2878 = vmatprep.mubr.f32.mxu0 %v11681_v21  ;;  %v3026_v9 = vmul.f32 %v3015_v16, %v9201_v34  ;;  %v3022_v61 = vmul.f32 %v3014_v49, %v9201_v34 }
 0x3e9   :  { %7593 = vmatmul.mubr.msk.f32.gmra.mrb[14].mxu1 %vm2372_vm10, %v7585_v33  ;;  %v8298_v33 = vpack.c.bf16 %v9555_v7, %v9557_v29  ;;  %v8300_v7 = vpack.c.bf16 %v9545_v46, %v9547_v51  ;;  %v8304_v29 = vpack.c.bf16 %v9565_v12, %v9567_v19 }
 0x3ea   :  { %v3011_v23 = vpop.permute.xlu0 %3010  ;;  %v3009_v0 = vpop.permute.xlu1 %3008  ;;  %2967 = vmatprep.mubr.f32.mxu1 %v11681_v21 }
 0x3eb   :  { %v3013_v31 = vsel %vm709_vm5, %v3007_v41, %v3011_v23  ;;  %v3019_v52 = vsel %vm709_vm5, %v3011_v23, %v2999_v60  ;;  %v3012_v2 = vsel %vm709_vm5, %v3005_v50, %v3009_v0  ;;  %v3018_v1 = vsel %vm709_vm5, %v3009_v0, %v2997_v6  ;;  %7590 = vmatmul.mubr.msk.f32.gmra.mrb[16].mxu0 %vm2372_vm10, %v7586_v43  ;;  %v7596_v50 = vld [vmem:[%s11543_s3 + $0x60] sm:$0xff]  ;;  %v7598_v23 = vld [vmem:[%s11543_s3 + $0x70] sm:$0xff] }
 0x3ec   :  { %v3024_v32 = vmul.f32 %v3019_v52, %v9189_v27  ;;  %v3027_v11 = vmul.f32 %v3013_v31, %v9208_v37  ;;  %v3020_v60 = vmul.f32 %v3018_v1, %v9189_v27  ;;  %v3023_v35 = vmul.f32 %v3012_v2, %v9208_v37  ;;  %2884 = vmatprep.mubr.f32.mxu0 %v11681_v21 }
 0x3ed   :  { %7594 = vmatmul.mubr.msk.f32.gmra.mrb[16].mxu1 %vm2372_vm10, %v7586_v43  ;;  %v8296_v41 = vpack.c.bf16 %v3026_v9, %v3022_v61  ;;  %v8302_v43 = vpack.c.bf16 %v9573_v8, %v9575_v40  ;;  %v7597_v8 = vld [vmem:[%s11543_s3 + $0x68] sm:$0xff] }
 0x3ee   :  { %v3453_v47 = vpop.permute.xlu0 %3452  ;;  %v8292_v6 = vpack.c.bf16 %v3024_v32, %v3020_v60  ;;  %v3451_v3 = vpop.permute.xlu1 %3450  ;;  %2973 = vmatprep.mubr.f32.mxu1 %v11681_v21  ;;  %v8294_v20 = vpack.c.bf16 %v3027_v11, %v3023_v35  ;;  %v7599_v60 = vld [vmem:[%s11543_s3 + $0x78] sm:$0xff] }
 0x3ef   :  { %7591 = vmatmul.mubr.msk.f32.gmra.mrb[18].mxu0 %vm2372_vm10, %v7587_v17 }
 0x3f0   :  { %8293 = vmatpush1.bf16.msra.mxu0 %v8292_v6  ;;  %8295 = vmatprep.subr.bf16.mxu1 %v8294_v20 }
 0x3f1   :  { %7595 = vmatmul.mubr.msk.f32.gmra.mrb[18].mxu1 %vm2372_vm10, %v7587_v17  ;;  %8299 = vmatprep.subr.bf16.mxu0 %v8298_v33 }
 0x3f2   :  { %v3457_v42 = vpop.permute.xlu0 %3456  ;;  %8297 = vmatpush1.bf16.msra.mxu1 %v8296_v41  ;;  %3109 = vmatprep.mubr.f32.mxu0 %v11681_v21  ;;  %v3455_v16 = vpop.permute.xlu1 %3454 }
 0x3f3   :  { %8303 = vmatprep.subr.bf16.mxu1 %v8302_v43  ;;  %7600 = vmatmul.mubr.msk.f32.vlgmr.msra.gmra.mrb[12].mxu0 %vm2372_vm10, %v7596_v50  ;;  %v3471_v11 = vsel %vm1091_vm6, %v3453_v47, %v3457_v42  ;;  %v3470_v2 = vsel %vm1091_vm6, %v3451_v3, %v3455_v16 }
 0x3f4   :  { %3198 = vmatprep.mubr.f32.mxu1 %v11681_v21  ;;  %8301 = vmatpush1.bf16.msra.mxu0 %v8300_v7  ;;  %v3478_v6 = vmul.f32 %v3471_v11, %v9244_v58 }
 0x3f5   :  { %7604 = vmatmul.mubr.msk.f32.vlgmr.msra.gmra.mrb[12].mxu1 %vm2372_vm10, %v7596_v50  ;;  %3115 = vmatprep.mubr.f32.mxu0 %v11681_v21 }
 0x3f6   :  { %v3461_v40 = vpop.permute.xlu0 %3460  ;;  %8305 = vmatpush1.bf16.msra.mxu1 %v8304_v29  ;;  %v3459_v51 = vpop.permute.xlu1 %3458  ;;  %3204 = vmatprep.mubr.f32.mxu1 %v11681_v21 }
 0x3f7   :  { %v3469_v46 = vsel %vm1091_vm6, %v3457_v42, %v3461_v40  ;;  %v3468_v12 = vsel %vm1091_vm6, %v3455_v16, %v3459_v51  ;;  %7601 = vmatmul.mubr.msk.f32.gmra.mrb[14].mxu0 %vm2372_vm10, %v7597_v8  ;;  %v7608_v42 = vld [vmem:[%s11543_s3 + $0x80] sm:$0xff] }
 0x3f8   :  { %v3479_v49 = vmul.f32 %v3469_v46, %v9241_v56  ;;  %v3475_v19 = vmul.f32 %v3468_v12, %v9241_v56  ;;  %3121 = vmatprep.mubr.f32.mxu0 %v11681_v21 }
 0x3f9   :  { %7605 = vmatmul.mubr.msk.f32.gmra.mrb[14].mxu1 %vm2372_vm10, %v7597_v8  ;;  %v7609_v8 = vld [vmem:[%s11543_s3 + $0x88] sm:$0xff] }
 0x3fa   :  { %v3465_v31 = vpop.permute.xlu0 %3464  ;;  %v3463_v0 = vpop.permute.xlu1 %3462  ;;  %3210 = vmatprep.mubr.f32.mxu1 %v11681_v21  ;;  %v8306_v32 = vpack.c.bf16 %v3479_v49, %v3475_v19 }
 0x3fb   :  { %v3473_v52 = vsel %vm1091_vm6, %v3465_v31, %v3453_v47  ;;  %v3472_v9 = vsel %vm1091_vm6, %v3463_v0, %v3451_v3  ;;  %7602 = vmatmul.mubr.msk.f32.gmra.mrb[16].mxu0 %vm2372_vm10, %v7598_v23  ;;  %v3467_v35 = vsel %vm1091_vm6, %v3461_v40, %v3465_v31  ;;  %v3466_v17 = vsel %vm1091_vm6, %v3459_v51, %v3463_v0 }
 0x3fc   :  { %v3481_v1 = vmul.f32 %v3473_v52, %v9234_v53  ;;  %v3477_v61 = vmul.f32 %v3472_v9, %v9234_v53  ;;  %8307 = vmatprep.subr.bf16.mxu0 %v8306_v32  ;;  %3127 = vmatprep.mubr.f32.mxu0 %v11681_v21  ;;  %v3474_v3 = vmul.f32 %v3470_v2, %v9244_v58 }
 0x3fd   :  { %7606 = vmatmul.mubr.msk.f32.gmra.mrb[16].mxu1 %vm2372_vm10, %v7598_v23  ;;  %v3480_v41 = vmul.f32 %v3467_v35, %v9257_v62  ;;  %v3476_v50 = vmul.f32 %v3466_v17, %v9257_v62  ;;  %v7610_v23 = vld [vmem:[%s11543_s3 + $0x90] sm:$0xff] }
 0x3fe   :  { %v3696_v47 = vpop.permute.xlu0 %3695  ;;  %v3694_v20 = vpop.permute.xlu1 %3693  ;;  %3216 = vmatprep.mubr.f32.mxu1 %v11681_v21  ;;  %v8310_v33 = vpack.c.bf16 %v3481_v1, %v3477_v61  ;;  %v8308_v16 = vpack.c.bf16 %v3478_v6, %v3474_v3 }
 0x3ff   :  { %7603 = vmatmul.mubr.msk.f32.gmra.mrb[18].mxu0 %vm2372_vm10, %v7599_v60  ;;  %v8312_v29 = vpack.c.bf16 %v3480_v41, %v3476_v50 }
 0x400   :  { %8311 = vmatprep.subr.bf16.mxu1 %v8310_v33  ;;  %3320 = vmatprep.mubr.f32.mxu0 %v11681_v21 }
 0x401   :  { %7607 = vmatmul.mubr.msk.f32.gmra.mrb[18].mxu1 %vm2372_vm10, %v7599_v60  ;;  %v7611_v60 = vld [vmem:[%s11543_s3 + $0x98] sm:$0xff] }
 0x402   :  { %v3700_v43 = vpop.permute.xlu0 %3699  ;;  %v3698_v7 = vpop.permute.xlu1 %3697  ;;  %3409 = vmatprep.mubr.f32.mxu1 %v11681_v21 }
 0x403   :  { %7612 = vmatmul.mubr.msk.f32.vlgmr.msra.gmra.mrb[12].mxu0 %vm2372_vm10, %v7608_v42  ;;  %v3714_v11 = vsel %vm1302_vm7, %v3696_v47, %v3700_v43  ;;  %v3713_v2 = vsel %vm1302_vm7, %v3694_v20, %v3698_v7 }
 0x404   :  { %8309 = vmatpush1.bf16.msra.mxu0 %v8308_v16  ;;  %3326 = vmatprep.mubr.f32.mxu0 %v11681_v21  ;;  %v3721_v6 = vmul.f32 %v3714_v11, %v9290_v30  ;;  %v3717_v3 = vmul.f32 %v3713_v2, %v9290_v30 }
 0x405   :  { %7616 = vmatmul.mubr.msk.f32.vlgmr.msra.gmra.mrb[12].mxu1 %vm2372_vm10, %v7608_v42  ;;  %v7620_v42 = vld [vmem:[%s11543_s3 + $0xa0] sm:$0xff] }
 0x406   :  { %v3704_v40 = vpop.permute.xlu0 %3703  ;;  %8313 = vmatpush1.bf16.msra.mxu1 %v8312_v29  ;;  %v3702_v51 = vpop.permute.xlu1 %3701  ;;  %3415 = vmatprep.mubr.f32.mxu1 %v11681_v21  ;;  %v8316_v16 = vpack.c.bf16 %v3721_v6, %v3717_v3 }
 0x407   :  { %v3712_v46 = vsel %vm1302_vm7, %v3700_v43, %v3704_v40  ;;  %v3711_v12 = vsel %vm1302_vm7, %v3698_v7, %v3702_v51  ;;  %7613 = vmatmul.mubr.msk.f32.gmra.mrb[14].mxu0 %vm2372_vm10, %v7609_v8 }
 0x408   :  { %v3722_v49 = vmul.f32 %v3712_v46, %v9286_v25  ;;  %v3718_v19 = vmul.f32 %v3711_v12, %v9286_v25  ;;  %3332 = vmatprep.mubr.f32.mxu0 %v11681_v21 }
 0x409   :  { %7617 = vmatmul.mubr.msk.f32.gmra.mrb[14].mxu1 %vm2372_vm10, %v7609_v8  ;;  %v7621_v8 = vld [vmem:[%s11543_s3 + $0xa8] sm:$0xff] }
 0x40a   :  { %v3708_v31 = vpop.permute.xlu0 %3707  ;;  %v3706_v0 = vpop.permute.xlu1 %3705  ;;  %3421 = vmatprep.mubr.f32.mxu1 %v11681_v21  ;;  %v8314_v32 = vpack.c.bf16 %v3722_v49, %v3718_v19 }
 0x40b   :  { %v3716_v52 = vsel %vm1302_vm7, %v3708_v31, %v3696_v47  ;;  %v3715_v9 = vsel %vm1302_vm7, %v3706_v0, %v3694_v20  ;;  %7614 = vmatmul.mubr.msk.f32.gmra.mrb[16].mxu0 %vm2372_vm10, %v7610_v23  ;;  %v3710_v35 = vsel %vm1302_vm7, %v3704_v40, %v3708_v31  ;;  %v3709_v17 = vsel %vm1302_vm7, %v3702_v51, %v3706_v0 }
 0x40c   :  { %v3724_v1 = vmul.f32 %v3716_v52, %v9272_v10  ;;  %v3720_v61 = vmul.f32 %v3715_v9, %v9272_v10  ;;  %8315 = vmatprep.subr.bf16.mxu0 %v8314_v32  ;;  %3338 = vmatprep.mubr.f32.mxu0 %v11681_v21  ;;  %v3723_v41 = vmul.f32 %v3710_v35, %v9303_v36 }
 0x40d   :  { %7618 = vmatmul.mubr.msk.f32.gmra.mrb[16].mxu1 %vm2372_vm10, %v7610_v23  ;;  %v3719_v50 = vmul.f32 %v3709_v17, %v9303_v36  ;;  %v7622_v23 = vld [vmem:[%s11543_s3 + $0xb0] sm:$0xff] }
 0x40e   :  { %v3939_v47 = vpop.permute.xlu0 %3938  ;;  %v3937_v20 = vpop.permute.xlu1 %3936  ;;  %3427 = vmatprep.mubr.f32.mxu1 %v11681_v21  ;;  %v8318_v33 = vpack.c.bf16 %v3724_v1, %v3720_v61 }
 0x40f   :  { %7615 = vmatmul.mubr.msk.f32.gmra.mrb[18].mxu0 %vm2372_vm10, %v7611_v60  ;;  %v8320_v29 = vpack.c.bf16 %v3723_v41, %v3719_v50 }
 0x410   :  { %8319 = vmatprep.subr.bf16.mxu1 %v8318_v33  ;;  %3563 = vmatprep.mubr.f32.mxu0 %v11681_v21 }
 0x411   :  { %7619 = vmatmul.mubr.msk.f32.gmra.mrb[18].mxu1 %vm2372_vm10, %v7611_v60  ;;  %v7623_v60 = vld [vmem:[%s11543_s3 + $0xb8] sm:$0xff] }
 0x412   :  { %v3943_v43 = vpop.permute.xlu0 %3942  ;;  %v3941_v7 = vpop.permute.xlu1 %3940  ;;  %3652 = vmatprep.mubr.f32.mxu1 %v11681_v21 }
 0x413   :  { %7624 = vmatmul.mubr.msk.f32.vlgmr.msra.gmra.mrb[12].mxu0 %vm2372_vm10, %v7620_v42  ;;  %v3957_v11 = vsel %vm1513_vm8, %v3939_v47, %v3943_v43  ;;  %v3956_v2 = vsel %vm1513_vm8, %v3937_v20, %v3941_v7 }
 0x414   :  { %8317 = vmatpush1.bf16.msra.mxu0 %v8316_v16  ;;  %3569 = vmatprep.mubr.f32.mxu0 %v11681_v21  ;;  %v3964_v6 = vmul.f32 %v3957_v11, %v9332_v59  ;;  %v3960_v3 = vmul.f32 %v3956_v2, %v9332_v59 }
 0x415   :  { %7628 = vmatmul.mubr.msk.f32.vlgmr.msra.gmra.mrb[12].mxu1 %vm2372_vm10, %v7620_v42  ;;  %v7632_v42 = vld [vmem:[%s11543_s3 + $0xc0] sm:$0xff] }
 0x416   :  { %v3947_v40 = vpop.permute.xlu0 %3946  ;;  %8321 = vmatpush1.bf16.msra.mxu1 %v8320_v29  ;;  %v3945_v51 = vpop.permute.xlu1 %3944  ;;  %3658 = vmatprep.mubr.f32.mxu1 %v11681_v21  ;;  %v8324_v16 = vpack.c.bf16 %v3964_v6, %v3960_v3 }
 0x417   :  { %v3955_v46 = vsel %vm1513_vm8, %v3943_v43, %v3947_v40  ;;  %v3954_v12 = vsel %vm1513_vm8, %v3941_v7, %v3945_v51  ;;  %7625 = vmatmul.mubr.msk.f32.gmra.mrb[14].mxu0 %vm2372_vm10, %v7621_v8 }
 0x418   :  { %v3965_v49 = vmul.f32 %v3955_v46, %v9328_v55  ;;  %v3961_v19 = vmul.f32 %v3954_v12, %v9328_v55  ;;  %3575 = vmatprep.mubr.f32.mxu0 %v11681_v21 }
 0x419   :  { %7629 = vmatmul.mubr.msk.f32.gmra.mrb[14].mxu1 %vm2372_vm10, %v7621_v8  ;;  %v7633_v8 = vld [vmem:[%s11543_s3 + $0xc8] sm:$0xff] }
 0x41a   :  { %v3951_v31 = vpop.permute.xlu0 %3950  ;;  %v3949_v0 = vpop.permute.xlu1 %3948  ;;  %3664 = vmatprep.mubr.f32.mxu1 %v11681_v21  ;;  %v8322_v32 = vpack.c.bf16 %v3965_v49, %v3961_v19 }
 0x41b   :  { %v3959_v52 = vsel %vm1513_vm8, %v3951_v31, %v3939_v47  ;;  %v3958_v9 = vsel %vm1513_vm8, %v3949_v0, %v3937_v20  ;;  %7626 = vmatmul.mubr.msk.f32.gmra.mrb[16].mxu0 %vm2372_vm10, %v7622_v23  ;;  %v3953_v35 = vsel %vm1513_vm8, %v3947_v40, %v3951_v31  ;;  %v3952_v17 = vsel %vm1513_vm8, %v3945_v51, %v3949_v0 }
 0x41c   :  { %v3967_v1 = vmul.f32 %v3959_v52, %v9314_v45  ;;  %v3963_v61 = vmul.f32 %v3958_v9, %v9314_v45  ;;  %8323 = vmatprep.subr.bf16.mxu0 %v8322_v32  ;;  %3581 = vmatprep.mubr.f32.mxu0 %v11681_v21  ;;  %v3966_v41 = vmul.f32 %v3953_v35, %v9345_v5 }
 0x41d   :  { %7630 = vmatmul.mubr.msk.f32.gmra.mrb[16].mxu1 %vm2372_vm10, %v7622_v23  ;;  %v3962_v50 = vmul.f32 %v3952_v17, %v9345_v5  ;;  %v7634_v23 = vld [vmem:[%s11543_s3 + $0xd0] sm:$0xff] }
 0x41e   :  { %v4182_v47 = vpop.permute.xlu0 %4181  ;;  %v4180_v20 = vpop.permute.xlu1 %4179  ;;  %3670 = vmatprep.mubr.f32.mxu1 %v11681_v21  ;;  %v8326_v33 = vpack.c.bf16 %v3967_v1, %v3963_v61 }
 0x41f   :  { %7627 = vmatmul.mubr.msk.f32.gmra.mrb[18].mxu0 %vm2372_vm10, %v7623_v60  ;;  %v8328_v29 = vpack.c.bf16 %v3966_v41, %v3962_v50 }
 0x420   :  { %8327 = vmatprep.subr.bf16.mxu1 %v8326_v33  ;;  %3806 = vmatprep.mubr.f32.mxu0 %v11681_v21  ;;  %v11683_v33 = vld [vmem:[#allocation31_spill] sm:$0xff] }
 0x421   :  { %7631 = vmatmul.mubr.msk.f32.gmra.mrb[18].mxu1 %vm2372_vm10, %v7623_v60  ;;  %v7635_v60 = vld [vmem:[%s11543_s3 + $0xd8] sm:$0xff] }
 0x422   :  { %v4186_v43 = vpop.permute.xlu0 %4185  ;;  %v4184_v7 = vpop.permute.xlu1 %4183  ;;  %3895 = vmatprep.mubr.f32.mxu1 %v11681_v21 }
 0x423   :  { %7636 = vmatmul.mubr.msk.f32.vlgmr.msra.gmra.mrb[12].mxu0 %vm2372_vm10, %v7632_v42  ;;  %v4200_v11 = vsel %vm1724_vm9, %v4182_v47, %v4186_v43  ;;  %v4199_v2 = vsel %vm1724_vm9, %v4180_v20, %v4184_v7 }
 0x424   :  { %8325 = vmatpush1.bf16.msra.mxu0 %v8324_v16  ;;  %3812 = vmatprep.mubr.f32.mxu0 %v11681_v21 }
 0x425   :  { %7640 = vmatmul.mubr.msk.f32.vlgmr.msra.gmra.mrb[12].mxu1 %vm2372_vm10, %v7632_v42  ;;  %v7644_v42 = vld [vmem:[%s11543_s3 + $0xe0] sm:$0xff] }
 0x426   :  { %v4190_v40 = vpop.permute.xlu0 %4189  ;;  %8329 = vmatpush1.bf16.msra.mxu1 %v8328_v29  ;;  %v4188_v51 = vpop.permute.xlu1 %4187  ;;  %3901 = vmatprep.mubr.f32.mxu1 %v11681_v21  ;;  %v11684_v29 = vmov 1.0|1.0  }
 0x427   :  { %v4198_v46 = vsel %vm1724_vm9, %v4186_v43, %v4190_v40  ;;  %v4197_v12 = vsel %vm1724_vm9, %v4184_v7, %v4188_v51  ;;  %7637 = vmatmul.mubr.msk.f32.gmra.mrb[14].mxu0 %vm2372_vm10, %v7633_v8  ;;  %v7645_v7 = vld [vmem:[%s11543_s3 + $0xe8] sm:$0xff] }
 0x428   :  { %v4208_v49 = vmul.f32 %v4198_v46, %v9370_v14  ;;  %v4204_v19 = vmul.f32 %v4197_v12, %v9370_v14  ;;  %3818 = vmatprep.mubr.f32.mxu0 %v11681_v21  ;;  %v7656_v46 = vld [vmem:[%s11543_s3 + $0x100] sm:$0xff]  ;;  %v7659_v12 = vld [vmem:[%s11543_s3 + $0x118] sm:$0xff] }
 0x429   :  { %7641 = vmatmul.mubr.msk.f32.gmra.mrb[14].mxu1 %vm2372_vm10, %v7633_v8  ;;  %v7646_v8 = vld [vmem:[%s11543_s3 + $0xf0] sm:$0xff] }
 0x42a   :  { %v4194_v31 = vpop.permute.xlu0 %4193  ;;  %v4192_v0 = vpop.permute.xlu1 %4191  ;;  %3907 = vmatprep.mubr.f32.mxu1 %v11681_v21  ;;  %v8330_v32 = vpack.c.bf16 %v4208_v49, %v4204_v19  ;;  %v7658_v49 = vld [vmem:[%s11543_s3 + $0x110] sm:$0xff] }
 0x42b   :  { %v4202_v52 = vsel %vm1724_vm9, %v4194_v31, %v4182_v47  ;;  %v4201_v9 = vsel %vm1724_vm9, %v4192_v0, %v4180_v20  ;;  %7638 = vmatmul.mubr.msk.f32.gmra.mrb[16].mxu0 %vm2372_vm10, %v7634_v23  ;;  %v4196_v35 = vsel %vm1724_vm9, %v4190_v40, %v4194_v31  ;;  %v4195_v17 = vsel %vm1724_vm9, %v4188_v51, %v4192_v0  ;;  %v11682_v47 = vld [vmem:[#allocation30_spill] sm:$0xff]  ;;  %v7657_v51 = vld [vmem:[%s11543_s3 + $0x108] sm:$0xff] }
 0x42c   :  { %v4210_v1 = vmul.f32 %v4202_v52, %v9356_v15  ;;  %v4206_v61 = vmul.f32 %v4201_v9, %v9356_v15  ;;  %8331 = vmatprep.subr.bf16.mxu0 %v8330_v32  ;;  %3824 = vmatprep.mubr.f32.mxu0 %v11681_v21  ;;  %v4207_v6 = vmul.f32 %v4200_v11, %v11682_v47  ;;  %v7647_v40 = vld [vmem:[%s11543_s3 + $0xf8] sm:$0xff] }
 0x42d   :  { %7642 = vmatmul.mubr.msk.f32.gmra.mrb[16].mxu1 %vm2372_vm10, %v7634_v23  ;;  %v4203_v3 = vmul.f32 %v4199_v2, %v11682_v47  ;;  %v4209_v41 = vmul.f32 %v4196_v35, %v11683_v33  ;;  %v4205_v50 = vmul.f32 %v4195_v17, %v11683_v33 }
 0x42e   :  { %3913 = vmatprep.mubr.f32.mxu1 %v11681_v21  ;;  %v8334_v20 = vpack.c.bf16 %v4210_v1, %v4206_v61 }
 0x42f   :  { %7639 = vmatmul.mubr.msk.f32.gmra.mrb[18].mxu0 %vm2372_vm10, %v7635_v60  ;;  %v8332_v43 = vpack.c.bf16 %v4207_v6, %v4203_v3  ;;  %v8336_v16 = vpack.c.bf16 %v4209_v41, %v4205_v50 }
 0x430   :  { %8335 = vmatprep.subr.bf16.mxu1 %v8334_v20  ;;  %4049 = vmatprep.mubr.f32.mxu0 %v11681_v21 }
 0x431   :  { %7643 = vmatmul.mubr.msk.f32.gmra.mrb[18].mxu1 %vm2372_vm10, %v7635_v60 }
 0x432   :  { %4138 = vmatprep.mubr.f32.mxu1 %v11681_v21 }
 0x433   :  { %7648 = vmatmul.mubr.msk.f32.vlgmr.msra.gmra.mrb[12].mxu0 %vm2372_vm10, %v7644_v42 }
 0x434   :  { %8333 = vmatpush1.bf16.msra.mxu0 %v8332_v43  ;;  %4055 = vmatprep.mubr.f32.mxu0 %v11681_v21 }
 0x435   :  { %7652 = vmatmul.mubr.msk.f32.vlgmr.msra.gmra.mrb[12].mxu1 %vm2372_vm10, %v7644_v42  ;;  %8338 = vmatprep.subr.bf16.mxu0 %v11684_v29 }
 0x436   :  { %8337 = vmatpush1.bf16.msra.mxu1 %v8336_v16  ;;  %4144 = vmatprep.mubr.f32.mxu1 %v11681_v21 }
 0x437   :  { %7649 = vmatmul.mubr.msk.f32.gmra.mrb[14].mxu0 %vm2372_vm10, %v7645_v7  ;;  %8354 = vmatprep.subr.bf16.mxu1 %v11684_v29 }
 0x438   :  { %4061 = vmatprep.mubr.f32.mxu0 %v11681_v21 }
 0x439   :  { %7653 = vmatmul.mubr.msk.f32.gmra.mrb[14].mxu1 %vm2372_vm10, %v7645_v7 }
 0x43a   :  { %4150 = vmatprep.mubr.f32.mxu1 %v11681_v21 }
 0x43b   :  { %7650 = vmatmul.mubr.msk.f32.gmra.mrb[16].mxu0 %vm2372_vm10, %v7646_v8 }
 0x43c   :  { %4067 = vmatprep.mubr.f32.mxu0 %v11681_v21 }
 0x43d   :  { %7654 = vmatmul.mubr.msk.f32.gmra.mrb[16].mxu1 %vm2372_vm10, %v7646_v8 }
 0x43e   :  { %4156 = vmatprep.mubr.f32.mxu1 %v11681_v21 }
 0x43f   :  { %7651 = vmatmul.mubr.msk.f32.gmra.mrb[18].mxu0 %vm2372_vm10, %v7647_v40 }
 0x440   :  { %4292 = vmatprep.mubr.f32.mxu0 %v11681_v21 }
 0x441   :  { %7655 = vmatmul.mubr.msk.f32.gmra.mrb[18].mxu1 %vm2372_vm10, %v7647_v40 }
 0x442   :  { %4381 = vmatprep.mubr.f32.mxu1 %v11681_v21 }
 0x443   :  { %7660 = vmatmul.mubr.msk.f32.vlgmr.msra.gmra.mrb[12].mxu0 %vm2372_vm10, %v7656_v46 }
 0x444   :  { %4298 = vmatprep.mubr.f32.mxu0 %v11681_v21  ;;  %8339 = vmatpush3.bf16.msra.mxu0 %v11684_v29 }
 0x445   :  { %7664 = vmatmul.mubr.msk.f32.vlgmr.msra.gmra.mrb[12].mxu1 %vm2372_vm10, %v7656_v46  ;;  %8340 = vmatprep.subr.bf16.mxu0 %v11684_v29 }
 0x446   :  { %4387 = vmatprep.mubr.f32.mxu1 %v11681_v21  ;;  %8355 = vmatpush3.bf16.msra.mxu1 %v11684_v29 }
 0x447   :  { %7661 = vmatmul.mubr.msk.f32.gmra.mrb[14].mxu0 %vm2372_vm10, %v7657_v51  ;;  %8356 = vmatprep.subr.bf16.mxu1 %v11684_v29 }
 0x448   :  { %4304 = vmatprep.mubr.f32.mxu0 %v11681_v21  ;;  %8341 = vmatpush3.bf16.msra.mxu0 %v11684_v29 }
 0x449   :  { %7665 = vmatmul.mubr.msk.f32.gmra.mrb[14].mxu1 %vm2372_vm10, %v7657_v51  ;;  %8342 = vmatprep.subr.bf16.mxu0 %v11684_v29 }
 0x44a   :  { %4393 = vmatprep.mubr.f32.mxu1 %v11681_v21  ;;  %8357 = vmatpush3.bf16.msra.mxu1 %v11684_v29 }
 0x44b   :  { %7662 = vmatmul.mubr.msk.f32.gmra.mrb[16].mxu0 %vm2372_vm10, %v7658_v49  ;;  %8358 = vmatprep.subr.bf16.mxu1 %v11684_v29 }
 0x44c   :  { %4310 = vmatprep.mubr.f32.mxu0 %v11681_v21  ;;  %8343 = vmatpush3.bf16.msra.mxu0 %v11684_v29 }
 0x44d   :  { %7666 = vmatmul.mubr.msk.f32.gmra.mrb[16].mxu1 %vm2372_vm10, %v7658_v49  ;;  %8344 = vmatprep.subr.bf16.mxu0 %v11684_v29 }
 0x44e   :  { %4399 = vmatprep.mubr.f32.mxu1 %v11681_v21  ;;  %8359 = vmatpush3.bf16.msra.mxu1 %v11684_v29 }
 0x44f   :  { %7663 = vmatmul.mubr.msk.f32.gmra.mrb[18].mxu0 %vm2372_vm10, %v7659_v12  ;;  %8360 = vmatprep.subr.bf16.mxu1 %v11684_v29 }
 0x450   :  { %8345 = vmatpush3.bf16.msra.mxu0 %v11684_v29 }
 0x451   :  { %7667 = vmatmul.mubr.msk.f32.gmra.mrb[18].mxu1 %vm2372_vm10, %v7659_v12  ;;  %8346 = vmatprep.subr.bf16.mxu0 %v11684_v29 }
 0x452   :  { %8361 = vmatpush3.bf16.msra.mxu1 %v11684_v29 }
 0x453   :  { %8362 = vmatprep.subr.bf16.mxu1 %v11684_v29 }
 0x454   :  { %8347 = vmatpush3.bf16.msra.mxu0 %v11684_v29 }
 0x455   :  { %8348 = vmatprep.subr.bf16.mxu0 %v11684_v29 }
 0x456   :  { %8363 = vmatpush3.bf16.msra.mxu1 %v11684_v29 }
 0x457   :  { %8364 = vmatprep.subr.bf16.mxu1 %v11684_v29 }
 0x458   :  { %8349 = vmatpush3.bf16.msra.mxu0 %v11684_v29 }
 0x459   :  { %8350 = vmatprep.subr.bf16.mxu0 %v11684_v29 }
 0x45a   :  { %8365 = vmatpush3.bf16.msra.mxu1 %v11684_v29 }
 0x45b   :  { %8366 = vmatprep.subr.bf16.mxu1 %v11684_v29 }
 0x45c   :  { %8351 = vmatpush3.bf16.msra.mxu0 %v11684_v29 }
 0x45d   :  { %8352 = vmatprep.subr.bf16.mxu0 %v11684_v29 }
 0x45e   :  { %8367 = vmatpush3.bf16.msra.mxu1 %v11684_v29 }
 0x45f   :  { %8368 = vmatprep.subr.bf16.mxu1 %v11684_v29 }
 0x460   :  { %8353 = vmatpush3.bf16.msra.mxu0 %v11684_v29 }
 0x461   :  { %8370 = vmatprep.subr.bf16.mxu0 %v11684_v29 }
 0x462   :  { %8369 = vmatpush3.bf16.msra.mxu1 %v11684_v29 }
 0x463   :  { %8386 = vmatprep.subr.bf16.mxu1 %v11684_v29 }
 0x516   :  { %v10177_v19 = vpop.f32.mrb[12].mxu0 }
 0x517   :  { %v10179_v23 = vpop.f32.mrb[13].mxu0  ;;  %v4592_v50 = vmul.f32 %v10177_v19, %v10177_v19 }
 0x518   :  { %v10181_v31 = vpop.f32.mrb[12].mxu1  ;;  %4486 = vmatprep.mubr.f32.mxu0 %v10179_v23  ;;  %v4593_v3 = vmul.f32 %v10179_v23, %v10179_v23 }
 0x519   :  { %v10184_v52 = vpop.f32.mrb[13].mxu1  ;;  %4487 = vmatmul.mubr.f32.vlgmr.msra.gmra.mrb[20].mxu0 %v10177_v19  ;;  %v4594_v43 = vmul.f32 %v10181_v31, %v10181_v31 }
 0x51a   :  { %4571 = vmatprep.mubr.f32.mxu1 %v10184_v52  ;;  %8371 = vmatpush3.bf16.msra.mxu0 %v11684_v29  ;;  %v10189_v0 = vpop.f32.mrb[14].mxu0  ;;  %v4595_v41 = vmul.f32 %v10184_v52, %v10184_v52 }
 0x51b   :  { %4572 = vmatmul.mubr.f32.vlgmr.msra.gmra.mrb[20].mxu1 %v10181_v31  ;;  %v10192_v32 = vpop.f32.mrb[15].mxu0  ;;  %8372 = vmatprep.subr.bf16.mxu0 %v11684_v29  ;;  %v4596_v7 = vmul.f32 %v10189_v0, %v10189_v0 }
 0x51c   :  { %8387 = vmatpush3.bf16.msra.mxu1 %v11684_v29  ;;  %v10196_v11 = vpop.f32.mrb[14].mxu1  ;;  %4491 = vmatprep.mubr.f32.mxu0 %v10192_v32  ;;  %v4597_v42 = vmul.f32 %v10192_v32, %v10192_v32 }
 0x51d   :  { %v10199_v2 = vpop.f32.mrb[15].mxu1  ;;  %4492 = vmatmul.mubr.f32.gmra.mrb[22].mxu0 %v10189_v0  ;;  %8388 = vmatprep.subr.bf16.mxu1 %v11684_v29  ;;  %v4598_v40 = vmul.f32 %v10196_v11, %v10196_v11 }
 0x51e   :  { %4576 = vmatprep.mubr.f32.mxu1 %v10199_v2  ;;  %8373 = vmatpush3.bf16.msra.mxu0 %v11684_v29  ;;  %v10205_v1 = vpop.f32.mrb[16].mxu0  ;;  %v4599_v16 = vmul.f32 %v10199_v2, %v10199_v2 }
 0x51f   :  { %4577 = vmatmul.mubr.f32.gmra.mrb[22].mxu1 %v10196_v11  ;;  %v10208_v9 = vpop.f32.mrb[17].mxu0  ;;  %8374 = vmatprep.subr.bf16.mxu0 %v11684_v29  ;;  %v4600_v51 = vmul.f32 %v10205_v1, %v10205_v1 }
 0x520   :  { %8389 = vmatpush3.bf16.msra.mxu1 %v11684_v29  ;;  %v10212_v61 = vpop.f32.mrb[16].mxu1  ;;  %4496 = vmatprep.mubr.f32.mxu0 %v10208_v9  ;;  %v4601_v8 = vmul.f32 %v10208_v9, %v10208_v9 }
 0x521   :  { %v10215_v60 = vpop.f32.mrb[17].mxu1  ;;  %4497 = vmatmul.mubr.f32.gmra.mrb[24].mxu0 %v10205_v1  ;;  %8390 = vmatprep.subr.bf16.mxu1 %v11684_v29  ;;  %v4602_v12 = vmul.f32 %v10212_v61, %v10212_v61 }
 0x522   :  { %4581 = vmatprep.mubr.f32.mxu1 %v10215_v60  ;;  %8375 = vmatpush3.bf16.msra.mxu0 %v11684_v29  ;;  %v10221_v35 = vpop.f32.mrb[18].mxu0  ;;  %v4603_v46 = vmul.f32 %v10215_v60, %v10215_v60 }
 0x523   :  { %4582 = vmatmul.mubr.f32.gmra.mrb[24].mxu1 %v10212_v61  ;;  %v10224_v17 = vpop.f32.mrb[19].mxu0  ;;  %8376 = vmatprep.subr.bf16.mxu0 %v11684_v29 }
 0x524   :  { %8391 = vmatpush3.bf16.msra.mxu1 %v11684_v29  ;;  %v10228_v6 = vpop.f32.mrb[18].mxu1  ;;  %4501 = vmatprep.mubr.f32.mxu0 %v10224_v17  ;;  %v4605_v49 = vmul.f32 %v10224_v17, %v10224_v17 }
 0x525   :  { %v10233_v20 = vpop.f32.mrb[19].mxu1  ;;  %4502 = vmatmul.mubr.f32.gmra.mrb[26].mxu0 %v10221_v35  ;;  %8392 = vmatprep.subr.bf16.mxu1 %v11684_v29 }
 0x526   :  { %4586 = vmatprep.mubr.f32.mxu1 %v10233_v20  ;;  %8377 = vmatpush3.bf16.msra.mxu0 %v11684_v29 }
 0x527   :  { %4587 = vmatmul.mubr.f32.gmra.mrb[26].mxu1 %v10228_v6  ;;  %4672 = vmatprep.mubr.f32.mxu0 %v4593_v3  ;;  %v4607_v3 = vmul.f32 %v10233_v20, %v10233_v20 }
 0x528   :  { %8393 = vmatpush3.bf16.msra.mxu1 %v11684_v29  ;;  %4757 = vmatprep.mubr.f32.mxu1 %v4595_v41  ;;  %v4604_v41 = vmul.f32 %v10221_v35, %v10221_v35 }
 0x529   :  { %8378 = vmatprep.subr.bf16.mxu0 %v11684_v29  ;;  %8394 = vmatprep.subr.bf16.mxu1 %v11684_v29 }
 0x52a   :  { %8379 = vmatpush3.bf16.msra.mxu0 %v11684_v29 }
 0x52b   :  { %8380 = vmatprep.subr.bf16.mxu0 %v11684_v29 }
 0x52c   :  { %8395 = vmatpush3.bf16.msra.mxu1 %v11684_v29 }
 0x52d   :  { %8396 = vmatprep.subr.bf16.mxu1 %v11684_v29 }
 0x52e   :  { %8381 = vmatpush3.bf16.msra.mxu0 %v11684_v29 }
 0x52f   :  { %8382 = vmatprep.subr.bf16.mxu0 %v11684_v29 }
 0x530   :  { %8397 = vmatpush3.bf16.msra.mxu1 %v11684_v29 }
 0x531   :  { %8398 = vmatprep.subr.bf16.mxu1 %v11684_v29 }
 0x532   :  { %8383 = vmatpush3.bf16.msra.mxu0 %v11684_v29 }
 0x533   :  { %8384 = vmatprep.subr.bf16.mxu0 %v11684_v29 }
 0x534   :  { %8399 = vmatpush3.bf16.msra.mxu1 %v11684_v29 }
 0x535   :  { %8400 = vmatprep.subr.bf16.mxu1 %v11684_v29 }
 0x536   :  { %8385 = vmatpush3.bf16.msra.mxu0 %v11684_v29 }
 0x538   :  { %8401 = vmatpush3.bf16.msra.mxu1 %v11684_v29 }
 0x539   :  { %4673 = vmatmul.mubr.f32.vlgmr.msra.gmra.mrb[28].mxu0 %v4592_v50  ;;  %v4606_v50 = vmul.f32 %v10228_v6, %v10228_v6 }
 0x53a   :  { %4677 = vmatprep.mubr.f32.mxu0 %v4597_v42 }
 0x53b   :  { %4758 = vmatmul.mubr.f32.vlgmr.msra.gmra.mrb[28].mxu1 %v4594_v43 }
 0x53c   :  { %4762 = vmatprep.mubr.f32.mxu1 %v4599_v16 }
 0x53d   :  { %4678 = vmatmul.mubr.f32.gmra.mrb[30].mxu0 %v4596_v7 }
 0x53e   :  { %4682 = vmatprep.mubr.f32.mxu0 %v4601_v8 }
 0x53f   :  { %4763 = vmatmul.mubr.f32.gmra.mrb[30].mxu1 %v4598_v40 }
 0x540   :  { %4767 = vmatprep.mubr.f32.mxu1 %v4603_v46 }
 0x541   :  { %4683 = vmatmul.mubr.f32.gmra.mrb[32].mxu0 %v4600_v51 }
 0x542   :  { %4687 = vmatprep.mubr.f32.mxu0 %v4605_v49 }
 0x543   :  { %4768 = vmatmul.mubr.f32.gmra.mrb[32].mxu1 %v4602_v12 }
 0x544   :  { %4772 = vmatprep.mubr.f32.mxu1 %v4607_v3 }
 0x545   :  { %4688 = vmatmul.mubr.f32.gmra.mrb[34].mxu0 %v4604_v41 }
 0x546   :  { %5110 = vmatprep.mubr.f32.mxu0 %v11681_v21 }
 0x547   :  { %4773 = vmatmul.mubr.f32.gmra.mrb[34].mxu1 %v4606_v50 }
 0x548   :  { %5187 = vmatprep.mubr.f32.mxu1 %v11681_v21 }
 0x5ec   :  { %v7906_v42 = vpop.f32.mrb[20].mxu0 }
 0x5ed   :  { %v7907_v43 = vpop.f32.mrb[21].mxu0 }
 0x5ee   :  { %v7908_v16 = vadd.f32 %v7907_v43, %v7906_v42  ;;  %v7950_v7 = vpop.f32.mrb[20].mxu1 }
 0x5ef   :  { %v7951_v8 = vpop.f32.mrb[21].mxu1 }
 0x5f0   :  { %v7952_v40 = vadd.f32 %v7951_v8, %v7950_v7  ;;  %v7909_v46 = vpop.f32.mrb[22].mxu0 }
 0x5f1   :  { %v7910_v51 = vpop.f32.mrb[23].mxu0 }
 0x5f2   :  { %v4574_v49 = vadd.f32 %v7952_v40, %v7908_v16  ;;  %v7911_v12 = vadd.f32 %v7910_v51, %v7909_v46  ;;  %v7953_v3 = vpop.f32.mrb[22].mxu1 }
 0x5f3   :  { %v7954_v29 = vpop.f32.mrb[23].mxu1 }
 0x5f4   :  { %v7955_v58 = vadd.f32 %v7954_v29, %v7953_v3  ;;  %v7912_v34 = vpop.f32.mrb[24].mxu0  ;;  %v4778_v3 = vmul.f32 0.001953125, %v4574_v49 }
 0x5f5   :  { %v7913_v41 = vpop.f32.mrb[25].mxu0 }
 0x5f6   :  { %v4579_v27 = vadd.f32 %v7955_v58, %v7911_v12  ;;  %v7914_v37 = vadd.f32 %v7913_v41, %v7912_v34  ;;  %v7956_v50 = vpop.f32.mrb[24].mxu1  ;;  %v4786_v38 = vmul.f32 %v4778_v3, %v4778_v3 }
 0x5f7   :  { %v7957_v22 = vpop.f32.mrb[25].mxu1 }
 0x5f8   :  { %v7958_v63 = vadd.f32 %v7957_v22, %v7956_v50  ;;  %v7915_v57 = vpop.f32.mrb[26].mxu0 }
 0x5f9   :  { %v7916_v4 = vpop.f32.mrb[27].mxu0 }
 0x5fa   :  { %v4584_v42 = vadd.f32 %v7958_v63, %v7914_v37  ;;  %v7917_v43 = vadd.f32 %v7916_v4, %v7915_v57  ;;  %v7959_v54 = vpop.f32.mrb[26].mxu1  ;;  %v4779_v63 = vmul.f32 0.001953125, %v4579_v27 }
 0x5fb   :  { %v7960_v7 = vpop.f32.mrb[27].mxu1 }
 0x5fc   :  { %v7961_v8 = vadd.f32 %v7960_v7, %v7959_v54  ;;  %v4787_v49 = vmul.f32 %v4779_v63, %v4779_v63 }
 0x5fe   :  { %v4589_v21 = vadd.f32 %v7961_v8, %v7917_v43 }
 0x60c   :  { %v7994_v16 = vpop.f32.mrb[28].mxu0 }
 0x60d   :  { %v7995_v40 = vpop.f32.mrb[29].mxu0 }
 0x60e   :  { %v7996_v46 = vadd.f32 %v7995_v40, %v7994_v16  ;;  %v8038_v51 = vpop.f32.mrb[28].mxu1  ;;  %v4780_v40 = vmul.f32 0.001953125, %v4584_v42 }
 0x60f   :  { %v8039_v29 = vpop.f32.mrb[29].mxu1 }
 0x610   :  { %v8040_v44 = vadd.f32 %v8039_v29, %v8038_v51  ;;  %v7997_v58 = vpop.f32.mrb[30].mxu0 }
 0x611   :  { %v7998_v34 = vpop.f32.mrb[31].mxu0 }
 0x612   :  { %v4760_v12 = vadd.f32 %v8040_v44, %v7996_v46  ;;  %v7999_v41 = vadd.f32 %v7998_v34, %v7997_v58  ;;  %v8041_v22 = vpop.f32.mrb[30].mxu1 }
 0x613   :  { %v8042_v50 = vpop.f32.mrb[31].mxu1 }
 0x614   :  { %v4782_v57 = vmul.f32 0.001953125, %v4760_v12  ;;  %v8043_v4 = vadd.f32 %v8042_v50, %v8041_v22  ;;  %v8000_v37 = vpop.f32.mrb[32].mxu0  ;;  %v4788_v22 = vmul.f32 %v4780_v40, %v4780_v40  ;;  %v4781_v50 = vmul.f32 0.001953125, %v4589_v21  ;;  %v66_v21 = vld [vmem:[%s11542_s6 + $0x20] sm:$0xff] }
 0x615   :  { %v8001_v54 = vpop.f32.mrb[33].mxu0 }
 0x616   :  { %v4790_v43 = vsub.f32 %v4782_v57, %v4786_v38  ;;  %v4765_v7 = vadd.f32 %v8043_v4, %v7999_v41  ;;  %v8002_v8 = vadd.f32 %v8001_v54, %v8000_v37  ;;  %v8044_v16 = vpop.f32.mrb[32].mxu1  ;;  %v4789_v54 = vmul.f32 %v4781_v50, %v4781_v50 }
 0x617   :  { %v8045_v48 = vpop.f32.mrb[33].mxu1 }
 0x618   :  { %v4794_v51 = vmax.f32 %v4790_v43, 0.0  ;;  %v4783_v29 = vmul.f32 0.001953125, %v4765_v7  ;;  %v8046_v39 = vadd.f32 %v8045_v48, %v8044_v16  ;;  %v8003_v44 = vpop.f32.mrb[34].mxu0 }
 0x619   :  { %v8004_v46 = vpop.f32.mrb[35].mxu0 }
 0x61a   :  { %v4798_v58 = vadd.f32 1e-05, %v4794_v51  ;;  %v4791_v34 = vsub.f32 %v4783_v29, %v4787_v49  ;;  %v4770_v15 = vadd.f32 %v8046_v39, %v8002_v8  ;;  %v8005_v27 = vadd.f32 %v8004_v46, %v8003_v44  ;;  %v8047_v12 = vpop.f32.mrb[34].mxu1 }
 0x61b   :  { %v8048_v33 = vpop.f32.mrb[35].mxu1 }
 0x61c   :  { %8892 = vrsqrt.f32 %v4798_v58  ;;  %v4795_v38 = vmax.f32 %v4791_v34, 0.0  ;;  %v4784_v41 = vmul.f32 0.001953125, %v4770_v15  ;;  %v8049_v57 = vadd.f32 %v8048_v33, %v8047_v12  ;;  %v67_v15 = vld [vmem:[%s11542_s6 + $0x28] sm:$0xff]  ;;  %v70_v33 = vld [vmem:[%s11542_s6 + $0x40] sm:$0xff] }
 0x61d   :  { %v71_v34 = vld [vmem:[%s11542_s6 + $0x48] sm:$0xff] }
 0x61e   :  { %v4799_v42 = vadd.f32 1e-05, %v4795_v38  ;;  %v4792_v4 = vsub.f32 %v4784_v41, %v4788_v22  ;;  %v4775_v37 = vadd.f32 %v8049_v57, %v8005_v27  ;;  %v68_v27 = vld [vmem:[%s11542_s6 + $0x30] sm:$0xff] }
 0x61f   :  { %v72_v57 = vld [vmem:[%s11542_s6 + $0x50] sm:$0xff] }
 0x620   :  { %8894 = vrsqrt.f32 %v4799_v42  ;;  %v4796_v48 = vmax.f32 %v4792_v4, 0.0  ;;  %v4785_v43 = vmul.f32 0.001953125, %v4775_v37 }
 0x622   :  { %v4800_v7 = vadd.f32 1e-05, %v4796_v48  ;;  %v4793_v16 = vsub.f32 %v4785_v43, %v4789_v54 }
 0x624   :  { %8896 = vrsqrt.f32 %v4800_v7  ;;  %v4797_v39 = vmax.f32 %v4793_v16, 0.0 }
 0x626   :  { %v8893_v8 = vpop.eup %8892  ;;  %v4801_v49 = vadd.f32 1e-05, %v4797_v39 }
 0x627   :  { %v4806_v51 = vmul.f32 %v8893_v8, %v66_v21 }
 0x628   :  { %8898 = vrsqrt.f32 %v4801_v49 }
 0x629   :  { %4820 = vperm.xlu1 %8887, %v4806_v51   ;;  %v4810_v29 = vmul.f32 %v4806_v51, %v4778_v3  ;;  %v69_v3 = vld [vmem:[%s11542_s6 + $0x38] sm:$0xff] }
 0x62a   :  { %v8895_v44 = vpop.eup %8894 }
 0x62b   :  { %v4807_v46 = vmul.f32 %v8895_v44, %v67_v15  ;;  %v4814_v58 = vsub.f32 %v70_v33, %v4810_v29 }
 0x62d   :  { %4825 = vperm.xlu0 %8886, %v4807_v46   ;;  %4856 = vperm.xlu1 %8887, %v4814_v58   ;;  %v4811_v12 = vmul.f32 %v4807_v46, %v4779_v63  ;;  %v73_v63 = vld [vmem:[%s11542_s6 + $0x58] sm:$0xff] }
 0x62e   :  { %v8897_v22 = vpop.eup %8896 }
 0x62f   :  { %v4815_v38 = vsub.f32 %v71_v34, %v4811_v12  ;;  %v4808_v41 = vmul.f32 %v8897_v22, %v68_v27 }
 0x631   :  { %4861 = vperm.xlu0 %8886, %v4815_v38   ;;  %4830 = vperm.xlu1 %8887, %v4808_v41   ;;  %v4812_v42 = vmul.f32 %v4808_v41, %v4780_v40 }
 0x632   :  { %v8899_v4 = vpop.eup %8898 }
 0x633   :  { %v4809_v37 = vmul.f32 %v8899_v4, %v69_v3  ;;  %v4816_v54 = vsub.f32 %v72_v57, %v4812_v42 }
 0x635   :  { %4835 = vperm.xlu0 %8886, %v4809_v37   ;;  %4866 = vperm.xlu1 %8887, %v4816_v54   ;;  %v4813_v48 = vmul.f32 %v4809_v37, %v4781_v50 }
 0x637   :  { %v4817_v43 = vsub.f32 %v73_v63, %v4813_v48 }
 0x639   :  { %4871 = vperm.xlu0 %8886, %v4817_v43  }
 0x6a8   :  { %v4821_v7 = vpop.permute.xlu1 %4820 }
 0x6a9   :  { %v4838_v16 = vmul.f32 %v4821_v7, %v10177_v19  ;;  %v4839_v8 = vmul.f32 %v4821_v7, %v10179_v23  ;;  %v4840_v50 = vmul.f32 %v4821_v7, %v10181_v31  ;;  %v4841_v34 = vmul.f32 %v4821_v7, %v10184_v52 }
 0x6ac   :  { %v4826_v39 = vpop.permute.xlu0 %4825  ;;  %v4857_v21 = vpop.permute.xlu1 %4856 }
 0x6ad   :  { %v4874_v40 = vadd.f32 %v4857_v21, %v4838_v16  ;;  %v4842_v49 = vmul.f32 %v4826_v39, %v10189_v0  ;;  %v4875_v51 = vadd.f32 %v4857_v21, %v4839_v8  ;;  %v4843_v29 = vmul.f32 %v4826_v39, %v10192_v32 }
 0x6ae   :  { %v4876_v58 = vadd.f32 %v4857_v21, %v4840_v50  ;;  %v4844_v0 = vmul.f32 %v4826_v39, %v10196_v11  ;;  %v4877_v27 = vadd.f32 %v4857_v21, %v4841_v34  ;;  %v4845_v22 = vmul.f32 %v4826_v39, %v10199_v2 }
 0x6af   :  { %v10316_v15 = vmax.f32 %v4874_v40, 0.0  ;;  %v10324_v23 = vmax.f32 %v4875_v51, 0.0 }
 0x6b0   :  { %v4862_v33 = vpop.permute.xlu0 %4861  ;;  %v10334_v12 = vmax.f32 %v4876_v58, 0.0  ;;  %v10343_v52 = vmax.f32 %v4877_v27, 0.0  ;;  %v4831_v2 = vpop.permute.xlu1 %4830 }
 0x6b1   :  { %11685 = vst [vmem:[#allocation32_spill] sm:$0xff] %v10316_v15  ;;  %v4878_v44 = vadd.f32 %v4862_v33, %v4842_v49  ;;  %4972 = vrot.lane.b32.xlu1 %v10316_v15, %s8905_s13  ;;  %v4879_v19 = vadd.f32 %v4862_v33, %v4843_v29  ;;  %11687 = vst [vmem:[#allocation34_spill] sm:$0xff] %v10324_v23  ;;  %v4880_v31 = vadd.f32 %v4862_v33, %v4844_v0 }
 0x6b2   :  { %11689 = vst [vmem:[#allocation36_spill] sm:$0xff] %v10334_v12  ;;  %v4881_v11 = vadd.f32 %v4862_v33, %v4845_v22  ;;  %11691 = vst [vmem:[#allocation38_spill] sm:$0xff] %v10343_v52  ;;  %v4846_v63 = vmul.f32 %v4831_v2, %v10205_v1  ;;  %v4847_v21 = vmul.f32 %v4831_v2, %v10208_v9 }
 0x6b3   :  { %v10322_v46 = vmax.f32 %v4878_v44, 0.0  ;;  %v10332_v32 = vmax.f32 %v4879_v19, 0.0  ;;  %v10341_v38 = vmax.f32 %v4880_v31, 0.0 }
 0x6b4   :  { %v10349_v41 = vmax.f32 %v4881_v11, 0.0  ;;  %v10443_v3 = vpop.permute.xlu0 %4835  ;;  %v4867_v57 = vpop.permute.xlu1 %4866 }
 0x6b5   :  { %11686 = vst [vmem:[#allocation33_spill] sm:$0xff] %v10322_v46  ;;  %4974 = vrot.lane.b32.xlu0 %v10322_v46, %s8905_s13  ;;  %4980 = vrot.lane.b32.xlu1 %v10324_v23, %s8905_s13  ;;  %11688 = vst [vmem:[#allocation35_spill] sm:$0xff] %v10332_v32  ;;  %v4882_v7 = vadd.f32 %v4867_v57, %v4846_v63  ;;  %v4850_v8 = vmul.f32 %v10443_v3, %v10221_v35 }
 0x6b6   :  { %11690 = vst [vmem:[#allocation37_spill] sm:$0xff] %v10341_v38  ;;  %11692 = vst [vmem:[#allocation39_spill] sm:$0xff] %v10349_v41  ;;  %v4883_v49 = vadd.f32 %v4867_v57, %v4847_v21  ;;  %v4848_v35 = vmul.f32 %v4831_v2, %v10212_v61  ;;  %v4851_v50 = vmul.f32 %v10443_v3, %v10224_v17 }
 0x6b7   :  { %v10478_v44 = vmax.f32 %v4882_v7, 0.0  ;;  %v4852_v58 = vmul.f32 %v10443_v3, %v10228_v6 }
 0x6b8   :  { %v10453_v42 = vpop.permute.xlu0 %4871  ;;  %v4884_v61 = vadd.f32 %v4867_v57, %v4848_v35  ;;  %v10495_v17 = vmax.f32 %v4883_v49, 0.0 }
 0x6b9   :  { %4982 = vrot.lane.b32.xlu0 %v10332_v32, %s8905_s13  ;;  %4988 = vrot.lane.b32.xlu1 %v10334_v12, %s8905_s13  ;;  %v4886_v51 = vadd.f32 %v10453_v42, %v4850_v8  ;;  %v4887_v31 = vadd.f32 %v10453_v42, %v4851_v50 }
 0x6bb   :  { %v10498_v27 = vmax.f32 %v4886_v51, 0.0 }
 0x6bd   :  { %4990 = vrot.lane.b32.xlu0 %v10341_v38, %s8905_s13  ;;  %4996 = vrot.lane.b32.xlu1 %v10343_v52, %s8905_s13 }
 0x6c1   :  { %4998 = vrot.lane.b32.xlu0 %v10349_v41, %s8905_s13  ;;  %4906 = vrot.lane.b32.xlu1 %v10316_v15, %s8906_s0 }
 0x6c5   :  { %4908 = vrot.lane.b32.xlu0 %v10322_v46, %s8906_s0  ;;  %4914 = vrot.lane.b32.xlu1 %v10324_v23, %s8906_s0 }
 0x6c9   :  { %4916 = vrot.lane.b32.xlu0 %v10332_v32, %s8906_s0  ;;  %4922 = vrot.lane.b32.xlu1 %v10334_v12, %s8906_s0 }
 0x6cd   :  { %4924 = vrot.lane.b32.xlu0 %v10341_v38, %s8906_s0  ;;  %4930 = vrot.lane.b32.xlu1 %v10343_v52, %s8906_s0 }
 0x6d1   :  { %4932 = vrot.lane.b32.xlu0 %v10349_v41, %s8906_s0  ;;  %5360 = vrot.lane.b32.xlu1 %v10316_v15, %s8907_s14 }
 0x6d5   :  { %5362 = vrot.lane.b32.xlu0 %v10322_v46, %s8907_s14  ;;  %5368 = vrot.lane.b32.xlu1 %v10324_v23, %s8907_s14 }
 0x6d9   :  { %5370 = vrot.lane.b32.xlu0 %v10332_v32, %s8907_s14  ;;  %5376 = vrot.lane.b32.xlu1 %v10334_v12, %s8907_s14 }
 0x6dd   :  { %5378 = vrot.lane.b32.xlu0 %v10341_v38, %s8907_s14  ;;  %5384 = vrot.lane.b32.xlu1 %v10343_v52, %s8907_s14 }
 0x6e1   :  { %5386 = vrot.lane.b32.xlu0 %v10349_v41, %s8907_s14  ;;  %5595 = vrot.lane.b32.xlu1 %v10316_v15, %s8908_s15 }
 0x6e5   :  { %5597 = vrot.lane.b32.xlu0 %v10322_v46, %s8908_s15  ;;  %5603 = vrot.lane.b32.xlu1 %v10324_v23, %s8908_s15 }
 0x6e9   :  { %5605 = vrot.lane.b32.xlu0 %v10332_v32, %s8908_s15  ;;  %5611 = vrot.lane.b32.xlu1 %v10334_v12, %s8908_s15 }
 0x6ed   :  { %5613 = vrot.lane.b32.xlu0 %v10341_v38, %s8908_s15  ;;  %5619 = vrot.lane.b32.xlu1 %v10343_v52, %s8908_s15 }
 0x6f1   :  { %5621 = vrot.lane.b32.xlu0 %v10349_v41, %s8908_s15  ;;  %6001 = vrot.lane.b32.xlu1 %v10316_v15, %s8909_s16 }
 0x6f5   :  { %6003 = vrot.lane.b32.xlu0 %v10322_v46, %s8909_s16  ;;  %6009 = vrot.lane.b32.xlu1 %v10324_v23, %s8909_s16 }
 0x6f9   :  { %6011 = vrot.lane.b32.xlu0 %v10332_v32, %s8909_s16  ;;  %6017 = vrot.lane.b32.xlu1 %v10334_v12, %s8909_s16 }
 0x6fd   :  { %6019 = vrot.lane.b32.xlu0 %v10341_v38, %s8909_s16  ;;  %6025 = vrot.lane.b32.xlu1 %v10343_v52, %s8909_s16 }
 0x701   :  { %6027 = vrot.lane.b32.xlu0 %v10349_v41, %s8909_s16  ;;  %6236 = vrot.lane.b32.xlu1 %v10316_v15, %s8910_s17 }
 0x705   :  { %6238 = vrot.lane.b32.xlu0 %v10322_v46, %s8910_s17  ;;  %6244 = vrot.lane.b32.xlu1 %v10324_v23, %s8910_s17 }
 0x709   :  { %6246 = vrot.lane.b32.xlu0 %v10332_v32, %s8910_s17  ;;  %6252 = vrot.lane.b32.xlu1 %v10334_v12, %s8910_s17 }
 0x70d   :  { %6254 = vrot.lane.b32.xlu0 %v10341_v38, %s8910_s17  ;;  %6260 = vrot.lane.b32.xlu1 %v10343_v52, %s8910_s17 }
 0x711   :  { %6262 = vrot.lane.b32.xlu0 %v10349_v41, %s8910_s17  ;;  %6471 = vrot.lane.b32.xlu1 %v10316_v15, %s8911_s18 }
 0x715   :  { %6473 = vrot.lane.b32.xlu0 %v10322_v46, %s8911_s18  ;;  %6479 = vrot.lane.b32.xlu1 %v10324_v23, %s8911_s18 }
 0x719   :  { %6481 = vrot.lane.b32.xlu0 %v10332_v32, %s8911_s18  ;;  %6487 = vrot.lane.b32.xlu1 %v10334_v12, %s8911_s18 }
 0x71d   :  { %6489 = vrot.lane.b32.xlu0 %v10341_v38, %s8911_s18  ;;  %6495 = vrot.lane.b32.xlu1 %v10343_v52, %s8911_s18 }
 0x721   :  { %6497 = vrot.lane.b32.xlu0 %v10349_v41, %s8911_s18  ;;  %6706 = vrot.lane.b32.xlu1 %v10316_v15, %s8912_s19 }
 0x723   :  { %v4973_v4 = vpop.permute.xlu1 %4972 }
 0x725   :  { %6708 = vrot.lane.b32.xlu0 %v10322_v46, %s8912_s19  ;;  %6714 = vrot.lane.b32.xlu1 %v10324_v23, %s8912_s19 }
 0x727   :  { %v4975_v37 = vpop.permute.xlu0 %4974  ;;  %v4981_v54 = vpop.permute.xlu1 %4980 }
 0x728   :  { %v5012_v48 = vsel %vm134_vm1, %v4973_v4, %v4981_v54 }
 0x729   :  { %6716 = vrot.lane.b32.xlu0 %v10332_v32, %s8912_s19  ;;  %6722 = vrot.lane.b32.xlu1 %v10334_v12, %s8912_s19  ;;  %v5021_v40 = vmul.f32 %v5012_v48, %v9085_v26 }
 0x72b   :  { %v4983_v43 = vpop.permute.xlu0 %4982  ;;  %v4989_v39 = vpop.permute.xlu1 %4988 }
 0x72c   :  { %v5013_v16 = vsel %vm134_vm1, %v4975_v37, %v4983_v43  ;;  %v5008_v6 = vsel %vm134_vm1, %v4981_v54, %v4989_v39  ;;  %v4849_v54 = vmul.f32 %v4831_v2, %v10215_v60  ;;  %v4853_v60 = vmul.f32 %v10443_v3, %v10233_v20 }
 0x72d   :  { %v5025_v1 = vmul.f32 %v5013_v16, %v9085_v26  ;;  %6724 = vrot.lane.b32.xlu0 %v10341_v38, %s8912_s19  ;;  %6730 = vrot.lane.b32.xlu1 %v10343_v52, %s8912_s19  ;;  %v5022_v8 = vmul.f32 %v5008_v6, %v9090_v28 }
 0x72e   :  { %v4885_v51 = vadd.f32 %v4867_v57, %v4849_v54 }
 0x72f   :  { %v4991_v33 = vpop.permute.xlu0 %4990  ;;  %v8402_v29 = vpack.c.bf16 %v5025_v1, %v5021_v40  ;;  %v4997_v9 = vpop.permute.xlu1 %4996 }
 0x730   :  { %v5009_v19 = vsel %vm134_vm1, %v4983_v43, %v4991_v33  ;;  %v5004_v0 = vsel %vm134_vm1, %v4989_v39, %v4997_v9  ;;  %v5016_v34 = vsel %vm134_vm1, %v4997_v9, %v4973_v4  ;;  %v4888_v39 = vadd.f32 %v10453_v42, %v4852_v58 }
 0x731   :  { %6732 = vrot.lane.b32.xlu0 %v10349_v41, %s8912_s19  ;;  %8403 = vmatprep.subr.bf16.mxu0 %v8402_v29  ;;  %v5026_v11 = vmul.f32 %v5009_v19, %v9090_v28  ;;  %v5020_v43 = vmul.f32 %v5016_v34, %v9081_v24  ;;  %v5023_v7 = vmul.f32 %v5004_v0, %v9070_v18  ;;  %v10539_v50 = vmax.f32 %v4885_v51, 0.0 }
 0x732   :  { %4976 = vrot.lane.b32.xlu1 %v10478_v44, %s8905_s13  ;;  %v4889_v9 = vadd.f32 %v10453_v42, %v4853_v60  ;;  %v10535_v35 = vmax.f32 %v4888_v39, 0.0 }
 0x733   :  { %v4999_v22 = vpop.permute.xlu0 %4998  ;;  %v10507_v48 = vpop.permute.xlu1 %4906  ;;  %v8412_v2 = vpack.c.bf16 %v5026_v11, %v5022_v8 }
 0x734   :  { %v5005_v63 = vsel %vm134_vm1, %v4991_v33, %v4999_v22  ;;  %v5017_v4 = vsel %vm134_vm1, %v4999_v22, %v4975_v37  ;;  %v10519_v37 = vmax.f32 %v4887_v31, 0.0  ;;  %v10524_v33 = vmax.f32 %v4884_v61, 0.0 }
 0x735   :  { %v5024_v16 = vmul.f32 %v5017_v4, %v9081_v24  ;;  %v5027_v21 = vmul.f32 %v5005_v63, %v9070_v18  ;;  %4978 = vrot.lane.b32.xlu0 %v10498_v27, %s8905_s13  ;;  %v10547_v20 = vmax.f32 %v4889_v9, 0.0 }
 0x736   :  { %4984 = vrot.lane.b32.xlu1 %v10495_v17, %s8905_s13 }
 0x737   :  { %v8404_v40 = vpack.c.bf16 %v5024_v16, %v5020_v43  ;;  %v10522_v1 = vpop.permute.xlu0 %4908  ;;  %v8410_v49 = vpack.c.bf16 %v5027_v21, %v5023_v7  ;;  %v10526_v29 = vpop.permute.xlu1 %4914 }
 0x739   :  { %4986 = vrot.lane.b32.xlu0 %v10519_v37, %s8905_s13  ;;  %8405 = vmatpush1.bf16.msra.mxu0 %v8404_v40 }
 0x73a   :  { %4992 = vrot.lane.b32.xlu1 %v10524_v33, %s8905_s13  ;;  %8411 = vmatprep.subr.bf16.mxu1 %v8410_v49 }
 0x73b   :  { %8413 = vmatpush1.bf16.msra.mxu1 %v8412_v2  ;;  %v10537_v57 = vpop.permute.xlu0 %4916  ;;  %v10541_v19 = vpop.permute.xlu1 %4922 }
 0x73d   :  { %4994 = vrot.lane.b32.xlu0 %v10535_v35, %s8905_s13 }
 0x73e   :  { %5000 = vrot.lane.b32.xlu1 %v10539_v50, %s8905_s13 }
 0x73f   :  { %v10549_v3 = vpop.permute.xlu0 %4924  ;;  %v10551_v42 = vpop.permute.xlu1 %4930 }
 0x741   :  { %5002 = vrot.lane.b32.xlu0 %v10547_v20, %s8905_s13 }
 0x742   :  { %4910 = vrot.lane.b32.xlu1 %v10478_v44, %s8906_s0 }
 0x743   :  { %v10557_v58 = vpop.permute.xlu0 %4932  ;;  %v10559_v0 = vpop.permute.xlu1 %5360 }
 0x745   :  { %4912 = vrot.lane.b32.xlu0 %v10498_v27, %s8906_s0 }
 0x746   :  { %4918 = vrot.lane.b32.xlu1 %v10495_v17, %s8906_s0 }
 0x747   :  { %v10565_v34 = vpop.permute.xlu0 %5362  ;;  %v10567_v61 = vpop.permute.xlu1 %5368 }
 0x749   :  { %4920 = vrot.lane.b32.xlu0 %v10519_v37, %s8906_s0 }
 0x74a   :  { %4926 = vrot.lane.b32.xlu1 %v10524_v33, %s8906_s0 }
 0x74b   :  { %v10573_v31 = vpop.permute.xlu0 %5370  ;;  %v10575_v22 = vpop.permute.xlu1 %5376 }
 0x74d   :  { %4928 = vrot.lane.b32.xlu0 %v10535_v35, %s8906_s0 }
 0x74e   :  { %4934 = vrot.lane.b32.xlu1 %v10539_v50, %s8906_s0 }
 0x74f   :  { %v10581_v6 = vpop.permute.xlu0 %5378  ;;  %v10583_v11 = vpop.permute.xlu1 %5384 }
 0x751   :  { %4936 = vrot.lane.b32.xlu0 %v10547_v20, %s8906_s0 }
 0x752   :  { %5364 = vrot.lane.b32.xlu1 %v10478_v44, %s8907_s14 }
 0x753   :  { %v10589_v63 = vpop.permute.xlu0 %5386  ;;  %v10591_v4 = vpop.permute.xlu1 %5595 }
 0x755   :  { %5366 = vrot.lane.b32.xlu0 %v10498_v27, %s8907_s14 }
 0x756   :  { %5372 = vrot.lane.b32.xlu1 %v10495_v17, %s8907_s14 }
 0x757   :  { %v10597_v43 = vpop.permute.xlu0 %5597  ;;  %v10599_v7 = vpop.permute.xlu1 %5603 }
 0x759   :  { %5374 = vrot.lane.b32.xlu0 %v10519_v37, %s8907_s14 }
 0x75a   :  { %5380 = vrot.lane.b32.xlu1 %v10524_v33, %s8907_s14 }
 0x75b   :  { %v10605_v16 = vpop.permute.xlu0 %5605  ;;  %v10607_v21 = vpop.permute.xlu1 %5611 }
 0x75d   :  { %5382 = vrot.lane.b32.xlu0 %v10535_v35, %s8907_s14 }
 0x75e   :  { %5388 = vrot.lane.b32.xlu1 %v10539_v50, %s8907_s14 }
 0x75f   :  { %v10613_v54 = vpop.permute.xlu0 %5613  ;;  %v10615_v39 = vpop.permute.xlu1 %5619 }
 0x761   :  { %5390 = vrot.lane.b32.xlu0 %v10547_v20, %s8907_s14 }
 0x762   :  { %5599 = vrot.lane.b32.xlu1 %v10478_v44, %s8908_s15 }
 0x763   :  { %v10621_v8 = vpop.permute.xlu0 %5621  ;;  %v10623_v40 = vpop.permute.xlu1 %6001 }
 0x764   :  { %11693 = vst [vmem:[#allocation40_spill] sm:$0xff] %v10623_v40 }
 0x765   :  { %5601 = vrot.lane.b32.xlu0 %v10498_v27, %s8908_s15 }
 0x766   :  { %5607 = vrot.lane.b32.xlu1 %v10495_v17, %s8908_s15 }
 0x767   :  { %v10629_v49 = vpop.permute.xlu0 %6003  ;;  %v10631_v51 = vpop.permute.xlu1 %6009 }
 0x768   :  { %11694 = vst [vmem:[#allocation41_spill] sm:$0xff] %v10631_v51 }
 0x769   :  { %5609 = vrot.lane.b32.xlu0 %v10519_v37, %s8908_s15 }
 0x76a   :  { %5615 = vrot.lane.b32.xlu1 %v10524_v33, %s8908_s15 }
 0x76b   :  { %v10637_v60 = vpop.permute.xlu0 %6011  ;;  %v6018_v2 = vpop.permute.xlu1 %6017 }
 0x76c   :  { %11695 = vst [vmem:[#allocation42_spill] sm:$0xff] %v10637_v60  ;;  %v6037_v9 = vsel %vm1091_vm6, %v10631_v51, %v6018_v2 }
 0x76d   :  { %5617 = vrot.lane.b32.xlu0 %v10535_v35, %s8908_s15  ;;  %v10650_v15 = vmul.f32 %v6037_v9, %v9241_v56 }
 0x76e   :  { %5623 = vrot.lane.b32.xlu1 %v10539_v50, %s8908_s15 }
 0x76f   :  { %v6020_v38 = vpop.permute.xlu0 %6019  ;;  %v6026_v46 = vpop.permute.xlu1 %6025 }
 0x770   :  { %v6038_v12 = vsel %vm1091_vm6, %v10637_v60, %v6020_v38  ;;  %v6033_v52 = vsel %vm1091_vm6, %v6018_v2, %v6026_v46  ;;  %v6045_v51 = vsel %vm1091_vm6, %v6026_v46, %v10623_v40 }
 0x771   :  { %v10653_v41 = vmul.f32 %v6038_v12, %v9241_v56  ;;  %5625 = vrot.lane.b32.xlu0 %v10547_v20, %s8908_s15  ;;  %v10672_v32 = vmul.f32 %v6033_v52, %v9257_v62  ;;  %v10675_v46 = vmul.f32 %v6045_v51, %v9234_v53 }
 0x772   :  { %6005 = vrot.lane.b32.xlu1 %v10478_v44, %s8909_s16 }
 0x773   :  { %v6028_v60 = vpop.permute.xlu0 %6027  ;;  %v6237_v56 = vpop.permute.xlu1 %6236  ;;  %11696 = vst [vmem:[#allocation43_spill] sm:$0xff] %v10672_v32  ;;  %11697 = vst [vmem:[#allocation44_spill] sm:$0xff] %v10675_v46 }
 0x774   :  { %v6034_v12 = vsel %vm1091_vm6, %v6020_v38, %v6028_v60  ;;  %v6046_v2 = vsel %vm1091_vm6, %v6028_v60, %v10629_v49 }
 0x775   :  { %v10678_v40 = vmul.f32 %v6034_v12, %v9257_v62  ;;  %v10681_v23 = vmul.f32 %v6046_v2, %v9234_v53  ;;  %6007 = vrot.lane.b32.xlu0 %v10498_v27, %s8909_s16 }
 0x776   :  { %6013 = vrot.lane.b32.xlu1 %v10495_v17, %s8909_s16 }
 0x777   :  { %11698 = vst [vmem:[#allocation45_spill] sm:$0xff] %v10678_v40  ;;  %11699 = vst [vmem:[#allocation46_spill] sm:$0xff] %v10681_v23  ;;  %v6239_v52 = vpop.permute.xlu0 %6238  ;;  %v6245_v60 = vpop.permute.xlu1 %6244 }
 0x778   :  { %v6276_v12 = vsel %vm1302_vm7, %v6237_v56, %v6245_v60 }
 0x779   :  { %6015 = vrot.lane.b32.xlu0 %v10519_v37, %s8909_s16  ;;  %v10700_v38 = vmul.f32 %v6276_v12, %v9290_v30 }
 0x77a   :  { %6021 = vrot.lane.b32.xlu1 %v10524_v33, %s8909_s16 }
 0x77b   :  { %v6247_v2 = vpop.permute.xlu0 %6246  ;;  %v6253_v53 = vpop.permute.xlu1 %6252  ;;  %11700 = vst [vmem:[#allocation47_spill] sm:$0xff] %v10700_v38 }
 0x77c   :  { %v6277_v9 = vsel %vm1302_vm7, %v6239_v52, %v6247_v2  ;;  %v6272_v32 = vsel %vm1302_vm7, %v6245_v60, %v6253_v53 }
 0x77d   :  { %v10703_v51 = vmul.f32 %v6277_v9, %v9290_v30  ;;  %6023 = vrot.lane.b32.xlu0 %v10535_v35, %s8909_s16  ;;  %v10716_v9 = vmul.f32 %v6272_v32, %v9286_v25 }
 0x77e   :  { %6029 = vrot.lane.b32.xlu1 %v10539_v50, %s8909_s16 }
 0x77f   :  { %11701 = vst [vmem:[#allocation48_spill] sm:$0xff] %v10703_v51  ;;  %v6255_v62 = vpop.permute.xlu0 %6254  ;;  %v6261_v46 = vpop.permute.xlu1 %6260 }
 0x780   :  { %v6273_v12 = vsel %vm1302_vm7, %v6247_v2, %v6255_v62  ;;  %v6268_v60 = vsel %vm1302_vm7, %v6253_v53, %v6261_v46  ;;  %v6280_v23 = vsel %vm1302_vm7, %v6261_v46, %v6237_v56 }
 0x781   :  { %v10719_v30 = vmul.f32 %v6273_v12, %v9286_v25  ;;  %6031 = vrot.lane.b32.xlu0 %v10547_v20, %s8909_s16  ;;  %v10736_v25 = vmul.f32 %v6268_v60, %v9303_v36  ;;  %v10739_v56 = vmul.f32 %v6280_v23, %v9272_v10 }
 0x782   :  { %6240 = vrot.lane.b32.xlu1 %v10478_v44, %s8910_s17 }
 0x783   :  { %v6263_v2 = vpop.permute.xlu0 %6262  ;;  %v6472_v53 = vpop.permute.xlu1 %6471  ;;  %11702 = vst [vmem:[#allocation49_spill] sm:$0xff] %v10736_v25  ;;  %11703 = vst [vmem:[#allocation50_spill] sm:$0xff] %v10739_v56 }
 0x784   :  { %v6269_v12 = vsel %vm1302_vm7, %v6255_v62, %v6263_v2  ;;  %v6281_v40 = vsel %vm1302_vm7, %v6263_v2, %v6239_v52 }
 0x785   :  { %v10742_v46 = vmul.f32 %v6269_v12, %v9303_v36  ;;  %v10745_v38 = vmul.f32 %v6281_v40, %v9272_v10  ;;  %6242 = vrot.lane.b32.xlu0 %v10498_v27, %s8910_s17 }
 0x786   :  { %6248 = vrot.lane.b32.xlu1 %v10495_v17, %s8910_s17 }
 0x787   :  { %11704 = vst [vmem:[#allocation51_spill] sm:$0xff] %v10742_v46  ;;  %11705 = vst [vmem:[#allocation52_spill] sm:$0xff] %v10745_v38  ;;  %v6474_v52 = vpop.permute.xlu0 %6473  ;;  %v6480_v60 = vpop.permute.xlu1 %6479 }
 0x788   :  { %v6511_v2 = vsel %vm1513_vm8, %v6472_v53, %v6480_v60 }
 0x789   :  { %6250 = vrot.lane.b32.xlu0 %v10519_v37, %s8910_s17  ;;  %v10764_v62 = vmul.f32 %v6511_v2, %v9332_v59 }
 0x78a   :  { %6256 = vrot.lane.b32.xlu1 %v10524_v33, %s8910_s17 }
 0x78b   :  { %v6482_v40 = vpop.permute.xlu0 %6481  ;;  %v6488_v32 = vpop.permute.xlu1 %6487  ;;  %11706 = vst [vmem:[#allocation53_spill] sm:$0xff] %v10764_v62 }
 0x78c   :  { %v6512_v12 = vsel %vm1513_vm8, %v6474_v52, %v6482_v40  ;;  %v6507_v10 = vsel %vm1513_vm8, %v6480_v60, %v6488_v32 }
 0x78d   :  { %v10767_v23 = vmul.f32 %v6512_v12, %v9332_v59  ;;  %6258 = vrot.lane.b32.xlu0 %v10535_v35, %s8910_s17  ;;  %v10780_v12 = vmul.f32 %v6507_v10, %v9328_v55 }
 0x78e   :  { %6264 = vrot.lane.b32.xlu1 %v10539_v50, %s8910_s17 }
 0x78f   :  { %11707 = vst [vmem:[#allocation54_spill] sm:$0xff] %v10767_v23  ;;  %v6490_v25 = vpop.permute.xlu0 %6489  ;;  %v6496_v46 = vpop.permute.xlu1 %6495  ;;  %11708 = vst [vmem:[#allocation55_spill] sm:$0xff] %v10780_v12 }
 0x790   :  { %v6508_v2 = vsel %vm1513_vm8, %v6482_v40, %v6490_v25  ;;  %v6503_v60 = vsel %vm1513_vm8, %v6488_v32, %v6496_v46  ;;  %v6515_v51 = vsel %vm1513_vm8, %v6496_v46, %v6472_v53 }
 0x791   :  { %v10783_v59 = vmul.f32 %v6508_v2, %v9328_v55  ;;  %6266 = vrot.lane.b32.xlu0 %v10547_v20, %s8910_s17  ;;  %v10800_v55 = vmul.f32 %v6503_v60, %v9345_v5  ;;  %v10803_v53 = vmul.f32 %v6515_v51, %v9314_v45 }
 0x792   :  { %6475 = vrot.lane.b32.xlu1 %v10478_v44, %s8911_s18 }
 0x793   :  { %11709 = vst [vmem:[#allocation56_spill] sm:$0xff] %v10783_v59  ;;  %v6498_v40 = vpop.permute.xlu0 %6497  ;;  %v6707_v32 = vpop.permute.xlu1 %6706  ;;  %11710 = vst [vmem:[#allocation57_spill] sm:$0xff] %v10800_v55 }
 0x794   :  { %v6504_v2 = vsel %vm1513_vm8, %v6490_v25, %v6498_v40  ;;  %v6516_v36 = vsel %vm1513_vm8, %v6498_v40, %v6474_v52  ;;  %11711 = vst [vmem:[#allocation58_spill] sm:$0xff] %v10803_v53 }
 0x795   :  { %v10806_v46 = vmul.f32 %v6504_v2, %v9345_v5  ;;  %v10809_v62 = vmul.f32 %v6516_v36, %v9314_v45  ;;  %6477 = vrot.lane.b32.xlu0 %v10498_v27, %s8911_s18 }
 0x796   :  { %6483 = vrot.lane.b32.xlu1 %v10495_v17, %s8911_s18 }
 0x797   :  { %11712 = vst [vmem:[#allocation59_spill] sm:$0xff] %v10806_v46  ;;  %11713 = vst [vmem:[#allocation60_spill] sm:$0xff] %v10809_v62  ;;  %v6709_v52 = vpop.permute.xlu0 %6708  ;;  %v6715_v60 = vpop.permute.xlu1 %6714 }
 0x798   :  { %v6746_v40 = vsel %vm1724_vm9, %v6707_v32, %v6715_v60 }
 0x799   :  { %6485 = vrot.lane.b32.xlu0 %v10519_v37, %s8911_s18  ;;  %v10828_v25 = vmul.f32 %v6746_v40, %v11682_v47 }
 0x79a   :  { %6491 = vrot.lane.b32.xlu1 %v10524_v33, %s8911_s18 }
 0x79b   :  { %v6717_v36 = vpop.permute.xlu0 %6716  ;;  %v6723_v10 = vpop.permute.xlu1 %6722  ;;  %11714 = vst [vmem:[#allocation61_spill] sm:$0xff] %v10828_v25 }
 0x79c   :  { %v6747_v2 = vsel %vm1724_vm9, %v6709_v52, %v6717_v36  ;;  %v6742_v45 = vsel %vm1724_vm9, %v6715_v60, %v6723_v10 }
 0x79d   :  { %v10831_v51 = vmul.f32 %v6747_v2, %v11682_v47  ;;  %6493 = vrot.lane.b32.xlu0 %v10535_v35, %s8911_s18  ;;  %v10844_v2 = vmul.f32 %v6742_v45, %v9370_v14 }
 0x79e   :  { %6499 = vrot.lane.b32.xlu1 %v10539_v50, %s8911_s18 }
 0x79f   :  { %11715 = vst [vmem:[#allocation62_spill] sm:$0xff] %v10831_v51  ;;  %v6725_v55 = vpop.permute.xlu0 %6724  ;;  %v6731_v46 = vpop.permute.xlu1 %6730  ;;  %11716 = vst [vmem:[#allocation63_spill] sm:$0xff] %v10844_v2 }
 0x7a0   :  { %v6743_v40 = vsel %vm1724_vm9, %v6717_v36, %v6725_v55  ;;  %v6738_v60 = vsel %vm1724_vm9, %v6723_v10, %v6731_v46  ;;  %v6750_v53 = vsel %vm1724_vm9, %v6731_v46, %v6707_v32  ;;  %v11720_v32 = vld [vmem:[#allocation28_spill] sm:$0xff] }
 0x7a1   :  { %v10847_v47 = vmul.f32 %v6743_v40, %v9370_v14  ;;  %6501 = vrot.lane.b32.xlu0 %v10547_v20, %s8911_s18  ;;  %v11718_v14 = vld [vmem:[#allocation31_spill] sm:$0xff]  ;;  %v10867_v46 = vmul.f32 %v6750_v53, %v11720_v32  ;;  %v4947_v53 = vsel %vm93_vm2, %v10522_v1, %v10537_v57 }
 0x7a2   :  { %6710 = vrot.lane.b32.xlu1 %v10478_v44, %s8912_s19  ;;  %v10864_v25 = vmul.f32 %v6738_v60, %v11718_v14 }
 0x7a3   :  { %11717 = vst [vmem:[#allocation64_spill] sm:$0xff] %v10847_v47  ;;  %v6733_v36 = vpop.permute.xlu0 %6732  ;;  %11721 = vst [vmem:[#allocation66_spill] sm:$0xff] %v10867_v46  ;;  %v11724_v46 = vld [vmem:[#allocation5_spill] sm:$0xff] }
 0x7a4   :  { %v6739_v40 = vsel %vm1724_vm9, %v6725_v55, %v6733_v36  ;;  %v6751_v5 = vsel %vm1724_vm9, %v6733_v36, %v6709_v52  ;;  %v4977_v10 = vpop.permute.xlu1 %4976  ;;  %11719 = vst [vmem:[#allocation65_spill] sm:$0xff] %v10864_v25 }
 0x7a5   :  { %v10870_v51 = vmul.f32 %v6739_v40, %v11718_v14  ;;  %v10873_v62 = vmul.f32 %v6751_v5, %v11720_v32  ;;  %6712 = vrot.lane.b32.xlu0 %v10498_v27, %s8912_s19 }
 0x7a6   :  { %6718 = vrot.lane.b32.xlu1 %v10495_v17, %s8912_s19 }
 0x7a7   :  { %11722 = vst [vmem:[#allocation67_spill] sm:$0xff] %v10870_v51  ;;  %11723 = vst [vmem:[#allocation68_spill] sm:$0xff] %v10873_v62  ;;  %v4979_v52 = vpop.permute.xlu0 %4978 }
 0x7a8   :  { %v4985_v60 = vpop.permute.xlu1 %4984 }
 0x7a9   :  { %6720 = vrot.lane.b32.xlu0 %v10519_v37, %s8912_s19  ;;  %v5014_v5 = vsel %vm134_vm1, %v4977_v10, %v4985_v60 }
 0x7aa   :  { %6726 = vrot.lane.b32.xlu1 %v10524_v33, %s8912_s19  ;;  %v5029_v55 = vmul.f32 %v5014_v5, %v9085_v26  ;;  %v4939_v5 = vsel %vm93_vm2, %v10549_v3, %v10557_v58 }
 0x7ab   :  { %v4987_v36 = vpop.permute.xlu0 %4986 }
 0x7ac   :  { %v5015_v40 = vsel %vm134_vm1, %v4979_v52, %v4987_v36  ;;  %v4993_v45 = vpop.permute.xlu1 %4992 }
 0x7ad   :  { %v5033_v32 = vmul.f32 %v5015_v40, %v9085_v26  ;;  %6728 = vrot.lane.b32.xlu0 %v10535_v35, %s8912_s19  ;;  %v4946_v40 = vsel %vm93_vm2, %v10507_v48, %v10526_v29  ;;  %v5010_v2 = vsel %vm134_vm1, %v4985_v60, %v4993_v45  ;;  %v4942_v60 = vsel %vm93_vm2, %v10526_v29, %v10541_v19 }
 0x7ae   :  { %6734 = vrot.lane.b32.xlu1 %v10539_v50, %s8912_s19 }
 0x7af   :  { %v4995_v14 = vpop.permute.xlu0 %4994  ;;  %v8406_v25 = vpack.c.bf16 %v5033_v32, %v5029_v55  ;;  %v4959_v32 = vmul.f32 %v4947_v53, %v11724_v46  ;;  %v4951_v53 = vsel %vm93_vm2, %v10557_v58, %v10522_v1 }
 0x7b0   :  { %v5001_v51 = vpop.permute.xlu1 %5000  ;;  %v5011_v26 = vsel %vm134_vm1, %v4987_v36, %v4995_v14  ;;  %v4943_v36 = vsel %vm93_vm2, %v10537_v57, %v10549_v3 }
 0x7b1   :  { %6736 = vrot.lane.b32.xlu0 %v10547_v20, %s8912_s19  ;;  %8407 = vmatprep.subr.bf16.mxu0 %v8406_v25  ;;  %v5006_v55 = vsel %vm134_vm1, %v4993_v45, %v5001_v51  ;;  %v5018_v62 = vsel %vm134_vm1, %v5001_v51, %v4977_v10  ;;  %v4938_v25 = vsel %vm93_vm2, %v10541_v19, %v10551_v42  ;;  %v11725_v51 = vld [vmem:[#allocation7_spill] sm:$0xff] }
 0x7b2   :  { %v4961_v10 = vmul.f32 %v4939_v5, %v11725_v51  ;;  %v5034_v23 = vmul.f32 %v5011_v26, %v9090_v28  ;;  %v5028_v59 = vmul.f32 %v5018_v62, %v9081_v24  ;;  %v5031_v56 = vmul.f32 %v5006_v55, %v9070_v18 }
 0x7b3   :  { %v5003_v47 = vpop.permute.xlu0 %5002  ;;  %v4955_v45 = vmul.f32 %v4946_v40, %v11724_v46  ;;  %v4957_v62 = vmul.f32 %v4938_v25, %v11725_v51  ;;  %v11727_v40 = vld [vmem:[#allocation6_spill] sm:$0xff] }
 0x7b4   :  { %v5007_v57 = vsel %vm134_vm1, %v4995_v14, %v5003_v47  ;;  %v5019_v3 = vsel %vm134_vm1, %v5003_v47, %v4979_v52  ;;  %v4911_v12 = vpop.permute.xlu1 %4910  ;;  %v4950_v14 = vsel %vm93_vm2, %v10551_v42, %v10507_v48  ;;  %v5030_v47 = vmul.f32 %v5010_v2, %v9090_v28  ;;  %v11726_v52 = vld [vmem:[#allocation4_spill] sm:$0xff]  ;;  %v7668_v28 = vld [vmem:[%s11544_s4 + $0x10] sm:$0xff] }
 0x7b5   :  { %v5032_v1 = vmul.f32 %v5019_v3, %v9081_v24  ;;  %v5035_v58 = vmul.f32 %v5007_v57, %v9070_v18  ;;  %v4958_v24 = vmul.f32 %v4951_v53, %v11726_v52  ;;  %v4960_v55 = vmul.f32 %v4943_v36, %v11727_v40 }
 0x7b6   :  { %v8416_v57 = vpack.c.bf16 %v5034_v23, %v5030_v47  ;;  %v8418_v38 = vpack.c.bf16 %v4959_v32, %v4955_v45  ;;  %v4954_v29 = vmul.f32 %v4950_v14, %v11726_v52  ;;  %v8426_v19 = vpack.c.bf16 %v4961_v10, %v4957_v62  ;;  %v11729_v47 = vld [vmem:[#allocation8_spill] sm:$0xff] }
 0x7b7   :  { %v8408_v5 = vpack.c.bf16 %v5032_v1, %v5028_v59  ;;  %v4913_v18 = vpop.permute.xlu0 %4912  ;;  %v8414_v26 = vpack.c.bf16 %v5035_v58, %v5031_v56  ;;  %v4956_v48 = vmul.f32 %v4942_v60, %v11727_v40  ;;  %v11728_v53 = vmov 0.0  }
 0x7b8   :  { %v4919_v3 = vpop.permute.xlu1 %4918  ;;  %v8420_v42 = vpack.c.bf16 %v4958_v24, %v4954_v29  ;;  %v5401_v10 = vsel %vm498_vm4, %v10565_v34, %v10573_v31  ;;  %v5400_v45 = vsel %vm498_vm4, %v10559_v0, %v10567_v61  ;;  %v5393_v60 = vsel %vm498_vm4, %v10581_v6, %v10589_v63 }
 0x7b9   :  { %8409 = vmatpush1.bf16.msra.mxu0 %v8408_v5  ;;  %8415 = vmatprep.subr.bf16.mxu1 %v8414_v26  ;;  %v4948_v59 = vsel %vm93_vm2, %v4911_v12, %v4919_v3  ;;  %v8428_v23 = vpack.c.bf16 %v4960_v55, %v4956_v48  ;;  %v5413_v62 = vmul.f32 %v5401_v10, %v11729_v47  ;;  %v11732_v10 = vld [vmem:[#allocation10_spill] sm:$0xff] }
 0x7ba   :  { %8417 = vmatpush1.bf16.msra.mxu1 %v8416_v57  ;;  %8419 = vmatprep.subr.bf16.mxu0 %v8418_v38  ;;  %v4963_v36 = vmul.f32 %v4948_v59, %v11724_v46  ;;  %v7669_v38 = vld [vmem:[%s11544_s4 + $0x18] sm:$0xff]  ;;  %v5397_v26 = vsel %vm498_vm4, %v10573_v31, %v10581_v6  ;;  %v5392_v55 = vsel %vm498_vm4, %v10575_v22, %v10583_v11 }
 0x7bb   :  { %v4921_v56 = vpop.permute.xlu0 %4920  ;;  %8427 = vmatprep.subr.bf16.mxu1 %v8426_v19  ;;  %v5405_v57 = vsel %vm498_vm4, %v10589_v63, %v10565_v34  ;;  %v11730_v19 = vld [vmem:[#allocation11_spill] sm:$0xff] }
 0x7bc   :  { %v4949_v2 = vsel %vm93_vm2, %v4913_v18, %v4921_v56  ;;  %v4927_v32 = vpop.permute.xlu1 %4926  ;;  %7670 = vmatmul.mubr.msk.f32.vlgmr.msra.gmra.mrb[36].mxu0 %vm5039_vm11, %v7668_v28 }
 0x7bd   :  { %v4967_v25 = vmul.f32 %v4949_v2, %v11724_v46  ;;  %8421 = vmatpush1.bf16.msra.mxu0 %v8420_v42  ;;  %7672 = vmatmul.mubr.msk.f32.vlgmr.msra.gmra.mrb[36].mxu1 %vm5039_vm11, %v7668_v28  ;;  %v5415_v28 = vmul.f32 %v5393_v60, %v11730_v19 }
 0x7be   :  { %8429 = vmatpush1.bf16.msra.mxu1 %v8428_v23  ;;  %5116 = vmatprep.mubr.f32.mxu0 %v11728_v53  ;;  %v5396_v23 = vsel %vm498_vm4, %v10567_v61, %v10575_v22 }
 0x7bf   :  { %v4929_v1 = vpop.permute.xlu0 %4928  ;;  %v8422_v58 = vpack.c.bf16 %v4967_v25, %v4963_v36  ;;  %5193 = vmatprep.mubr.f32.mxu1 %v11728_v53  ;;  %v11731_v36 = vld [vmem:[#allocation9_spill] sm:$0xff] }
 0x7c0   :  { %v4935_v46 = vpop.permute.xlu1 %4934  ;;  %7671 = vmatmul.mubr.msk.f32.gmra.mrb[38].mxu0 %vm5039_vm11, %v7669_v38  ;;  %v4945_v14 = vsel %vm93_vm2, %v4921_v56, %v4929_v1 }
 0x7c1   :  { %8423 = vmatprep.subr.bf16.mxu0 %v8422_v58  ;;  %7673 = vmatmul.mubr.msk.f32.gmra.mrb[38].mxu1 %vm5039_vm11, %v7669_v38  ;;  %v4940_v24 = vsel %vm93_vm2, %v4927_v32, %v4935_v46  ;;  %v4952_v5 = vsel %vm93_vm2, %v4935_v46, %v4911_v12  ;;  %v4944_v12 = vsel %vm93_vm2, %v4919_v3, %v4927_v32 }
 0x7c2   :  { %5270 = vmatprep.mubr.f32.mxu0 %v11728_v53  ;;  %5347 = vmatprep.mubr.f32.mxu1 %v11728_v53  ;;  %v4968_v48 = vmul.f32 %v4945_v14, %v11727_v40  ;;  %v4962_v42 = vmul.f32 %v4952_v5, %v11726_v52  ;;  %v4965_v56 = vmul.f32 %v4940_v24, %v11725_v51 }
 0x7c3   :  { %v4937_v29 = vpop.permute.xlu0 %4936  ;;  %v5409_v3 = vmul.f32 %v5400_v45, %v11729_v47  ;;  %v4964_v2 = vmul.f32 %v4944_v12, %v11727_v40  ;;  %v5411_v32 = vmul.f32 %v5392_v55, %v11730_v19  ;;  %v5636_v12 = vsel %vm709_vm5, %v10597_v43, %v10605_v16 }
 0x7c4   :  { %v4941_v31 = vsel %vm93_vm2, %v4929_v1, %v4937_v29  ;;  %v4953_v6 = vsel %vm93_vm2, %v4937_v29, %v4913_v18  ;;  %v5365_v59 = vpop.permute.xlu1 %5364  ;;  %v5404_v18 = vsel %vm498_vm4, %v10583_v11, %v10559_v0  ;;  %v5414_v1 = vmul.f32 %v5397_v26, %v11732_v10  ;;  %v4970_v0 = vld [vmem:[%s11544_s4] sm:$0xff] }
 0x7c5   :  { %v4966_v34 = vmul.f32 %v4953_v6, %v11726_v52  ;;  %v4969_v63 = vmul.f32 %v4941_v31, %v11725_v51  ;;  %v5412_v52 = vmul.f32 %v5405_v57, %v11731_v36  ;;  %v8432_v58 = vpack.c.bf16 %v4968_v48, %v4964_v2  ;;  %v4971_v57 = vld [vmem:[%s11544_s4 + $0x8] sm:$0xff] }
 0x7c6   :  { %v8434_v45 = vpack.c.bf16 %v5413_v62, %v5409_v3  ;;  %v5408_v61 = vmul.f32 %v5404_v18, %v11731_v36  ;;  %v8442_v22 = vpack.c.bf16 %v5415_v28, %v5411_v32  ;;  %v5410_v11 = vmul.f32 %v5396_v23, %v11732_v10  ;;  %v11734_v32 = vld [vmem:[#allocation15_spill] sm:$0xff] }
 0x7c7   :  { %v8424_v25 = vpack.c.bf16 %v4966_v34, %v4962_v42  ;;  %v5367_v51 = vpop.permute.xlu0 %5366  ;;  %v8430_v38 = vpack.c.bf16 %v4969_v63, %v4965_v56  ;;  %v5635_v48 = vsel %vm709_vm5, %v10591_v4, %v10599_v7  ;;  %v5628_v31 = vsel %vm709_vm5, %v10613_v54, %v10621_v8  ;;  %v11733_v42 = vld [vmem:[#allocation12_spill] sm:$0xff] }
 0x7c8   :  { %v5373_v46 = vpop.permute.xlu1 %5372  ;;  %v8436_v60 = vpack.c.bf16 %v5412_v52, %v5408_v61  ;;  %v8444_v62 = vpack.c.bf16 %v5414_v1, %v5410_v11  ;;  %v5648_v56 = vmul.f32 %v5636_v12, %v11733_v42  ;;  %v5632_v3 = vsel %vm709_vm5, %v10605_v16, %v10613_v54 }
 0x7c9   :  { %8425 = vmatpush1.bf16.msra.mxu0 %v8424_v25  ;;  %8431 = vmatprep.subr.bf16.mxu1 %v8430_v38  ;;  %v5402_v40 = vsel %vm498_vm4, %v5365_v59, %v5373_v46  ;;  %v5627_v23 = vsel %vm709_vm5, %v10607_v21, %v10615_v39  ;;  %v5640_v18 = vsel %vm709_vm5, %v10621_v8, %v10597_v43 }
 0x7ca   :  { %8433 = vmatpush1.bf16.msra.mxu1 %v8432_v58  ;;  %8435 = vmatprep.subr.bf16.mxu0 %v8434_v45  ;;  %v5417_v26 = vmul.f32 %v5402_v40, %v11729_v47  ;;  %v5650_v52 = vmul.f32 %v5628_v31, %v11734_v32  ;;  %v5631_v45 = vsel %vm709_vm5, %v10599_v7, %v10607_v21 }
 0x7cb   :  { %v5375_v14 = vpop.permute.xlu0 %5374  ;;  %8443 = vmatprep.subr.bf16.mxu1 %v8442_v22  ;;  %v5646_v22 = vmul.f32 %v5627_v23, %v11734_v32 }
 0x7cc   :  { %v5403_v24 = vsel %vm498_vm4, %v5367_v51, %v5375_v14  ;;  %v5381_v5 = vpop.permute.xlu1 %5380  ;;  %7674 = vmatmul.mubr.msk.f32.vlgmr.msra.gmra.mrb[36].mxu0 %vm5039_vm11, %v4970_v0 }
 0x7cd   :  { %v5421_v55 = vmul.f32 %v5403_v24, %v11729_v47  ;;  %8437 = vmatpush1.bf16.msra.mxu0 %v8436_v60  ;;  %7676 = vmatmul.mubr.msk.f32.vlgmr.msra.gmra.mrb[36].mxu1 %vm5039_vm11, %v4970_v0  ;;  %v11735_v0 = vld [vmem:[#allocation13_spill] sm:$0xff]  ;;  %v11736_v60 = vld [vmem:[#allocation14_spill] sm:$0xff]  ;;  %v8458_v21 = vpack.c.bf16 %v5650_v52, %v5646_v22 }
 0x7ce   :  { %8445 = vmatpush1.bf16.msra.mxu1 %v8444_v62  ;;  %5276 = vmatprep.mubr.f32.mxu0 %v11728_v53 }
 0x7cf   :  { %v5383_v29 = vpop.permute.xlu0 %5382  ;;  %v8438_v28 = vpack.c.bf16 %v5421_v55, %v5417_v26  ;;  %5353 = vmatprep.mubr.f32.mxu1 %v11728_v53 }
 0x7d0   :  { %v5389_v47 = vpop.permute.xlu1 %5388  ;;  %7675 = vmatmul.mubr.msk.f32.gmra.mrb[38].mxu0 %vm5039_vm11, %v4971_v57  ;;  %v5399_v6 = vsel %vm498_vm4, %v5375_v14, %v5383_v29  ;;  %v5649_v14 = vmul.f32 %v5632_v3, %v11736_v60 }
 0x7d1   :  { %8439 = vmatprep.subr.bf16.mxu0 %v8438_v28  ;;  %7677 = vmatmul.mubr.msk.f32.gmra.mrb[38].mxu1 %vm5039_vm11, %v4971_v57  ;;  %v5394_v34 = vsel %vm498_vm4, %v5381_v5, %v5389_v47  ;;  %v5406_v63 = vsel %vm498_vm4, %v5389_v47, %v5365_v59  ;;  %v5398_v59 = vsel %vm498_vm4, %v5373_v46, %v5381_v5 }
 0x7d2   :  { %5497 = vmatprep.mubr.f32.mxu0 %v11728_v53  ;;  %5574 = vmatprep.mubr.f32.mxu1 %v11728_v53  ;;  %v5422_v25 = vmul.f32 %v5399_v6, %v11732_v10  ;;  %v5416_v1 = vmul.f32 %v5406_v63, %v11731_v36  ;;  %v5419_v58 = vmul.f32 %v5394_v34, %v11730_v19 }
 0x7d3   :  { %v5391_v2 = vpop.permute.xlu0 %5390  ;;  %v5644_v46 = vmul.f32 %v5635_v48, %v11733_v42  ;;  %v5418_v61 = vmul.f32 %v5398_v59, %v11732_v10  ;;  %v7679_v48 = vld [vmem:[%s11544_s4 + $0x28] sm:$0xff] }
 0x7d4   :  { %v5395_v16 = vsel %vm498_vm4, %v5383_v29, %v5391_v2  ;;  %v5407_v54 = vsel %vm498_vm4, %v5391_v2, %v5367_v51  ;;  %v5600_v38 = vpop.permute.xlu1 %5599  ;;  %v5639_v51 = vsel %vm709_vm5, %v10615_v39, %v10591_v4  ;;  %v7678_v4 = vld [vmem:[%s11544_s4 + $0x20] sm:$0xff]  ;;  %v5645_v39 = vmul.f32 %v5631_v45, %v11736_v60 }
 0x7d5   :  { %v5420_v43 = vmul.f32 %v5407_v54, %v11731_v36  ;;  %v5423_v8 = vmul.f32 %v5395_v16, %v11730_v19  ;;  %v5647_v36 = vmul.f32 %v5640_v18, %v11735_v0  ;;  %v8448_v62 = vpack.c.bf16 %v5422_v25, %v5418_v61  ;;  %v11738_v61 = vld [vmem:[#allocation35_spill] sm:$0xff] }
 0x7d6   :  { %v8450_v5 = vpack.c.bf16 %v5648_v56, %v5644_v46  ;;  %v5643_v7 = vmul.f32 %v5639_v51, %v11735_v0  ;;  %v8460_v57 = vpack.c.bf16 %v5649_v14, %v5645_v39  ;;  %v11737_v51 = vld [vmem:[#allocation34_spill] sm:$0xff]  ;;  %v11742_v14 = vld [vmem:[#allocation32_spill] sm:$0xff]  ;;  %v8470_v39 = vpack.c.bf16 %v10519_v37, %v10495_v17 }
 0x7d7   :  { %v8440_v11 = vpack.c.bf16 %v5420_v43, %v5416_v1  ;;  %v5602_v19 = vpop.permute.xlu0 %5601  ;;  %v8446_v40 = vpack.c.bf16 %v5423_v8, %v5419_v58  ;;  %v8466_v22 = vpack.c.bf16 %v11738_v61, %v11737_v51  ;;  %v11757_v51 = vld [vmem:[#allocation43_spill] sm:$0xff] }
 0x7d8   :  { %v5608_v24 = vpop.permute.xlu1 %5607  ;;  %v8452_v26 = vpack.c.bf16 %v5647_v36, %v5643_v7  ;;  %v11739_v36 = vld [vmem:[#allocation38_spill] sm:$0xff]  ;;  %v11745_v7 = vld [vmem:[#allocation40_spill] sm:$0xff] }
 0x7d9   :  { %8441 = vmatpush1.bf16.msra.mxu0 %v8440_v11  ;;  %8447 = vmatprep.subr.bf16.mxu1 %v8446_v40  ;;  %v5637_v10 = vsel %vm709_vm5, %v5600_v38, %v5608_v24  ;;  %v11740_v11 = vld [vmem:[#allocation39_spill] sm:$0xff] }
 0x7da   :  { %8449 = vmatpush1.bf16.msra.mxu1 %v8448_v62  ;;  %8451 = vmatprep.subr.bf16.mxu0 %v8450_v5  ;;  %v5652_v28 = vmul.f32 %v5637_v10, %v11733_v42  ;;  %v11743_v62 = vld [vmem:[#allocation33_spill] sm:$0xff]  ;;  %v11746_v10 = vld [vmem:[#allocation36_spill] sm:$0xff] }
 0x7db   :  { %v5610_v55 = vpop.permute.xlu0 %5609  ;;  %8459 = vmatprep.subr.bf16.mxu1 %v8458_v21  ;;  %v11744_v5 = vld [vmem:[#allocation41_spill] sm:$0xff] }
 0x7dc   :  { %v5638_v12 = vsel %vm709_vm5, %v5602_v19, %v5610_v55  ;;  %v5616_v29 = vpop.permute.xlu1 %5615  ;;  %7680 = vmatmul.mubr.msk.f32.vlgmr.msra.gmra.mrb[36].mxu0 %vm5039_vm11, %v7678_v4  ;;  %v6041_v21 = vsel %vm1091_vm6, %v11745_v7, %v11744_v5 }
 0x7dd   :  { %v5656_v47 = vmul.f32 %v5638_v12, %v11733_v42  ;;  %8453 = vmatpush1.bf16.msra.mxu0 %v8452_v26  ;;  %7682 = vmatmul.mubr.msk.f32.vlgmr.msra.gmra.mrb[36].mxu1 %vm5039_vm11, %v7678_v4  ;;  %v5633_v3 = vsel %vm709_vm5, %v5608_v24, %v5616_v29  ;;  %v8468_v24 = vpack.c.bf16 %v11743_v62, %v11742_v14  ;;  %v11747_v26 = vld [vmem:[#allocation37_spill] sm:$0xff]  ;;  %v11748_v12 = vld [vmem:[#allocation18_spill] sm:$0xff]  ;;  %v11760_v14 = vld [vmem:[#allocation52_spill] sm:$0xff] }
 0x7de   :  { %8461 = vmatpush1.bf16.msra.mxu1 %v8460_v57  ;;  %5503 = vmatprep.mubr.f32.mxu0 %v11728_v53  ;;  %v5653_v1 = vmul.f32 %v5633_v3, %v11736_v60  ;;  %v7685_v57 = vld [vmem:[%s11544_s4 + $0x38] sm:$0xff]  ;;  %v6049_v17 = vmul.f32 %v6041_v21, %v11748_v12  ;;  %v11763_v21 = vld [vmem:[#allocation48_spill] sm:$0xff] }
 0x7df   :  { %v5618_v31 = vpop.permute.xlu0 %5617  ;;  %v8454_v6 = vpack.c.bf16 %v5656_v47, %v5652_v28  ;;  %5580 = vmatprep.mubr.f32.mxu1 %v11728_v53  ;;  %v11761_v62 = vld [vmem:[#allocation50_spill] sm:$0xff] }
 0x7e0   :  { %v5624_v56 = vpop.permute.xlu1 %5623  ;;  %7681 = vmatmul.mubr.msk.f32.gmra.mrb[38].mxu0 %vm5039_vm11, %v7679_v48  ;;  %v5634_v42 = vsel %vm709_vm5, %v5610_v55, %v5618_v31  ;;  %v8476_v55 = vpack.c.bf16 %v11747_v26, %v11746_v10  ;;  %v11766_v26 = vld [vmem:[#allocation51_spill] sm:$0xff] }
 0x7e1   :  { %8455 = vmatprep.subr.bf16.mxu0 %v8454_v6  ;;  %7683 = vmatmul.mubr.msk.f32.gmra.mrb[38].mxu1 %vm5039_vm11, %v7679_v48  ;;  %v5629_v34 = vsel %vm709_vm5, %v5616_v29, %v5624_v56  ;;  %v5641_v63 = vsel %vm709_vm5, %v5624_v56, %v5600_v38  ;;  %v5657_v18 = vmul.f32 %v5634_v42, %v11736_v60  ;;  %v11749_v56 = vld [vmem:[#allocation17_spill] sm:$0xff] }
 0x7e2   :  { %5732 = vmatprep.mubr.f32.mxu0 %v11728_v53  ;;  %5809 = vmatprep.mubr.f32.mxu1 %v11728_v53  ;;  %v5651_v25 = vmul.f32 %v5641_v63, %v11735_v0  ;;  %v5654_v16 = vmul.f32 %v5629_v34, %v11734_v32  ;;  %v11750_v63 = vpack.c.bf16 %v10653_v41, %v10650_v15 }
 0x7e3   :  { %v5626_v23 = vpop.permute.xlu0 %5625  ;;  %v8464_v46 = vpack.c.bf16 %v5657_v18, %v5653_v1  ;;  %v11755_v1 = vld [vmem:[#allocation16_spill] sm:$0xff] }
 0x7e4   :  { %v5630_v59 = vsel %vm709_vm5, %v5618_v31, %v5626_v23  ;;  %v5642_v2 = vsel %vm709_vm5, %v5626_v23, %v5602_v19  ;;  %v6006_v52 = vpop.permute.xlu1 %6005  ;;  %v8474_v19 = vpack.c.bf16 %v11740_v11, %v11739_v36 }
 0x7e5   :  { %v5655_v54 = vmul.f32 %v5642_v2, %v11735_v0  ;;  %v5658_v38 = vmul.f32 %v5630_v59, %v11734_v32  ;;  %v7684_v0 = vld [vmem:[%s11544_s4 + $0x30] sm:$0xff]  ;;  %v11741_v32 = vld [vmem:[#allocation42_spill] sm:$0xff]  ;;  %v11752_v2 = vld [vmem:[#allocation44_spill] sm:$0xff] }
 0x7e6   :  { %v6042_v40 = vsel %vm1091_vm6, %v10629_v49, %v11741_v32  ;;  %v8478_v49 = vpack.c.bf16 %v10547_v20, %v10539_v50  ;;  %v8472_v50 = vpack.c.bf16 %v10498_v27, %v10478_v44  ;;  %v8480_v20 = vpack.c.bf16 %v10535_v35, %v10524_v33  ;;  %v7690_v33 = vld [vmem:[%s11544_s4 + $0x40] sm:$0xff]  ;;  %v11751_v59 = vld [vmem:[#allocation46_spill] sm:$0xff]  ;;  %v7696_v32 = vld [vmem:[%s11544_s4 + $0x50] sm:$0xff] }
 0x7e7   :  { %v8456_v58 = vpack.c.bf16 %v5655_v54, %v5651_v25  ;;  %v6008_v43 = vpop.permute.xlu0 %6007  ;;  %v8462_v8 = vpack.c.bf16 %v5658_v38, %v5654_v16  ;;  %v6053_v29 = vmul.f32 %v6042_v40, %v11748_v12  ;;  %v11753_v25 = vpack.c.bf16 %v11751_v59, %v11752_v2  ;;  %v11754_v54 = vld [vmem:[#allocation19_spill] sm:$0xff] }
 0x7e8   :  { %v6014_v45 = vpop.permute.xlu1 %6013  ;;  %v11759_v40 = vpack.c.bf16 %v10719_v30, %v10716_v9  ;;  %v7697_v9 = vld [vmem:[%s11544_s4 + $0x58] sm:$0xff]  ;;  %v7702_v59 = vld [vmem:[%s11544_s4 + $0x60] sm:$0xff] }
 0x7e9   :  { %8457 = vmatpush1.bf16.msra.mxu0 %v8456_v58  ;;  %8463 = vmatprep.subr.bf16.mxu1 %v8462_v8  ;;  %v6043_v47 = vsel %vm1091_vm6, %v6006_v52, %v6014_v45  ;;  %v8484_v35 = vpack.c.bf16 %v6053_v29, %v6049_v17 }
 0x7ea   :  { %8465 = vmatpush1.bf16.msra.mxu1 %v8464_v46  ;;  %8467 = vmatprep.subr.bf16.mxu0 %v8466_v22  ;;  %v6057_v3 = vmul.f32 %v6043_v47, %v11748_v12 }
 0x7eb   :  { %v6016_v60 = vpop.permute.xlu0 %6015  ;;  %8475 = vmatprep.subr.bf16.mxu1 %v8474_v19 }
 0x7ec   :  { %v6022_v4 = vpop.permute.xlu1 %6021  ;;  %7686 = vmatmul.mubr.msk.f32.vlgmr.msra.gmra.mrb[36].mxu0 %vm5039_vm11, %v7684_v0  ;;  %v6044_v48 = vsel %vm1091_vm6, %v6008_v43, %v6016_v60 }
 0x7ed   :  { %8469 = vmatpush1.bf16.msra.mxu0 %v8468_v24  ;;  %7688 = vmatmul.mubr.msk.f32.vlgmr.msra.gmra.mrb[36].mxu1 %vm5039_vm11, %v7684_v0  ;;  %v6039_v28 = vsel %vm1091_vm6, %v6014_v45, %v6022_v4  ;;  %v6061_v23 = vmul.f32 %v6044_v48, %v11748_v12  ;;  %v7691_v45 = vld [vmem:[%s11544_s4 + $0x48] sm:$0xff]  ;;  %v11762_v24 = vpack.c.bf16 %v11760_v14, %v11761_v62  ;;  %v11769_v12 = vld [vmem:[#allocation22_spill] sm:$0xff] }
 0x7ee   :  { %8471 = vmatprep.subr.bf16.mxu0 %v8470_v39  ;;  %8477 = vmatpush1.bf16.msra.mxu1 %v8476_v55  ;;  %v6058_v42 = vmul.f32 %v6039_v28, %v11749_v56  ;;  %v11767_v55 = vld [vmem:[#allocation49_spill] sm:$0xff] }
 0x7ef   :  { %v6024_v37 = vpop.permute.xlu0 %6023  ;;  %8479 = vmatprep.subr.bf16.mxu1 %v8478_v49  ;;  %5738 = vmatprep.mubr.f32.mxu0 %v11728_v53  ;;  %v8488_v22 = vpack.c.bf16 %v6061_v23, %v6057_v3  ;;  %v11768_v49 = vpack.c.bf16 %v11766_v26, %v11767_v55 }
 0x7f0   :  { %v6040_v31 = vsel %vm1091_vm6, %v6016_v60, %v6024_v37  ;;  %v6030_v6 = vpop.permute.xlu1 %6029  ;;  %7687 = vmatmul.mubr.msk.f32.gmra.mrb[38].mxu0 %vm5039_vm11, %v7685_v57  ;;  %5815 = vmatprep.mubr.f32.mxu1 %v11728_v53 }
 0x7f1   :  { %v6062_v44 = vmul.f32 %v6040_v31, %v11749_v56  ;;  %v6035_v27 = vsel %vm1091_vm6, %v6022_v4, %v6030_v6  ;;  %8473 = vmatpush1.bf16.msra.mxu0 %v8472_v50  ;;  %7689 = vmatmul.mubr.msk.f32.gmra.mrb[38].mxu1 %vm5039_vm11, %v7685_v57  ;;  %v6047_v34 = vsel %vm1091_vm6, %v6030_v6, %v6006_v52  ;;  %v11764_v4 = vld [vmem:[#allocation47_spill] sm:$0xff] }
 0x7f2   :  { %8481 = vmatpush1.bf16.msra.mxu1 %v8480_v20  ;;  %8483 = vmatprep.subr.bf16.mxu0 %v11750_v63  ;;  %v6059_v38 = vmul.f32 %v6035_v27, %v11754_v54  ;;  %v6060_v58 = vmul.f32 %v6047_v34, %v11755_v1  ;;  %v11765_v30 = vpack.c.bf16 %v11763_v21, %v11764_v4  ;;  %v11772_v63 = vld [vmem:[#allocation20_spill] sm:$0xff] }
 0x7f3   :  { %v6032_v18 = vpop.permute.xlu0 %6031  ;;  %8491 = vmatprep.subr.bf16.mxu1 %v11753_v25  ;;  %5903 = vmatprep.mubr.f32.mxu0 %v11728_v53  ;;  %v8486_v16 = vpack.c.bf16 %v6062_v44, %v6058_v42 }
 0x7f4   :  { %v6036_v52 = vsel %vm1091_vm6, %v6024_v37, %v6032_v18  ;;  %v6048_v15 = vsel %vm1091_vm6, %v6032_v18, %v6008_v43  ;;  %v6241_v41 = vpop.permute.xlu1 %6240  ;;  %7692 = vmatmul.mubr.msk.f32.vlgmr.msra.gmra.mrb[36].mxu0 %vm5039_vm11, %v7690_v33  ;;  %5980 = vmatprep.mubr.f32.mxu1 %v11728_v53  ;;  %v11756_v43 = vld [vmem:[#allocation45_spill] sm:$0xff] }
 0x7f5   :  { %v6063_v8 = vmul.f32 %v6036_v52, %v11754_v54  ;;  %v6064_v46 = vmul.f32 %v6048_v15, %v11755_v1  ;;  %8485 = vmatpush1.bf16.msra.mxu0 %v8484_v35  ;;  %7694 = vmatmul.mubr.msk.f32.vlgmr.msra.gmra.mrb[36].mxu1 %vm5039_vm11, %v7690_v33  ;;  %v11758_v61 = vpack.c.bf16 %v11756_v43, %v11757_v51  ;;  %v11770_v37 = vld [vmem:[#allocation21_spill] sm:$0xff]  ;;  %v11771_v35 = vld [vmem:[#allocation23_spill] sm:$0xff]  ;;  %v11780_v43 = vld [vmem:[#allocation58_spill] sm:$0xff] }
 0x7f6   :  { %8487 = vmatprep.subr.bf16.mxu0 %v8486_v16  ;;  %5909 = vmatprep.mubr.f32.mxu0 %v11728_v53  ;;  %v11773_v16 = vld [vmem:[#allocation56_spill] sm:$0xff]  ;;  %v11774_v54 = vld [vmem:[#allocation55_spill] sm:$0xff]  ;;  %v11777_v1 = vld [vmem:[#allocation53_spill] sm:$0xff] }
 0x7f7   :  { %8493 = vmatpush1.bf16.msra.mxu1 %v11758_v61  ;;  %v8496_v36 = vpack.c.bf16 %v6063_v8, %v6059_v38  ;;  %v6243_v11 = vpop.permute.xlu0 %6242  ;;  %5986 = vmatprep.mubr.f32.mxu1 %v11728_v53  ;;  %v8494_v19 = vpack.c.bf16 %v6064_v46, %v6060_v58  ;;  %v11775_v38 = vpack.c.bf16 %v11773_v16, %v11774_v54  ;;  %v7703_v8 = vld [vmem:[%s11544_s4 + $0x68] sm:$0xff]  ;;  %v11798_v16 = vld [vmem:[#allocation67_spill] sm:$0xff]  ;;  %v11799_v54 = vld [vmem:[#allocation65_spill] sm:$0xff] }
 0x7f8   :  { %v6249_v0 = vpop.permute.xlu1 %6248  ;;  %7693 = vmatmul.mubr.msk.f32.gmra.mrb[38].mxu0 %vm5039_vm11, %v7691_v45 }
 0x7f9   :  { %8489 = vmatpush1.bf16.msra.mxu0 %v8488_v22  ;;  %8495 = vmatprep.subr.bf16.mxu1 %v8494_v19  ;;  %v6278_v10 = vsel %vm1302_vm7, %v6241_v41, %v6249_v0  ;;  %v11783_v19 = vld [vmem:[#allocation57_spill] sm:$0xff] }
 0x7fa   :  { %7695 = vmatmul.mubr.msk.f32.gmra.mrb[38].mxu1 %vm5039_vm11, %v7691_v45  ;;  %8499 = vmatprep.subr.bf16.mxu0 %v11759_v40  ;;  %v6292_v47 = vmul.f32 %v6278_v10, %v11769_v12  ;;  %v11779_v45 = vld [vmem:[#allocation60_spill] sm:$0xff] }
 0x7fb   :  { %8497 = vmatpush1.bf16.msra.mxu1 %v8496_v36  ;;  %v6251_v60 = vpop.permute.xlu0 %6250  ;;  %6138 = vmatprep.mubr.f32.mxu0 %v11728_v53  ;;  %v11781_v51 = vpack.c.bf16 %v11779_v45, %v11780_v43 }
 0x7fc   :  { %8507 = vmatprep.subr.bf16.mxu1 %v11762_v24  ;;  %v6257_v5 = vpop.permute.xlu1 %6256  ;;  %7698 = vmatmul.mubr.msk.f32.vlgmr.msra.gmra.mrb[36].mxu0 %vm5039_vm11, %v7696_v32  ;;  %v6279_v7 = vsel %vm1302_vm7, %v6243_v11, %v6251_v60 }
 0x7fd   :  { %6215 = vmatprep.mubr.f32.mxu1 %v11728_v53  ;;  %8501 = vmatpush1.bf16.msra.mxu0 %v11765_v30  ;;  %v6274_v39 = vsel %vm1302_vm7, %v6249_v0, %v6257_v5  ;;  %v6296_v29 = vmul.f32 %v6279_v7, %v11769_v12  ;;  %v11787_v12 = vld [vmem:[#allocation27_spill] sm:$0xff] }
 0x7fe   :  { %7700 = vmatmul.mubr.msk.f32.vlgmr.msra.gmra.mrb[36].mxu1 %vm5039_vm11, %v7696_v32  ;;  %6144 = vmatprep.mubr.f32.mxu0 %v11728_v53  ;;  %v6293_v50 = vmul.f32 %v6274_v39, %v11770_v37 }
 0x7ff   :  { %8509 = vmatpush1.bf16.msra.mxu1 %v11768_v49  ;;  %v6259_v57 = vpop.permute.xlu0 %6258  ;;  %6221 = vmatprep.mubr.f32.mxu1 %v11728_v53  ;;  %v8504_v42 = vpack.c.bf16 %v6296_v29, %v6292_v47 }
 0x800   :  { %v6275_v28 = vsel %vm1302_vm7, %v6251_v60, %v6259_v57  ;;  %v6265_v17 = vpop.permute.xlu1 %6264  ;;  %7699 = vmatmul.mubr.msk.f32.gmra.mrb[38].mxu0 %vm5039_vm11, %v7697_v9  ;;  %v11785_v60 = vld [vmem:[#allocation26_spill] sm:$0xff] }
 0x801   :  { %v6297_v20 = vmul.f32 %v6275_v28, %v11770_v37  ;;  %6373 = vmatprep.mubr.f32.mxu0 %v11728_v53  ;;  %v6270_v48 = vsel %vm1302_vm7, %v6257_v5, %v6265_v17  ;;  %v6282_v31 = vsel %vm1302_vm7, %v6265_v17, %v6241_v41  ;;  %v11776_v41 = vld [vmem:[#allocation54_spill] sm:$0xff]  ;;  %v11786_v5 = vld [vmem:[#allocation25_spill] sm:$0xff]  ;;  %v11788_v28 = vld [vmem:[#allocation24_spill] sm:$0xff] }
 0x802   :  { %7701 = vmatmul.mubr.msk.f32.gmra.mrb[38].mxu1 %vm5039_vm11, %v7697_v9  ;;  %v6294_v34 = vmul.f32 %v6270_v48, %v11771_v35  ;;  %v6295_v3 = vmul.f32 %v6282_v31, %v11772_v63  ;;  %v11778_v58 = vpack.c.bf16 %v11776_v41, %v11777_v1  ;;  %v11789_v31 = vld [vmem:[#allocation64_spill] sm:$0xff]  ;;  %v11801_v41 = vld [vmem:[#allocation30_spill] sm:$0xff] }
 0x803   :  { %v6267_v6 = vpop.permute.xlu0 %6266  ;;  %v8502_v56 = vpack.c.bf16 %v6297_v20, %v6293_v50  ;;  %6450 = vmatprep.mubr.f32.mxu1 %v11728_v53  ;;  %v7708_v20 = vld [vmem:[%s11544_s4 + $0x70] sm:$0xff] }
 0x804   :  { %v6271_v44 = vsel %vm1302_vm7, %v6259_v57, %v6267_v6  ;;  %v6283_v27 = vsel %vm1302_vm7, %v6267_v6, %v6243_v11  ;;  %v6476_v33 = vpop.permute.xlu1 %6475  ;;  %v11782_v11 = vld [vmem:[#allocation59_spill] sm:$0xff] }
 0x805   :  { %v6298_v23 = vmul.f32 %v6271_v44, %v11771_v35  ;;  %v6299_v18 = vmul.f32 %v6283_v27, %v11772_v63  ;;  %8503 = vmatprep.subr.bf16.mxu0 %v8502_v56  ;;  %v11784_v0 = vpack.c.bf16 %v11782_v11, %v11783_v19  ;;  %v11790_v6 = vld [vmem:[#allocation63_spill] sm:$0xff]  ;;  %v11792_v27 = vld [vmem:[#allocation62_spill] sm:$0xff] }
 0x806   :  { %8505 = vmatpush1.bf16.msra.mxu0 %v8504_v42  ;;  %v11791_v56 = vpack.c.bf16 %v11789_v31, %v11790_v6 }
 0x807   :  { %v8512_v2 = vpack.c.bf16 %v6298_v23, %v6294_v34  ;;  %v6478_v25 = vpop.permute.xlu0 %6477  ;;  %8515 = vmatprep.subr.bf16.mxu0 %v11775_v38  ;;  %v8510_v52 = vpack.c.bf16 %v6299_v18, %v6295_v3  ;;  %v7709_v34 = vld [vmem:[%s11544_s4 + $0x78] sm:$0xff]  ;;  %v11795_v3 = vld [vmem:[#allocation68_spill] sm:$0xff]  ;;  %v11800_v38 = vpack.c.bf16 %v11798_v16, %v11799_v54 }
 0x808   :  { %v6484_v15 = vpop.permute.xlu1 %6483  ;;  %v11796_v23 = vld [vmem:[#allocation66_spill] sm:$0xff] }
 0x809   :  { %8511 = vmatprep.subr.bf16.mxu1 %v8510_v52  ;;  %7704 = vmatmul.mubr.msk.f32.vlgmr.msra.gmra.mrb[36].mxu0 %vm5039_vm11, %v7702_v59  ;;  %v6513_v32 = vsel %vm1513_vm8, %v6476_v33, %v6484_v15  ;;  %v11797_v18 = vpack.c.bf16 %v11795_v3, %v11796_v23 }
 0x80a   :  { %8513 = vmatpush1.bf16.msra.mxu1 %v8512_v2  ;;  %8517 = vmatpush1.bf16.msra.mxu0 %v11778_v58  ;;  %v6527_v4 = vmul.f32 %v6513_v32, %v11785_v60 }
 0x80b   :  { %v6486_v46 = vpop.permute.xlu0 %6485  ;;  %8523 = vmatprep.subr.bf16.mxu1 %v11781_v51  ;;  %6379 = vmatprep.mubr.f32.mxu0 %v11728_v53 }
 0x80c   :  { %v6492_v61 = vpop.permute.xlu1 %6491  ;;  %v6514_v22 = vsel %vm1513_vm8, %v6478_v25, %v6486_v46 }
 0x80d   :  { %7706 = vmatmul.mubr.msk.f32.vlgmr.msra.gmra.mrb[36].mxu1 %vm5039_vm11, %v7702_v59  ;;  %7705 = vmatmul.mubr.msk.f32.gmra.mrb[38].mxu0 %vm5039_vm11, %v7703_v8  ;;  %v6509_v36 = vsel %vm1513_vm8, %v6484_v15, %v6492_v61  ;;  %v6531_v14 = vmul.f32 %v6514_v22, %v11785_v60 }
 0x80e   :  { %8525 = vmatpush1.bf16.msra.mxu1 %v11784_v0  ;;  %6456 = vmatprep.mubr.f32.mxu1 %v11728_v53  ;;  %v6528_v7 = vmul.f32 %v6509_v36, %v11786_v5 }
 0x80f   :  { %v6494_v40 = vpop.permute.xlu0 %6493  ;;  %6608 = vmatprep.mubr.f32.mxu0 %v11728_v53  ;;  %v8520_v26 = vpack.c.bf16 %v6531_v14, %v6527_v4  ;;  %v11804_v14 = vld [vmem:[#allocation28_spill] sm:$0xff] }
 0x810   :  { %v6510_v62 = vsel %vm1513_vm8, %v6486_v46, %v6494_v40  ;;  %v6500_v24 = vpop.permute.xlu1 %6499  ;;  %v11802_v46 = vld [vmem:[#allocation29_spill] sm:$0xff] }
 0x811   :  { %v6532_v21 = vmul.f32 %v6510_v62, %v11786_v5  ;;  %7707 = vmatmul.mubr.msk.f32.gmra.mrb[38].mxu1 %vm5039_vm11, %v7703_v8  ;;  %v6505_v30 = vsel %vm1513_vm8, %v6492_v61, %v6500_v24  ;;  %v6517_v9 = vsel %vm1513_vm8, %v6500_v24, %v6476_v33  ;;  %v11793_v33 = vld [vmem:[#allocation61_spill] sm:$0xff] }
 0x812   :  { %6685 = vmatprep.mubr.f32.mxu1 %v11728_v53  ;;  %v6529_v29 = vmul.f32 %v6505_v30, %v11787_v12  ;;  %v6530_v17 = vmul.f32 %v6517_v9, %v11788_v28  ;;  %v11794_v35 = vpack.c.bf16 %v11792_v27, %v11793_v33  ;;  %v11805_v30 = vmov 1.0|1.0  }
 0x813   :  { %v6502_v39 = vpop.permute.xlu0 %6501  ;;  %v8518_v10 = vpack.c.bf16 %v6532_v21, %v6528_v7  ;;  %v7714_v7 = vld [vmem:[%s11544_s4 + $0x80] sm:$0xff] }
 0x814   :  { %v6506_v55 = vsel %vm1513_vm8, %v6494_v40, %v6502_v39  ;;  %v6518_v49 = vsel %vm1513_vm8, %v6502_v39, %v6478_v25  ;;  %v6711_v57 = vpop.permute.xlu1 %6710  ;;  %v11803_v40 = vld [vmem:[#allocation31_spill] sm:$0xff] }
 0x815   :  { %v6533_v37 = vmul.f32 %v6506_v55, %v11787_v12  ;;  %v6534_v50 = vmul.f32 %v6518_v49, %v11788_v28  ;;  %8519 = vmatprep.subr.bf16.mxu0 %v8518_v10 }
 0x816   :  { %8521 = vmatpush1.bf16.msra.mxu0 %v8520_v26 }
 0x817   :  { %v8528_v47 = vpack.c.bf16 %v6533_v37, %v6529_v29  ;;  %v6713_v48 = vpop.permute.xlu0 %6712  ;;  %8531 = vmatprep.subr.bf16.mxu0 %v11791_v56  ;;  %v8526_v42 = vpack.c.bf16 %v6534_v50, %v6530_v17 }
 0x818   :  { %v6719_v44 = vpop.permute.xlu1 %6718 }
 0x819   :  { %8527 = vmatprep.subr.bf16.mxu1 %v8526_v42  ;;  %7710 = vmatmul.mubr.msk.f32.vlgmr.msra.gmra.mrb[36].mxu0 %vm5039_vm11, %v7708_v20  ;;  %v6748_v52 = vsel %vm1724_vm9, %v6711_v57, %v6719_v44 }
 0x81a   :  { %8529 = vmatpush1.bf16.msra.mxu1 %v8528_v47  ;;  %8533 = vmatpush1.bf16.msra.mxu0 %v11794_v35  ;;  %v6762_v51 = vmul.f32 %v6748_v52, %v11801_v41 }
 0x81b   :  { %v6721_v63 = vpop.permute.xlu0 %6720  ;;  %8539 = vmatprep.subr.bf16.mxu1 %v11797_v18  ;;  %6614 = vmatprep.mubr.f32.mxu0 %v11728_v53 }
 0x81c   :  { %v6727_v59 = vpop.permute.xlu1 %6726  ;;  %v6749_v2 = vsel %vm1724_vm9, %v6713_v48, %v6721_v63 }
 0x81d   :  { %7712 = vmatmul.mubr.msk.f32.vlgmr.msra.gmra.mrb[36].mxu1 %vm5039_vm11, %v7708_v20  ;;  %7711 = vmatmul.mubr.msk.f32.gmra.mrb[38].mxu0 %vm5039_vm11, %v7709_v34  ;;  %v6744_v25 = vsel %vm1724_vm9, %v6719_v44, %v6727_v59  ;;  %v6766_v1 = vmul.f32 %v6749_v2, %v11801_v41 }
 0x81e   :  { %8541 = vmatpush1.bf16.msra.mxu1 %v11800_v38  ;;  %6691 = vmatprep.mubr.f32.mxu1 %v11728_v53  ;;  %v6763_v45 = vmul.f32 %v6744_v25, %v11802_v46 }
 0x81f   :  { %v6729_v15 = vpop.permute.xlu0 %6728  ;;  %6843 = vmatprep.mubr.f32.mxu0 %v11728_v53  ;;  %v8536_v19 = vpack.c.bf16 %v6766_v1, %v6762_v51 }
 0x820   :  { %v6745_v58 = vsel %vm1724_vm9, %v6721_v63, %v6729_v15  ;;  %v6735_v8 = vpop.permute.xlu1 %6734 }
 0x821   :  { %v6767_v43 = vmul.f32 %v6745_v58, %v11802_v46  ;;  %7713 = vmatmul.mubr.msk.f32.gmra.mrb[38].mxu1 %vm5039_vm11, %v7709_v34  ;;  %v6740_v61 = vsel %vm1724_vm9, %v6727_v59, %v6735_v8  ;;  %v6752_v22 = vsel %vm1724_vm9, %v6735_v8, %v6711_v57 }
 0x822   :  { %6920 = vmatprep.mubr.f32.mxu1 %v11728_v53  ;;  %v6764_v60 = vmul.f32 %v6740_v61, %v11803_v40  ;;  %v6765_v62 = vmul.f32 %v6752_v22, %v11804_v14 }
 0x823   :  { %v6737_v36 = vpop.permute.xlu0 %6736  ;;  %v8534_v11 = vpack.c.bf16 %v6767_v43, %v6763_v45 }
 0x824   :  { %v6741_v0 = vsel %vm1724_vm9, %v6729_v15, %v6737_v36  ;;  %v6753_v32 = vsel %vm1724_vm9, %v6737_v36, %v6713_v48 }
 0x825   :  { %v6768_v24 = vmul.f32 %v6741_v0, %v11803_v40  ;;  %v6769_v5 = vmul.f32 %v6753_v32, %v11804_v14  ;;  %8535 = vmatprep.subr.bf16.mxu0 %v8534_v11 }
 0x826   :  { %8537 = vmatpush1.bf16.msra.mxu0 %v8536_v19 }
 0x827   :  { %v8544_v21 = vpack.c.bf16 %v6768_v24, %v6764_v60  ;;  %v8542_v4 = vpack.c.bf16 %v6769_v5, %v6765_v62  ;;  %8546 = vmatprep.subr.bf16.mxu0 %v11805_v30  ;;  %v74_v62 = vld [vmem:[%s11542_s6 + $0x60] sm:$0xff] }
 0x829   :  { %7716 = vmatmul.mubr.msk.f32.vlgmr.msra.gmra.mrb[36].mxu0 %vm5039_vm11, %v7714_v7  ;;  %8543 = vmatprep.subr.bf16.mxu1 %v8542_v4 }
 0x82a   :  { %8545 = vmatpush1.bf16.msra.mxu1 %v8544_v21  ;;  %6849 = vmatprep.mubr.f32.mxu0 %v11728_v53  ;;  %v76_v21 = vld [vmem:[%s11542_s6 + $0x70] sm:$0xff] }
 0x82b   :  { %8547 = vmatpush3.bf16.msra.mxu0 %v11805_v30  ;;  %8562 = vmatprep.subr.bf16.mxu1 %v11805_v30 }
 0x82c   :  { %8548 = vmatprep.subr.bf16.mxu0 %v11805_v30 }
 0x82d   :  { %7717 = vmatmul.mubr.msk.f32.gmra.mrb[38].mxu0 %vm5039_vm11, %v7715_v13  ;;  %7718 = vmatmul.mubr.msk.f32.vlgmr.msra.gmra.mrb[36].mxu1 %vm5039_vm11, %v7714_v7  ;;  %v75_v7 = vld [vmem:[%s11542_s6 + $0x68] sm:$0xff] }
 0x82e   :  { %6926 = vmatprep.mubr.f32.mxu1 %v11728_v53  ;;  %8563 = vmatpush3.bf16.msra.mxu1 %v11805_v30 }
 0x82f   :  { %8549 = vmatpush3.bf16.msra.mxu0 %v11805_v30  ;;  %8564 = vmatprep.subr.bf16.mxu1 %v11805_v30 }
 0x830   :  { %8550 = vmatprep.subr.bf16.mxu0 %v11805_v30 }
 0x831   :  { %7719 = vmatmul.mubr.msk.f32.gmra.mrb[38].mxu1 %vm5039_vm11, %v7715_v13 }
 0x832   :  { %8565 = vmatpush3.bf16.msra.mxu1 %v11805_v30 }
 0x833   :  { %8551 = vmatpush3.bf16.msra.mxu0 %v11805_v30  ;;  %8566 = vmatprep.subr.bf16.mxu1 %v11805_v30 }
 0x834   :  { %8552 = vmatprep.subr.bf16.mxu0 %v11805_v30 }
 0x836   :  { %8567 = vmatpush3.bf16.msra.mxu1 %v11805_v30 }
 0x837   :  { %8553 = vmatpush3.bf16.msra.mxu0 %v11805_v30  ;;  %8568 = vmatprep.subr.bf16.mxu1 %v11805_v30 }
 0x838   :  { %8554 = vmatprep.subr.bf16.mxu0 %v11805_v30 }
 0x83a   :  { %8569 = vmatpush3.bf16.msra.mxu1 %v11805_v30 }
 0x83b   :  { %8555 = vmatpush3.bf16.msra.mxu0 %v11805_v30  ;;  %8570 = vmatprep.subr.bf16.mxu1 %v11805_v30 }
 0x83c   :  { %8556 = vmatprep.subr.bf16.mxu0 %v11805_v30 }
 0x83e   :  { %8571 = vmatpush3.bf16.msra.mxu1 %v11805_v30 }
 0x83f   :  { %8557 = vmatpush3.bf16.msra.mxu0 %v11805_v30  ;;  %8572 = vmatprep.subr.bf16.mxu1 %v11805_v30 }
 0x840   :  { %8558 = vmatprep.subr.bf16.mxu0 %v11805_v30 }
 0x842   :  { %8573 = vmatpush3.bf16.msra.mxu1 %v11805_v30 }
 0x843   :  { %8559 = vmatpush3.bf16.msra.mxu0 %v11805_v30  ;;  %8574 = vmatprep.subr.bf16.mxu1 %v11805_v30 }
 0x844   :  { %8560 = vmatprep.subr.bf16.mxu0 %v11805_v30 }
 0x846   :  { %8575 = vmatpush3.bf16.msra.mxu1 %v11805_v30 }
 0x847   :  { %8561 = vmatpush3.bf16.msra.mxu0 %v11805_v30  ;;  %8576 = vmatprep.subr.bf16.mxu1 %v11805_v30 }
 0x848   :  { %8578 = vmatprep.subr.bf16.mxu0 %v11805_v30 }
 0x84a   :  { %8577 = vmatpush3.bf16.msra.mxu1 %v11805_v30 }
 0x84b   :  { %8594 = vmatprep.subr.bf16.mxu1 %v11805_v30 }
 0x8fc   :  { %v11434_v9 = vpop.f32.mrb[36].mxu0 }
 0x8fd   :  { %v11436_v39 = vpop.f32.mrb[37].mxu0  ;;  %v7091_v17 = vmul.f32 %v11434_v9, %v11434_v9 }
 0x8fe   :  { %7005 = vmatprep.mubr.f32.mxu0 %v11436_v39  ;;  %v7092_v57 = vmul.f32 %v11436_v39, %v11436_v39 }
 0x8ff   :  { %7006 = vmatmul.mubr.f32.vlgmr.msra.gmra.mrb[40].mxu0 %v11434_v9 }
 0x900   :  { %8579 = vmatpush3.bf16.msra.mxu0 %v11805_v30  ;;  %v11441_v10 = vpop.f32.mrb[38].mxu0  ;;  %v11443_v26 = vpop.f32.mrb[36].mxu1 }
 0x901   :  { %v11445_v55 = vpop.f32.mrb[39].mxu0  ;;  %v11447_v49 = vpop.f32.mrb[37].mxu1  ;;  %8580 = vmatprep.subr.bf16.mxu0 %v11805_v30  ;;  %v7095_v50 = vmul.f32 %v11441_v10, %v11441_v10  ;;  %v7093_v20 = vmul.f32 %v11443_v26, %v11443_v26 }
 0x902   :  { %7010 = vmatprep.mubr.f32.mxu0 %v11445_v55  ;;  %7080 = vmatprep.mubr.f32.mxu1 %v11447_v49  ;;  %v7094_v28 = vmul.f32 %v11447_v49, %v11447_v49  ;;  %v7096_v37 = vmul.f32 %v11445_v55, %v11445_v55 }
 0x903   :  { %7011 = vmatmul.mubr.f32.gmra.mrb[42].mxu0 %v11441_v10  ;;  %7081 = vmatmul.mubr.f32.vlgmr.msra.gmra.mrb[40].mxu1 %v11443_v26 }
 0x904   :  { %8581 = vmatpush3.bf16.msra.mxu0 %v11805_v30  ;;  %8595 = vmatpush3.bf16.msra.mxu1 %v11805_v30  ;;  %v11458_v12 = vpop.f32.mrb[38].mxu1 }
 0x905   :  { %7163 = vmatprep.mubr.f32.mxu0 %v7092_v57  ;;  %v11460_v29 = vpop.f32.mrb[39].mxu1  ;;  %8582 = vmatprep.subr.bf16.mxu0 %v11805_v30  ;;  %v7097_v48 = vmul.f32 %v11458_v12, %v11458_v12 }
 0x906   :  { %7085 = vmatprep.mubr.f32.mxu1 %v11460_v29  ;;  %8596 = vmatprep.subr.bf16.mxu1 %v11805_v30  ;;  %v7098_v47 = vmul.f32 %v11460_v29, %v11460_v29 }
 0x907   :  { %7086 = vmatmul.mubr.f32.gmra.mrb[42].mxu1 %v11458_v12 }
 0x908   :  { %8583 = vmatpush3.bf16.msra.mxu0 %v11805_v30  ;;  %8597 = vmatpush3.bf16.msra.mxu1 %v11805_v30 }
 0x909   :  { %7238 = vmatprep.mubr.f32.mxu1 %v7094_v28  ;;  %8584 = vmatprep.subr.bf16.mxu0 %v11805_v30  ;;  %v77_v28 = vld [vmem:[%s11542_s6 + $0x78] sm:$0xff] }
 0x90a   :  { %8598 = vmatprep.subr.bf16.mxu1 %v11805_v30 }
 0x90c   :  { %8585 = vmatpush3.bf16.msra.mxu0 %v11805_v30  ;;  %8599 = vmatpush3.bf16.msra.mxu1 %v11805_v30 }
 0x90d   :  { %8586 = vmatprep.subr.bf16.mxu0 %v11805_v30  ;;  %8600 = vmatprep.subr.bf16.mxu1 %v11805_v30 }
 0x910   :  { %8587 = vmatpush3.bf16.msra.mxu0 %v11805_v30  ;;  %8601 = vmatpush3.bf16.msra.mxu1 %v11805_v30 }
 0x911   :  { %8588 = vmatprep.subr.bf16.mxu0 %v11805_v30  ;;  %8602 = vmatprep.subr.bf16.mxu1 %v11805_v30 }
 0x914   :  { %8589 = vmatpush3.bf16.msra.mxu0 %v11805_v30  ;;  %8603 = vmatpush3.bf16.msra.mxu1 %v11805_v30 }
 0x915   :  { %8590 = vmatprep.subr.bf16.mxu0 %v11805_v30  ;;  %8604 = vmatprep.subr.bf16.mxu1 %v11805_v30 }
 0x918   :  { %8591 = vmatpush3.bf16.msra.mxu0 %v11805_v30  ;;  %8605 = vmatpush3.bf16.msra.mxu1 %v11805_v30 }
 0x919   :  { %8592 = vmatprep.subr.bf16.mxu0 %v11805_v30  ;;  %8606 = vmatprep.subr.bf16.mxu1 %v11805_v30 }
 0x91c   :  { %8593 = vmatpush3.bf16.msra.mxu0 %v11805_v30  ;;  %8607 = vmatpush3.bf16.msra.mxu1 %v11805_v30 }
 0x91d   :  { %8608 = vmatprep.subr.bf16.mxu1 %v11805_v30 }
 0x91f   :  { %7164 = vmatmul.mubr.f32.vlgmr.msra.gmra.mrb[44].mxu0 %v7091_v17 }
 0x920   :  { %7168 = vmatprep.mubr.f32.mxu0 %v7096_v37  ;;  %8609 = vmatpush3.bf16.msra.mxu1 %v11805_v30  ;;  %v78_v37 = vld [vmem:[%s11542_s6 + $0x80] sm:$0x1] }
 0x923   :  { %7169 = vmatmul.mubr.f32.gmra.mrb[46].mxu0 %v7095_v50  ;;  %7239 = vmatmul.mubr.f32.vlgmr.msra.gmra.mrb[44].mxu1 %v7093_v20 }
 0x924   :  { %7243 = vmatprep.mubr.f32.mxu1 %v7098_v47  ;;  %7386 = vmatprep.mubr.f32.mxu0 %v11728_v53 }
 0x927   :  { %7244 = vmatmul.mubr.f32.gmra.mrb[46].mxu1 %v7097_v48 }
 0x928   :  { %7457 = vmatprep.mubr.f32.mxu1 %v11728_v53 }
 0x9d2   :  { %v8082_v31 = vpop.f32.mrb[40].mxu0 }
 0x9d3   :  { %v8083_v6 = vpop.f32.mrb[41].mxu0 }
 0x9d4   :  { %v8084_v56 = vadd.f32 %v8083_v6, %v8082_v31 }
 0x9d6   :  { %v8085_v42 = vpop.f32.mrb[42].mxu0  ;;  %v8120_v44 = vpop.f32.mrb[40].mxu1 }
 0x9d7   :  { %v8086_v27 = vpop.f32.mrb[43].mxu0  ;;  %v8121_v33 = vpop.f32.mrb[41].mxu1 }
 0x9d8   :  { %v8087_v35 = vadd.f32 %v8086_v27, %v8085_v42  ;;  %v8122_v34 = vadd.f32 %v8121_v33, %v8120_v44 }
 0x9da   :  { %v7083_v63 = vadd.f32 %v8122_v34, %v8084_v56  ;;  %v8123_v3 = vpop.f32.mrb[42].mxu1 }
 0x9db   :  { %v8124_v23 = vpop.f32.mrb[43].mxu1 }
 0x9dc   :  { %v8125_v18 = vadd.f32 %v8124_v23, %v8123_v3  ;;  %v7249_v15 = vmul.f32 0.001953125, %v7083_v63 }
 0x9de   :  { %v7088_v59 = vadd.f32 %v8125_v18, %v8087_v35  ;;  %v7253_v45 = vmul.f32 %v7249_v15, %v7249_v15 }
 0x9e0   :  { %v7250_v43 = vmul.f32 0.001953125, %v7088_v59 }
 0x9e2   :  { %v7254_v11 = vmul.f32 %v7250_v43, %v7250_v43 }
 0x9f2   :  { %v8158_v2 = vpop.f32.mrb[44].mxu0 }
 0x9f3   :  { %v8159_v25 = vpop.f32.mrb[45].mxu0 }
 0x9f4   :  { %v8160_v16 = vadd.f32 %v8159_v25, %v8158_v2 }
 0x9f6   :  { %v8161_v54 = vpop.f32.mrb[46].mxu0  ;;  %v8196_v38 = vpop.f32.mrb[44].mxu1 }
 0x9f7   :  { %v8162_v53 = vpop.f32.mrb[47].mxu0  ;;  %v8197_v52 = vpop.f32.mrb[45].mxu1 }
 0x9f8   :  { %v8163_v41 = vadd.f32 %v8162_v53, %v8161_v54  ;;  %v8198_v1 = vadd.f32 %v8197_v52, %v8196_v38 }
 0x9fa   :  { %v7241_v58 = vadd.f32 %v8198_v1, %v8160_v16  ;;  %v8199_v8 = vpop.f32.mrb[46].mxu1 }
 0x9fb   :  { %v8200_v46 = vpop.f32.mrb[47].mxu1 }
 0x9fc   :  { %v7251_v51 = vmul.f32 0.001953125, %v7241_v58  ;;  %v8201_v61 = vadd.f32 %v8200_v46, %v8199_v8 }
 0x9fe   :  { %v7255_v22 = vsub.f32 %v7251_v51, %v7253_v45  ;;  %v7246_v36 = vadd.f32 %v8201_v61, %v8163_v41 }
 0xa00   :  { %v7257_v19 = vmax.f32 %v7255_v22, 0.0  ;;  %v7252_v0 = vmul.f32 0.001953125, %v7246_v36 }
 0xa02   :  { %v7259_v32 = vadd.f32 1e-05, %v7257_v19  ;;  %v7256_v40 = vsub.f32 %v7252_v0, %v7254_v11  ;;  %v11806_v11 = vld [vmem:[#allocation3_spill] sm:$0xff] }
 0xa04   :  { %8900 = vrsqrt.f32 %v7259_v32  ;;  %v7258_v60 = vmax.f32 %v7256_v40, 0.0 }
 0xa06   :  { %v7260_v14 = vadd.f32 1e-05, %v7258_v60 }
 0xa08   :  { %8902 = vrsqrt.f32 %v7260_v14 }
 0xa0e   :  { %v8901_v24 = vpop.eup %8900 }
 0xa0f   :  { %v7263_v5 = vmul.f32 %v8901_v24, %v74_v62  ;;  %v11807_v24 = vlaneseq }
 0xa11   :  { %7271 = vperm.xlu1 %8887, %v7263_v5   ;;  %v7265_v4 = vmul.f32 %v7263_v5, %v7249_v15  ;;  %vm7493_vm12 = vcmp.lt.s32.totalorder %v11807_v24, 512 }
 0xa12   :  { %v8903_v30 = vpop.eup %8902 }
 0xa13   :  { %v7264_v13 = vmul.f32 %v8903_v30, %v75_v7  ;;  %v7267_v57 = vsub.f32 %v76_v21, %v7265_v4 }
 0xa15   :  { %7276 = vperm.xlu0 %8886, %v7264_v13   ;;  %7289 = vperm.xlu1 %8887, %v7267_v57   ;;  %v7266_v17 = vmul.f32 %v7264_v13, %v7250_v43 }
 0xa17   :  { %v7268_v50 = vsub.f32 %v77_v28, %v7266_v17 }
 0xa19   :  { %7294 = vperm.xlu0 %8886, %v7268_v50   ;;  %7316 = vperm.xlu1 %8887, %v78_v37  }
 0xa90   :  { %v7272_v20 = vpop.permute.xlu1 %7271 }
 0xa91   :  { %v7279_v47 = vmul.f32 %v7272_v20, %v11434_v9  ;;  %v7280_v48 = vmul.f32 %v7272_v20, %v11436_v39  ;;  %v7281_v31 = vmul.f32 %v7272_v20, %v11443_v26  ;;  %v7282_v6 = vmul.f32 %v7272_v20, %v11447_v49 }
 0xa94   :  { %v7277_v56 = vpop.permute.xlu0 %7276  ;;  %v7290_v42 = vpop.permute.xlu1 %7289 }
 0xa95   :  { %v7297_v44 = vadd.f32 %v7290_v42, %v7279_v47  ;;  %v7298_v27 = vadd.f32 %v7290_v42, %v7280_v48  ;;  %v7299_v33 = vadd.f32 %v7290_v42, %v7281_v31  ;;  %v7300_v35 = vadd.f32 %v7290_v42, %v7282_v6 }
 0xa96   :  { %v7283_v34 = vmul.f32 %v7277_v56, %v11441_v10  ;;  %v7284_v63 = vmul.f32 %v7277_v56, %v11445_v55  ;;  %v7285_v3 = vmul.f32 %v7277_v56, %v11458_v12  ;;  %v7286_v9 = vmul.f32 %v7277_v56, %v11460_v29  ;;  %v7313_v12 = vld [vmem:[%s11545_s5] sm:$0x1] }
 0xa97   :  { %v7305_v49 = vmax.f32 %v7297_v44, 0.0  ;;  %v7307_v2 = vmax.f32 %v7299_v33, 0.0  ;;  %v7306_v25 = vmax.f32 %v7298_v27, 0.0  ;;  %v7308_v16 = vmax.f32 %v7300_v35, 0.0 }
 0xa98   :  { %v7295_v23 = vpop.permute.xlu0 %7294  ;;  %v8915_v29 = vmov 1966171168   ;;  %v7317_v8 = vpop.permute.xlu1 %7316 }
 0xa99   :  { %v7301_v39 = vadd.f32 %v7295_v23, %v7283_v34  ;;  %v7302_v18 = vadd.f32 %v7295_v23, %v7284_v63  ;;  %v7303_v26 = vadd.f32 %v7295_v23, %v7285_v3  ;;  %v7304_v59 = vadd.f32 %v7295_v23, %v7286_v9 }
 0xa9a   :  { %v7471_v1 = vunpack.c.l.s4 %v8915_v29 }
 0xa9b   :  { %v7309_v54 = vmax.f32 %v7301_v39, 0.0  ;;  %v7310_v38 = vmax.f32 %v7302_v18, 0.0  ;;  %v7311_v53 = vmax.f32 %v7303_v26, 0.0  ;;  %v7312_v52 = vmax.f32 %v7304_v59, 0.0 }
 0xa9c   :  { %v7472_v58 = vunpack.c.0.s8 %v7471_v1 }
 0xa9d   :  { %v8612_v10 = vpack.c.bf16 %v7309_v54, %v7305_v49  ;;  %v8616_v15 = vpack.c.bf16 %v7311_v53, %v7307_v2  ;;  %v8610_v55 = vpack.c.bf16 %v7310_v38, %v7306_v25  ;;  %v8614_v41 = vpack.c.bf16 %v7312_v52, %v7308_v16 }
 0xa9e   :  { %v7475_v19 = vsub.s32 %v7472_v58, %v11806_v11 }
 0xa9f   :  { %8611 = vmatprep.subr.bf16.mxu0 %v8610_v55  ;;  %8615 = vmatprep.subr.bf16.mxu1 %v8614_v41 }
 0xaa0   :  { %8613 = vmatpush1.bf16.msra.mxu0 %v8612_v10  ;;  %8617 = vmatpush1.bf16.msra.mxu1 %v8616_v15 }
 0xaa3   :  { %7720 = vmatmul.mubr.msk.f32.vlgmr.msra.gmra.mrb[48].mxu0 %vm2372_vm10, %v7313_v12  ;;  %7721 = vmatmul.mubr.msk.f32.vlgmr.msra.gmra.mrb[48].mxu1 %vm2372_vm10, %v7313_v12 }
 0xb76   :  { %v7388_v46 = vpop.f32.mrb[48].mxu0  ;;  %v7459_v45 = vpop.f32.mrb[48].mxu1 }
 0xb77   :  { %v7389_v43 = vadd.f32 %v7388_v46, %v7317_v8  ;;  %v7460_v51 = vadd.f32 %v7459_v45, %v7317_v8  ;;  %v7390_v61 = vpop.f32.mrb[49].mxu0  ;;  %v7461_v22 = vpop.f32.mrb[49].mxu1 }
 0xb78   :  { %v7391_v36 = vadd.f32 %v7390_v61, %v7317_v8  ;;  %v7462_v0 = vadd.f32 %v7461_v22, %v7317_v8 }
 0xb7a   :  { %v7468_v32 = vcombine.low %v7389_v43, %v7391_v36  ;;  %v7469_v40 = vcombine.low %v7460_v51, %v7462_v0 }
 0xb7c   :  { %v7476_v60 = vrot.slane %v7468_v32, %v7475_v19  ;;  %v7483_v14 = vrot.slane %v7469_v40, %v7475_v19 }
 0xb7e   :  { %v7484_v62 = vcombine.low %v7476_v60, %v7483_v14 }
 0xb80   :  { %v7491_v5 = vrot.slane %v7484_v62, %v7475_v19 }
 0xb82   :  { %7495 = vst.msk [vmem:[%s11546_s7] sm:$0xf] %vm7493_vm12, %v7491_v5 }

</bundles_post_ra>
